<compile_context>
chip_gen: v7x
topology: tpu7x:2x2x1
jax: 0.10.0
libtpu: 0.0.40
codegen_flags: <defaults>
</compile_context>

<pallas_src>
import functools

import jax
import jax.numpy as jnp
from jax.experimental import pallas as pl
from jax.experimental.pallas import tpu as pltpu

EPS = 1e-5
KSIZE = 3
LANE = 128


# ------------------------------- Pallas kernel ------------------------------ #
def _make_block_kernel(stride, equal_in_out, h_s, w_s, ho, wo, cin, cout_p, bt):
    """Fused BasicBlock kernel. One grid step processes `bt` images."""
    s = stride
    eb = 1 if s == 1 else 0                     # bottom/right pad needed only for s == 1
    hp1, wp1 = h_s + 1 + eb, w_s + 1 + eb       # per-phase padded conv1 scratch dims
    m = bt * ho * wo
    f32, bf16 = jnp.float32, jnp.bfloat16

    def kernel(x_ref, w1_ref, w2_ref, ws_ref, s1_ref, b1_ref, s2_ref, b2_ref,
               o_ref, a1p_ref, o1p_ref):
        # ---- zero ONLY the 1-pixel padding borders of the two scratches.
        # Done each step (cheap thin stores) so it stays correct regardless of
        # how the "parallel" grid is split across TensorCores; the interiors
        # are fully rewritten below, so no stale data can leak in.
        zrow1 = jnp.zeros((bt, s, s, 1, wp1, cin), bf16)
        zcol1 = jnp.zeros((bt, s, s, hp1, 1, cin), bf16)
        a1p_ref[:, :, :, pl.ds(0, 1), :, :] = zrow1
        a1p_ref[:, :, :, :, pl.ds(0, 1), :] = zcol1
        if eb:
            a1p_ref[:, :, :, pl.ds(hp1 - 1, 1), :, :] = zrow1
            a1p_ref[:, :, :, :, pl.ds(wp1 - 1, 1), :] = zcol1
        zrow2 = jnp.zeros((bt, 1, wo + 2, cout_p), bf16)
        zcol2 = jnp.zeros((bt, ho + 2, 1, cout_p), bf16)
        o1p_ref[:, pl.ds(0, 1), :, :] = zrow2
        o1p_ref[:, pl.ds(ho + 1, 1), :, :] = zrow2
        o1p_ref[:, :, pl.ds(0, 1), :] = zcol2
        o1p_ref[:, :, pl.ds(wo + 1, 1), :] = zcol2

        # ---- bn1 + relu1 (f32 math), single cast to bf16 for everything below
        xv = x_ref[...]                                       # (bt, s, s, h/s, w/s, cin) f32
        act = jnp.maximum(xv * s1_ref[...] + b1_ref[...], 0.0).astype(bf16)
        a1p_ref[:, :, :, pl.ds(1, h_s), pl.ds(1, w_s), :] = act

        # ---- shortcut: a single (M, cin) @ (cin, cout_p) MXU dot.
        #  * equalInOut : ws is a zero-padded identity, operand is the raw x
        #  * otherwise  : ws is the 1x1 convShortcut weight, operand is
        #                 relu(bn1(x)) sampled at stride s (= phase (0, 0))
        if equal_in_out:
            sc_in = xv[:, 0, 0].astype(bf16)                  # (bt, ho, wo, cin)
        else:
            sc_in = act[:, 0, 0]                              # (bt, ho, wo, cin)
        acc = jnp.dot(sc_in.reshape(m, cin), ws_ref[...],
                      preferred_element_type=f32)             # (m, cout_p)

        # ---- conv1: 3x3 / stride s / pad 1 as 9 accumulated per-tap MXU dots
        acc1 = jnp.zeros((m, cout_p), f32)
        for kh in range(KSIZE):
            rh = (kh - 1) % s
            ph = 1 + (kh - 1 - rh) // s
            for kw in range(KSIZE):
                rw = (kw - 1) % s
                pw = 1 + (kw - 1 - rw) // s
                win = a1p_ref[:, pl.ds(rh, 1), pl.ds(rw, 1),
                              pl.ds(ph, ho), pl.ds(pw, wo), :]
                acc1 = acc1 + jnp.dot(win.reshape(m, cin),
                                      w1_ref[kh * KSIZE + kw],
                                      preferred_element_type=f32)

        # ---- bn2 + relu2 (padded cout lanes stay exactly zero)
        o1 = jnp.maximum(acc1 * s2_ref[...] + b2_ref[...], 0.0).astype(bf16)
        # TODO(synk): F.dropout (droprate > 0) not implemented; module default droprate=0.0.
        o1p_ref[:, pl.ds(1, ho), pl.ds(1, wo), :] = o1.reshape(bt, ho, wo, cout_p)

        # ---- conv2: 3x3 / stride 1 / pad 1, accumulated straight onto shortcut
        for kh in range(KSIZE):
            for kw in range(KSIZE):
                win = o1p_ref[:, pl.ds(kh, ho), pl.ds(kw, wo), :]
                acc = acc + jnp.dot(win.reshape(m, cout_p),
                                    w2_ref[kh * KSIZE + kw],
                                    preferred_element_type=f32)

        # ---- single lane-dense f32 store of the block result
        o_ref[...] = acc.reshape(bt, ho, wo, cout_p)

    return kernel


# -------------------------------- wrapper ----------------------------------- #
def _pick_batch_tile(n, per_image_bytes, ho, wo):
    """Images per grid step: target MXU M >= 256, keep >= 2 'parallel' grid
    steps when possible (v7x has 2 TensorCores), stay under a conservative
    VMEM budget (v7x has only 64 MiB per TensorCore)."""
    budget = 24 * 1024 * 1024
    bt = max(1, min(n, -(-256 // max(1, ho * wo))))
    bt = min(bt, max(1, budget // max(1, per_image_bytes)))
    if n >= 2:
        bt = min(bt, max(1, n // 2))
    bt = max(1, bt)
    while n % bt:
        bt -= 1
    return bt


@functools.partial(jax.jit, static_argnums=(2, 3))
def basic_block_forward(x_nchw, params, stride, equal_in_out):
    """Pallas TPU implementation of BasicBlock.forward (inference-mode BN)."""
    n, cin, h, w = x_nchw.shape
    s = int(stride)
    if equal_in_out and s != 1:
        raise ValueError("equalInOut requires stride == 1 for the residual add")
    if h % s or w % s:
        # TODO(synk): odd spatial dims with stride > 1 not supported by the
        # phase layout; WRN/CIFAR shapes are always divisible.
        raise ValueError("spatial dims must be divisible by the stride")

    cout = params["w1"].shape[0]
    cout_p = -(-cout // LANE) * LANE            # lane-dense padded output channels
    pad_c = cout_p - cout
    h_s, w_s = h // s, w // s
    ho, wo = h_s, w_s                           # 3x3 / pad 1 conv output size

    x = x_nchw.astype(jnp.float32)
    # NCHW -> (N, sh, sw, H/s, W/s, C) in one fused transpose; for stride 1
    # this is just the NHWC transpose (no extra HBM pass for the phase split).
    if s == 1:
        xph = jnp.transpose(x, (0, 2, 3, 1)).reshape(n, 1, 1, h, w, cin)
    else:
        xph = jnp.transpose(x.reshape(n, cin, h_s, s, w_s, s), (0, 3, 5, 2, 4, 1))

    # Fold BN running stats into per-channel scale/bias (inference mode).
    s1 = params["gamma1"] / jnp.sqrt(params["var1"] + EPS)
    b1 = params["beta1"] - params["mean1"] * s1
    s2 = params["gamma2"] / jnp.sqrt(params["var2"] + EPS)
    b2 = params["beta2"] - params["mean2"] * s2
    s1r, b1r = s1.reshape(1, cin), b1.reshape(1, cin)
    s2r = jnp.pad(s2, (0, pad_c)).reshape(1, cout_p)
    b2r = jnp.pad(b2, (0, pad_c)).reshape(1, cout_p)

    # Conv weights as per-tap (Cin, Cout_p) bf16 matmul operands, zero-padded
    # in the output-channel (lane) dim.
    w1m = jnp.pad(jnp.transpose(params["w1"], (2, 3, 1, 0)).reshape(9, cin, cout),
                  ((0, 0), (0, 0), (0, pad_c))).astype(jnp.bfloat16)
    w2m = jnp.pad(jnp.transpose(params["w2"], (2, 3, 1, 0)).reshape(9, cout, cout),
                  ((0, 0), (0, pad_c), (0, pad_c))).astype(jnp.bfloat16)
    if equal_in_out:
        wsm = jnp.eye(cin, cout_p, dtype=jnp.bfloat16)    # identity shortcut on the MXU
    else:
        wsm = jnp.pad(params["ws"].reshape(cout, cin).T,
                      ((0, 0), (0, pad_c))).astype(jnp.bfloat16)

    # VMEM footprint per image (double-buffered I/O + scratches + temporaries).
    eb = 1 if s == 1 else 0
    hp1, wp1 = h_s + 1 + eb, w_s + 1 + eb
    per_img = (2 * (s * s * h_s * w_s * cin * 4 + ho * wo * cout_p * 4)
               + s * s * hp1 * wp1 * cin * 2
               + (ho + 2) * (wo + 2) * cout_p * 2
               + 3 * ho * wo * cout_p * 4
               + 6 * s * s * h_s * w_s * cin)
    bt = _pick_batch_tile(n, per_img, ho, wo)
    wt_bytes = (w1m.size + w2m.size + wsm.size) * 2
    vmem_limit = int(min(56 * 1024 * 1024,
                         max(24 * 1024 * 1024, 2 * (bt * per_img + wt_bytes))))

    kernel = _make_block_kernel(s, equal_in_out, h_s, w_s, ho, wo, cin, cout_p, bt)

    y = pl.pallas_call(
        kernel,
        out_shape=jax.ShapeDtypeStruct((n, ho, wo, cout_p), jnp.float32),
        grid=(n // bt,),
        in_specs=[
            pl.BlockSpec((bt, s, s, h_s, w_s, cin), lambda b: (b, 0, 0, 0, 0, 0)),
            pl.BlockSpec((9, cin, cout_p), lambda b: (0, 0, 0)),
            pl.BlockSpec((9, cout_p, cout_p), lambda b: (0, 0, 0)),
            pl.BlockSpec((cin, cout_p), lambda b: (0, 0)),
            pl.BlockSpec((1, cin), lambda b: (0, 0)),
            pl.BlockSpec((1, cin), lambda b: (0, 0)),
            pl.BlockSpec((1, cout_p), lambda b: (0, 0)),
            pl.BlockSpec((1, cout_p), lambda b: (0, 0)),
        ],
        out_specs=pl.BlockSpec((bt, ho, wo, cout_p), lambda b: (b, 0, 0, 0)),
        scratch_shapes=[
            pltpu.VMEM((bt, s, s, hp1, wp1, cin), jnp.bfloat16),     # padded relu(bn1(x))
            pltpu.VMEM((bt, ho + 2, wo + 2, cout_p), jnp.bfloat16),  # padded relu(bn2(conv1))
        ],
        compiler_params=pltpu.CompilerParams(
            dimension_semantics=("parallel",),
            vmem_limit_bytes=vmem_limit),
    )(xph, w1m, w2m, wsm, s1r, b1r, s2r, b2r)

    # Slice the lane padding away inside the (already required) NCHW transpose.
    return jnp.transpose(y[..., :cout], (0, 3, 1, 2))


# --------------------------- params / reference ----------------------------- #
def make_params(key, cin, cout):
    ks = jax.random.split(key, 11)

    def conv_init(k, shape):
        fan = shape[1] * shape[2] * shape[3]
        return jax.random.normal(k, shape, jnp.float32) * jnp.sqrt(2.0 / fan)

    return dict(
        w1=conv_init(ks[0], (cout, cin, 3, 3)),
        w2=conv_init(ks[1], (cout, cout, 3, 3)),
        ws=conv_init(ks[2], (cout, cin, 1, 1)),
        gamma1=1.0 + 0.1 * jax.random.normal(ks[3], (cin,), jnp.float32),
        beta1=0.1 * jax.random.normal(ks[4], (cin,), jnp.float32),
        mean1=0.1 * jax.random.normal(ks[5], (cin,), jnp.float32),
        var1=jax.random.uniform(ks[6], (cin,), jnp.float32, 0.5, 1.5),
        gamma2=1.0 + 0.1 * jax.random.normal(ks[7], (cout,), jnp.float32),
        beta2=0.1 * jax.random.normal(ks[8], (cout,), jnp.float32),
        mean2=0.1 * jax.random.normal(ks[9], (cout,), jnp.float32),
        var2=jax.random.uniform(ks[10], (cout,), jnp.float32, 0.5, 1.5),
    )


def _ref_forward(x_nchw, params, stride, equal_in_out):
    def bn(x, g, b, m, v):
        g, b, m, v = (t[None, :, None, None] for t in (g, b, m, v))
        return (x - m) / jnp.sqrt(v + EPS) * g + b

    def conv(x, w, s, p):
        return jax.lax.conv_general_dilated(
            x, w, (s, s), ((p, p), (p, p)),
            dimension_numbers=("NCHW", "OIHW", "NCHW"))

    act = jax.nn.relu(bn(x_nchw, params["gamma1"], params["beta1"],
                         params["mean1"], params["var1"]))
    if equal_in_out:
        shortcut = x_nchw
    else:
        shortcut = conv(act, params["ws"], stride, 0)
    c1 = conv(act, params["w1"], stride, 1)
    o = jax.nn.relu(bn(c1, params["gamma2"], params["beta2"],
                       params["mean2"], params["var2"]))
    c2 = conv(o, params["w2"], 1, 1)
    return shortcut + c2


if __name__ == "__main__":
    key = jax.random.PRNGKey(0)
    k_x1, k_x2, k_p1, k_p2 = jax.random.split(key, 4)

    # Case 1: in_planes != out_planes, stride=2 -> convShortcut path
    x1 = jax.random.normal(k_x1, (2, 4, 16, 16), jnp.float32)
    params1 = make_params(k_p1, cin=4, cout=8)
    y1 = basic_block_forward(x1, params1, 2, False)
    r1 = _ref_forward(x1, params1, 2, False)

    # Case 2: in_planes == out_planes, stride=1 -> identity-shortcut path
    x2 = jax.random.normal(k_x2, (2, 8, 16, 16), jnp.float32)
    params2 = make_params(k_p2, cin=8, cout=8)
    y2 = basic_block_forward(x2, params2, 1, True)
    r2 = _ref_forward(x2, params2, 1, True)

    jax.block_until_ready((y1, y2))
    assert y1.shape == (2, 8, 8, 8) and y2.shape == (2, 8, 16, 16)
    # bf16 MXU operands with f32 accumulation -> relative tolerance ~1e-2.
    for y, r in ((y1, r1), (y2, r2)):
        err = float(jnp.max(jnp.abs(y - r)))
        scale = float(jnp.max(jnp.abs(r)))
        assert err < 5e-2 * max(1.0, scale), (err, scale)
    print("KERNEL_OK")
</pallas_src>

<mosaic_0001>
module attributes {stable_mosaic.version = 11 : i64} {
  func.func @kernel(%arg0: i32, %arg1: memref<1x2x2x8x8x4xf32, #tpu.memory_space<vmem>>, %arg2: memref<9x4x128xbf16, #tpu.memory_space<vmem>>, %arg3: memref<9x128x128xbf16, #tpu.memory_space<vmem>>, %arg4: memref<4x128xbf16, #tpu.memory_space<vmem>>, %arg5: memref<1x4xf32, #tpu.memory_space<vmem>>, %arg6: memref<1x4xf32, #tpu.memory_space<vmem>>, %arg7: memref<1x128xf32, #tpu.memory_space<vmem>>, %arg8: memref<1x128xf32, #tpu.memory_space<vmem>>, %arg9: memref<1x8x8x128xf32, #tpu.memory_space<vmem>>, %arg10: memref<1x2x2x9x9x4xbf16, #tpu.memory_space<vmem>>, %arg11: memref<1x10x10x128xbf16, #tpu.memory_space<vmem>>) attributes {dimension_semantics = [#tpu.dimension_semantics<parallel>], iteration_bounds = array<i64: 2>, scalar_prefetch = 0 : i64, scratch_operands = 2 : i64, tpu.core_type = #tpu.core_type<tc>, window_params = [{transform_indices = @transform_0, window_bounds = array<i64: 1, 2, 2, 8, 8, 4>}, {pipeline_mode = #tpu.pipeline_mode<synchronous>, transform_indices = @transform_1, window_bounds = array<i64: 9, 4, 128>}, {pipeline_mode = #tpu.pipeline_mode<synchronous>, transform_indices = @transform_2, window_bounds = array<i64: 9, 128, 128>}, {pipeline_mode = #tpu.pipeline_mode<synchronous>, transform_indices = @transform_3, window_bounds = array<i64: 4, 128>}, {pipeline_mode = #tpu.pipeline_mode<synchronous>, transform_indices = @transform_4, window_bounds = array<i64: 1, 4>}, {pipeline_mode = #tpu.pipeline_mode<synchronous>, transform_indices = @transform_5, window_bounds = array<i64: 1, 4>}, {pipeline_mode = #tpu.pipeline_mode<synchronous>, transform_indices = @transform_6, window_bounds = array<i64: 1, 128>}, {pipeline_mode = #tpu.pipeline_mode<synchronous>, transform_indices = @transform_7, window_bounds = array<i64: 1, 128>}, {transform_indices = @transform_8, window_bounds = array<i64: 1, 8, 8, 128>}]} {
    %cst = arith.constant 0.000000e+00 : bf16
    %0 = vector.broadcast %cst : bf16 to vector<1x2x2x1x9x4xbf16>
    %cst_0 = arith.constant 0.000000e+00 : bf16
    %1 = vector.broadcast %cst_0 : bf16 to vector<1x2x2x9x1x4xbf16>
    %c0 = arith.constant 0 : index
    %c0_1 = arith.constant 0 : index
    %c0_2 = arith.constant 0 : index
    %c0_3 = arith.constant 0 : index
    %c0_4 = arith.constant 0 : index
    %c0_5 = arith.constant 0 : index
    %2 = vector.load %arg10[%c0, %c0_1, %c0_2, %c0_3, %c0_4, %c0_5] : memref<1x2x2x9x9x4xbf16, #tpu.memory_space<vmem>>, vector<1x2x2x1x9x4xbf16>
    tpu.vector_store %arg10[%c0, %c0_1, %c0_2, %c0_3, %c0_4, %c0_5], %0 {strides = array<i32>} : memref<1x2x2x9x9x4xbf16, #tpu.memory_space<vmem>>, vector<1x2x2x1x9x4xbf16>,
    %c0_6 = arith.constant 0 : index
    %c0_7 = arith.constant 0 : index
    %c0_8 = arith.constant 0 : index
    %c0_9 = arith.constant 0 : index
    %c0_10 = arith.constant 0 : index
    %c0_11 = arith.constant 0 : index
    %3 = vector.load %arg10[%c0_6, %c0_7, %c0_8, %c0_9, %c0_10, %c0_11] : memref<1x2x2x9x9x4xbf16, #tpu.memory_space<vmem>>, vector<1x2x2x9x1x4xbf16>
    tpu.vector_store %arg10[%c0_6, %c0_7, %c0_8, %c0_9, %c0_10, %c0_11], %1 {strides = array<i32>} : memref<1x2x2x9x9x4xbf16, #tpu.memory_space<vmem>>, vector<1x2x2x9x1x4xbf16>,
    %cst_12 = arith.constant 0.000000e+00 : bf16
    %4 = vector.broadcast %cst_12 : bf16 to vector<1x1x10x128xbf16>
    %cst_13 = arith.constant 0.000000e+00 : bf16
    %5 = vector.broadcast %cst_13 : bf16 to vector<1x10x1x128xbf16>
    %c0_14 = arith.constant 0 : index
    %c0_15 = arith.constant 0 : index
    %c0_16 = arith.constant 0 : index
    %c0_17 = arith.constant 0 : index
    %6 = vector.load %arg11[%c0_14, %c0_15, %c0_16, %c0_17] : memref<1x10x10x128xbf16, #tpu.memory_space<vmem>>, vector<1x1x10x128xbf16>
    tpu.vector_store %arg11[%c0_14, %c0_15, %c0_16, %c0_17], %4 {strides = array<i32>} : memref<1x10x10x128xbf16, #tpu.memory_space<vmem>>, vector<1x1x10x128xbf16>,
    %c0_18 = arith.constant 0 : index
    %c9 = arith.constant 9 : index
    %c0_19 = arith.constant 0 : index
    %c0_20 = arith.constant 0 : index
    %7 = vector.load %arg11[%c0_18, %c9, %c0_19, %c0_20] : memref<1x10x10x128xbf16, #tpu.memory_space<vmem>>, vector<1x1x10x128xbf16>
    tpu.vector_store %arg11[%c0_18, %c9, %c0_19, %c0_20], %4 {strides = array<i32>} : memref<1x10x10x128xbf16, #tpu.memory_space<vmem>>, vector<1x1x10x128xbf16>,
    %c0_21 = arith.constant 0 : index
    %c0_22 = arith.constant 0 : index
    %c0_23 = arith.constant 0 : index
    %c0_24 = arith.constant 0 : index
    %8 = vector.load %arg11[%c0_21, %c0_22, %c0_23, %c0_24] : memref<1x10x10x128xbf16, #tpu.memory_space<vmem>>, vector<1x10x1x128xbf16>
    tpu.vector_store %arg11[%c0_21, %c0_22, %c0_23, %c0_24], %5 {strides = array<i32>} : memref<1x10x10x128xbf16, #tpu.memory_space<vmem>>, vector<1x10x1x128xbf16>,
    %c0_25 = arith.constant 0 : index
    %c0_26 = arith.constant 0 : index
    %c9_27 = arith.constant 9 : index
    %c0_28 = arith.constant 0 : index
    %9 = vector.load %arg11[%c0_25, %c0_26, %c9_27, %c0_28] : memref<1x10x10x128xbf16, #tpu.memory_space<vmem>>, vector<1x10x1x128xbf16>
    tpu.vector_store %arg11[%c0_25, %c0_26, %c9_27, %c0_28], %5 {strides = array<i32>} : memref<1x10x10x128xbf16, #tpu.memory_space<vmem>>, vector<1x10x1x128xbf16>,
    %c0_29 = arith.constant 0 : index
    %c0_30 = arith.constant 0 : index
    %c0_31 = arith.constant 0 : index
    %c0_32 = arith.constant 0 : index
    %c0_33 = arith.constant 0 : index
    %c0_34 = arith.constant 0 : index
    %10 = vector.load %arg1[%c0_29, %c0_30, %c0_31, %c0_32, %c0_33, %c0_34] : memref<1x2x2x8x8x4xf32, #tpu.memory_space<vmem>>, vector<1x2x2x8x8x4xf32>
    %c0_35 = arith.constant 0 : index
    %c0_36 = arith.constant 0 : index
    %11 = vector.load %arg5[%c0_35, %c0_36] : memref<1x4xf32, #tpu.memory_space<vmem>>, vector<1x4xf32>
    %12 = vector.shape_cast %11 : vector<1x4xf32> to vector<1x1x1x1x1x4xf32>
    %13 = vector.broadcast %12 : vector<1x1x1x1x1x4xf32> to vector<1x2x2x8x8x4xf32>
    %14 = arith.mulf %10, %13 : vector<1x2x2x8x8x4xf32>
    %c0_37 = arith.constant 0 : index
    %c0_38 = arith.constant 0 : index
    %15 = vector.load %arg6[%c0_37, %c0_38] : memref<1x4xf32, #tpu.memory_space<vmem>>, vector<1x4xf32>
    %16 = vector.shape_cast %15 : vector<1x4xf32> to vector<1x1x1x1x1x4xf32>
    %17 = vector.broadcast %16 : vector<1x1x1x1x1x4xf32> to vector<1x2x2x8x8x4xf32>
    %18 = arith.addf %14, %17 : vector<1x2x2x8x8x4xf32>
    %cst_39 = arith.constant 0.000000e+00 : f32
    %19 = vector.broadcast %cst_39 : f32 to vector<1x2x2x8x8x4xf32>
    %20 = arith.maximumf %18, %19 : vector<1x2x2x8x8x4xf32>
    %21 = arith.truncf %20 : vector<1x2x2x8x8x4xf32> to vector<1x2x2x8x8x4xbf16>
    %c0_40 = arith.constant 0 : index
    %c0_41 = arith.constant 0 : index
    %c0_42 = arith.constant 0 : index
    %c1 = arith.constant 1 : index
    %c1_43 = arith.constant 1 : index
    %c0_44 = arith.constant 0 : index
    %22 = vector.load %arg10[%c0_40, %c0_41, %c0_42, %c1, %c1_43, %c0_44] : memref<1x2x2x9x9x4xbf16, #tpu.memory_space<vmem>>, vector<1x2x2x8x8x4xbf16>
    tpu.vector_store %arg10[%c0_40, %c0_41, %c0_42, %c1, %c1_43, %c0_44], %21 {strides = array<i32>} : memref<1x2x2x9x9x4xbf16, #tpu.memory_space<vmem>>, vector<1x2x2x8x8x4xbf16>,
    %23 = vector.extract_strided_slice %21 {offsets = [0, 0, 0, 0, 0, 0], sizes = [1, 1, 1, 8, 8, 4], strides = [1, 1, 1, 1, 1, 1]} : vector<1x2x2x8x8x4xbf16> to vector<1x1x1x8x8x4xbf16>
    %24 = vector.shape_cast %23 : vector<1x1x1x8x8x4xbf16> to vector<1x8x8x4xbf16>
    %25 = vector.shape_cast %24 : vector<1x8x8x4xbf16> to vector<64x4xbf16>
    %c0_45 = arith.constant 0 : index
    %c0_46 = arith.constant 0 : index
    %26 = vector.load %arg4[%c0_45, %c0_46] : memref<4x128xbf16, #tpu.memory_space<vmem>>, vector<4x128xbf16>
    %cst_47 = arith.constant dense<0.000000e+00> : vector<64x128xf32>
    %27 = tpu.matmul %25, %26, %cst_47 {dimension_numbers = #tpu.dot_dimension_numbers<[1], [0], [0], [1], [0, 0, 1, 1], [], []>} : vector<64x4xbf16>, vector<4x128xbf16>, vector<64x128xf32> -> vector<64x128xf32>
    %cst_48 = arith.constant 0.000000e+00 : f32
    %28 = vector.broadcast %cst_48 : f32 to vector<64x128xf32>
    %c0_49 = arith.constant 0 : index
    %c1_50 = arith.constant 1 : index
    %c1_51 = arith.constant 1 : index
    %c0_52 = arith.constant 0 : index
    %c0_53 = arith.constant 0 : index
    %c0_54 = arith.constant 0 : index
    %29 = vector.load %arg10[%c0_49, %c1_50, %c1_51, %c0_52, %c0_53, %c0_54] : memref<1x2x2x9x9x4xbf16, #tpu.memory_space<vmem>>, vector<1x1x1x8x8x4xbf16>
    %30 = vector.shape_cast %29 : vector<1x1x1x8x8x4xbf16> to vector<64x4xbf16>
    %c0_55 = arith.constant 0 : index
    %c0_56 = arith.constant 0 : index
    %c0_57 = arith.constant 0 : index
    %31 = vector.load %arg2[%c0_55, %c0_56, %c0_57] : memref<9x4x128xbf16, #tpu.memory_space<vmem>>, vector<1x4x128xbf16>
    %32 = vector.shape_cast %31 : vector<1x4x128xbf16> to vector<4x128xbf16>
    %cst_58 = arith.constant dense<0.000000e+00> : vector<64x128xf32>
    %33 = tpu.matmul %30, %32, %cst_58 {dimension_numbers = #tpu.dot_dimension_numbers<[1], [0], [0], [1], [0, 0, 1, 1], [], []>} : vector<64x4xbf16>, vector<4x128xbf16>, vector<64x128xf32> -> vector<64x128xf32>
    %34 = arith.addf %28, %33 : vector<64x128xf32>
    %c0_59 = arith.constant 0 : index
    %c1_60 = arith.constant 1 : index
    %c0_61 = arith.constant 0 : index
    %c0_62 = arith.constant 0 : index
    %c1_63 = arith.constant 1 : index
    %c0_64 = arith.constant 0 : index
    %35 = vector.load %arg10[%c0_59, %c1_60, %c0_61, %c0_62, %c1_63, %c0_64] : memref<1x2x2x9x9x4xbf16, #tpu.memory_space<vmem>>, vector<1x1x1x8x8x4xbf16>
    %36 = vector.shape_cast %35 : vector<1x1x1x8x8x4xbf16> to vector<64x4xbf16>
    %c1_65 = arith.constant 1 : index
    %c0_66 = arith.constant 0 : index
    %c0_67 = arith.constant 0 : index
    %37 = vector.load %arg2[%c1_65, %c0_66, %c0_67] : memref<9x4x128xbf16, #tpu.memory_space<vmem>>, vector<1x4x128xbf16>
    %38 = vector.shape_cast %37 : vector<1x4x128xbf16> to vector<4x128xbf16>
    %cst_68 = arith.constant dense<0.000000e+00> : vector<64x128xf32>
    %39 = tpu.matmul %36, %38, %cst_68 {dimension_numbers = #tpu.dot_dimension_numbers<[1], [0], [0], [1], [0, 0, 1, 1], [], []>} : vector<64x4xbf16>, vector<4x128xbf16>, vector<64x128xf32> -> vector<64x128xf32>
    %40 = arith.addf %34, %39 : vector<64x128xf32>
    %c0_69 = arith.constant 0 : index
    %c1_70 = arith.constant 1 : index
    %c1_71 = arith.constant 1 : index
    %c0_72 = arith.constant 0 : index
    %c1_73 = arith.constant 1 : index
    %c0_74 = arith.constant 0 : index
    %41 = vector.load %arg10[%c0_69, %c1_70, %c1_71, %c0_72, %c1_73, %c0_74] : memref<1x2x2x9x9x4xbf16, #tpu.memory_space<vmem>>, vector<1x1x1x8x8x4xbf16>
    %42 = vector.shape_cast %41 : vector<1x1x1x8x8x4xbf16> to vector<64x4xbf16>
    %c2 = arith.constant 2 : index
    %c0_75 = arith.constant 0 : index
    %c0_76 = arith.constant 0 : index
    %43 = vector.load %arg2[%c2, %c0_75, %c0_76] : memref<9x4x128xbf16, #tpu.memory_space<vmem>>, vector<1x4x128xbf16>
    %44 = vector.shape_cast %43 : vector<1x4x128xbf16> to vector<4x128xbf16>
    %cst_77 = arith.constant dense<0.000000e+00> : vector<64x128xf32>
    %45 = tpu.matmul %42, %44, %cst_77 {dimension_numbers = #tpu.dot_dimension_numbers<[1], [0], [0], [1], [0, 0, 1, 1], [], []>} : vector<64x4xbf16>, vector<4x128xbf16>, vector<64x128xf32> -> vector<64x128xf32>
    %46 = arith.addf %40, %45 : vector<64x128xf32>
    %c0_78 = arith.constant 0 : index
    %c0_79 = arith.constant 0 : index
    %c1_80 = arith.constant 1 : index
    %c1_81 = arith.constant 1 : index
    %c0_82 = arith.constant 0 : index
    %c0_83 = arith.constant 0 : index
    %47 = vector.load %arg10[%c0_78, %c0_79, %c1_80, %c1_81, %c0_82, %c0_83] : memref<1x2x2x9x9x4xbf16, #tpu.memory_space<vmem>>, vector<1x1x1x8x8x4xbf16>
    %48 = vector.shape_cast %47 : vector<1x1x1x8x8x4xbf16> to vector<64x4xbf16>
    %c3 = arith.constant 3 : index
    %c0_84 = arith.constant 0 : index
    %c0_85 = arith.constant 0 : index
    %49 = vector.load %arg2[%c3, %c0_84, %c0_85] : memref<9x4x128xbf16, #tpu.memory_space<vmem>>, vector<1x4x128xbf16>
    %50 = vector.shape_cast %49 : vector<1x4x128xbf16> to vector<4x128xbf16>
    %cst_86 = arith.constant dense<0.000000e+00> : vector<64x128xf32>
    %51 = tpu.matmul %48, %50, %cst_86 {dimension_numbers = #tpu.dot_dimension_numbers<[1], [0], [0], [1], [0, 0, 1, 1], [], []>} : vector<64x4xbf16>, vector<4x128xbf16>, vector<64x128xf32> -> vector<64x128xf32>
    %52 = arith.addf %46, %51 : vector<64x128xf32>
    %c0_87 = arith.constant 0 : index
    %c0_88 = arith.constant 0 : index
    %c0_89 = arith.constant 0 : index
    %c1_90 = arith.constant 1 : index
    %c1_91 = arith.constant 1 : index
    %c0_92 = arith.constant 0 : index
    %53 = vector.load %arg10[%c0_87, %c0_88, %c0_89, %c1_90, %c1_91, %c0_92] : memref<1x2x2x9x9x4xbf16, #tpu.memory_space<vmem>>, vector<1x1x1x8x8x4xbf16>
    %54 = vector.shape_cast %53 : vector<1x1x1x8x8x4xbf16> to vector<64x4xbf16>
    %c4 = arith.constant 4 : index
    %c0_93 = arith.constant 0 : index
    %c0_94 = arith.constant 0 : index
    %55 = vector.load %arg2[%c4, %c0_93, %c0_94] : memref<9x4x128xbf16, #tpu.memory_space<vmem>>, vector<1x4x128xbf16>
    %56 = vector.shape_cast %55 : vector<1x4x128xbf16> to vector<4x128xbf16>
    %cst_95 = arith.constant dense<0.000000e+00> : vector<64x128xf32>
    %57 = tpu.matmul %54, %56, %cst_95 {dimension_numbers = #tpu.dot_dimension_numbers<[1], [0], [0], [1], [0, 0, 1, 1], [], []>} : vector<64x4xbf16>, vector<4x128xbf16>, vector<64x128xf32> -> vector<64x128xf32>
    %58 = arith.addf %52, %57 : vector<64x128xf32>
    %c0_96 = arith.constant 0 : index
    %c0_97 = arith.constant 0 : index
    %c1_98 = arith.constant 1 : index
    %c1_99 = arith.constant 1 : index
    %c1_100 = arith.constant 1 : index
    %c0_101 = arith.constant 0 : index
    %59 = vector.load %arg10[%c0_96, %c0_97, %c1_98, %c1_99, %c1_100, %c0_101] : memref<1x2x2x9x9x4xbf16, #tpu.memory_space<vmem>>, vector<1x1x1x8x8x4xbf16>
    %60 = vector.shape_cast %59 : vector<1x1x1x8x8x4xbf16> to vector<64x4xbf16>
    %c5 = arith.constant 5 : index
    %c0_102 = arith.constant 0 : index
    %c0_103 = arith.constant 0 : index
    %61 = vector.load %arg2[%c5, %c0_102, %c0_103] : memref<9x4x128xbf16, #tpu.memory_space<vmem>>, vector<1x4x128xbf16>
    %62 = vector.shape_cast %61 : vector<1x4x128xbf16> to vector<4x128xbf16>
    %cst_104 = arith.constant dense<0.000000e+00> : vector<64x128xf32>
    %63 = tpu.matmul %60, %62, %cst_104 {dimension_numbers = #tpu.dot_dimension_numbers<[1], [0], [0], [1], [0, 0, 1, 1], [], []>} : vector<64x4xbf16>, vector<4x128xbf16>, vector<64x128xf32> -> vector<64x128xf32>
    %64 = arith.addf %58, %63 : vector<64x128xf32>
    %c0_105 = arith.constant 0 : index
    %c1_106 = arith.constant 1 : index
    %c1_107 = arith.constant 1 : index
    %c1_108 = arith.constant 1 : index
    %c0_109 = arith.constant 0 : index
    %c0_110 = arith.constant 0 : index
    %65 = vector.load %arg10[%c0_105, %c1_106, %c1_107, %c1_108, %c0_109, %c0_110] : memref<1x2x2x9x9x4xbf16, #tpu.memory_space<vmem>>, vector<1x1x1x8x8x4xbf16>
    %66 = vector.shape_cast %65 : vector<1x1x1x8x8x4xbf16> to vector<64x4xbf16>
    %c6 = arith.constant 6 : index
    %c0_111 = arith.constant 0 : index
    %c0_112 = arith.constant 0 : index
    %67 = vector.load %arg2[%c6, %c0_111, %c0_112] : memref<9x4x128xbf16, #tpu.memory_space<vmem>>, vector<1x4x128xbf16>
    %68 = vector.shape_cast %67 : vector<1x4x128xbf16> to vector<4x128xbf16>
    %cst_113 = arith.constant dense<0.000000e+00> : vector<64x128xf32>
    %69 = tpu.matmul %66, %68, %cst_113 {dimension_numbers = #tpu.dot_dimension_numbers<[1], [0], [0], [1], [0, 0, 1, 1], [], []>} : vector<64x4xbf16>, vector<4x128xbf16>, vector<64x128xf32> -> vector<64x128xf32>
    %70 = arith.addf %64, %69 : vector<64x128xf32>
    %c0_114 = arith.constant 0 : index
    %c1_115 = arith.constant 1 : index
    %c0_116 = arith.constant 0 : index
    %c1_117 = arith.constant 1 : index
    %c1_118 = arith.constant 1 : index
    %c0_119 = arith.constant 0 : index
    %71 = vector.load %arg10[%c0_114, %c1_115, %c0_116, %c1_117, %c1_118, %c0_119] : memref<1x2x2x9x9x4xbf16, #tpu.memory_space<vmem>>, vector<1x1x1x8x8x4xbf16>
    %72 = vector.shape_cast %71 : vector<1x1x1x8x8x4xbf16> to vector<64x4xbf16>
    %c7 = arith.constant 7 : index
    %c0_120 = arith.constant 0 : index
    %c0_121 = arith.constant 0 : index
    %73 = vector.load %arg2[%c7, %c0_120, %c0_121] : memref<9x4x128xbf16, #tpu.memory_space<vmem>>, vector<1x4x128xbf16>
    %74 = vector.shape_cast %73 : vector<1x4x128xbf16> to vector<4x128xbf16>
    %cst_122 = arith.constant dense<0.000000e+00> : vector<64x128xf32>
    %75 = tpu.matmul %72, %74, %cst_122 {dimension_numbers = #tpu.dot_dimension_numbers<[1], [0], [0], [1], [0, 0, 1, 1], [], []>} : vector<64x4xbf16>, vector<4x128xbf16>, vector<64x128xf32> -> vector<64x128xf32>
    %76 = arith.addf %70, %75 : vector<64x128xf32>
    %c0_123 = arith.constant 0 : index
    %c1_124 = arith.constant 1 : index
    %c1_125 = arith.constant 1 : index
    %c1_126 = arith.constant 1 : index
    %c1_127 = arith.constant 1 : index
    %c0_128 = arith.constant 0 : index
    %77 = vector.load %arg10[%c0_123, %c1_124, %c1_125, %c1_126, %c1_127, %c0_128] : memref<1x2x2x9x9x4xbf16, #tpu.memory_space<vmem>>, vector<1x1x1x8x8x4xbf16>
    %78 = vector.shape_cast %77 : vector<1x1x1x8x8x4xbf16> to vector<64x4xbf16>
    %c8 = arith.constant 8 : index
    %c0_129 = arith.constant 0 : index
    %c0_130 = arith.constant 0 : index
    %79 = vector.load %arg2[%c8, %c0_129, %c0_130] : memref<9x4x128xbf16, #tpu.memory_space<vmem>>, vector<1x4x128xbf16>
    %80 = vector.shape_cast %79 : vector<1x4x128xbf16> to vector<4x128xbf16>
    %cst_131 = arith.constant dense<0.000000e+00> : vector<64x128xf32>
    %81 = tpu.matmul %78, %80, %cst_131 {dimension_numbers = #tpu.dot_dimension_numbers<[1], [0], [0], [1], [0, 0, 1, 1], [], []>} : vector<64x4xbf16>, vector<4x128xbf16>, vector<64x128xf32> -> vector<64x128xf32>
    %82 = arith.addf %76, %81 : vector<64x128xf32>
    %c0_132 = arith.constant 0 : index
    %c0_133 = arith.constant 0 : index
    %83 = vector.load %arg7[%c0_132, %c0_133] : memref<1x128xf32, #tpu.memory_space<vmem>>, vector<1x128xf32>
    %84 = vector.broadcast %83 : vector<1x128xf32> to vector<64x128xf32>
    %85 = arith.mulf %82, %84 : vector<64x128xf32>
    %c0_134 = arith.constant 0 : index
    %c0_135 = arith.constant 0 : index
    %86 = vector.load %arg8[%c0_134, %c0_135] : memref<1x128xf32, #tpu.memory_space<vmem>>, vector<1x128xf32>
    %87 = vector.broadcast %86 : vector<1x128xf32> to vector<64x128xf32>
    %88 = arith.addf %85, %87 : vector<64x128xf32>
    %cst_136 = arith.constant 0.000000e+00 : f32
    %89 = vector.broadcast %cst_136 : f32 to vector<64x128xf32>
    %90 = arith.maximumf %88, %89 : vector<64x128xf32>
    %91 = arith.truncf %90 : vector<64x128xf32> to vector<64x128xbf16>
    %92 = vector.shape_cast %91 : vector<64x128xbf16> to vector<1x8x8x128xbf16>
    %c0_137 = arith.constant 0 : index
    %c1_138 = arith.constant 1 : index
    %c1_139 = arith.constant 1 : index
    %c0_140 = arith.constant 0 : index
    %93 = vector.load %arg11[%c0_137, %c1_138, %c1_139, %c0_140] : memref<1x10x10x128xbf16, #tpu.memory_space<vmem>>, vector<1x8x8x128xbf16>
    tpu.vector_store %arg11[%c0_137, %c1_138, %c1_139, %c0_140], %92 {strides = array<i32>} : memref<1x10x10x128xbf16, #tpu.memory_space<vmem>>, vector<1x8x8x128xbf16>,
    %c0_141 = arith.constant 0 : index
    %c0_142 = arith.constant 0 : index
    %c0_143 = arith.constant 0 : index
    %c0_144 = arith.constant 0 : index
    %94 = vector.load %arg11[%c0_141, %c0_142, %c0_143, %c0_144] : memref<1x10x10x128xbf16, #tpu.memory_space<vmem>>, vector<1x8x8x128xbf16>
    %95 = vector.shape_cast %94 : vector<1x8x8x128xbf16> to vector<64x128xbf16>
    %c0_145 = arith.constant 0 : index
    %c0_146 = arith.constant 0 : index
    %c0_147 = arith.constant 0 : index
    %96 = vector.load %arg3[%c0_145, %c0_146, %c0_147] : memref<9x128x128xbf16, #tpu.memory_space<vmem>>, vector<1x128x128xbf16>
    %97 = vector.shape_cast %96 : vector<1x128x128xbf16> to vector<128x128xbf16>
    %cst_148 = arith.constant dense<0.000000e+00> : vector<64x128xf32>
    %98 = tpu.matmul %95, %97, %cst_148 {dimension_numbers = #tpu.dot_dimension_numbers<[1], [0], [0], [1], [0, 0, 1, 1], [], []>} : vector<64x128xbf16>, vector<128x128xbf16>, vector<64x128xf32> -> vector<64x128xf32>
    %99 = arith.addf %27, %98 : vector<64x128xf32>
    %c0_149 = arith.constant 0 : index
    %c0_150 = arith.constant 0 : index
    %c1_151 = arith.constant 1 : index
    %c0_152 = arith.constant 0 : index
    %100 = vector.load %arg11[%c0_149, %c0_150, %c1_151, %c0_152] : memref<1x10x10x128xbf16, #tpu.memory_space<vmem>>, vector<1x8x8x128xbf16>
    %101 = vector.shape_cast %100 : vector<1x8x8x128xbf16> to vector<64x128xbf16>
    %c1_153 = arith.constant 1 : index
    %c0_154 = arith.constant 0 : index
    %c0_155 = arith.constant 0 : index
    %102 = vector.load %arg3[%c1_153, %c0_154, %c0_155] : memref<9x128x128xbf16, #tpu.memory_space<vmem>>, vector<1x128x128xbf16>
    %103 = vector.shape_cast %102 : vector<1x128x128xbf16> to vector<128x128xbf16>
    %cst_156 = arith.constant dense<0.000000e+00> : vector<64x128xf32>
    %104 = tpu.matmul %101, %103, %cst_156 {dimension_numbers = #tpu.dot_dimension_numbers<[1], [0], [0], [1], [0, 0, 1, 1], [], []>} : vector<64x128xbf16>, vector<128x128xbf16>, vector<64x128xf32> -> vector<64x128xf32>
    %105 = arith.addf %99, %104 : vector<64x128xf32>
    %c0_157 = arith.constant 0 : index
    %c0_158 = arith.constant 0 : index
    %c2_159 = arith.constant 2 : index
    %c0_160 = arith.constant 0 : index
    %106 = vector.load %arg11[%c0_157, %c0_158, %c2_159, %c0_160] : memref<1x10x10x128xbf16, #tpu.memory_space<vmem>>, vector<1x8x8x128xbf16>
    %107 = vector.shape_cast %106 : vector<1x8x8x128xbf16> to vector<64x128xbf16>
    %c2_161 = arith.constant 2 : index
    %c0_162 = arith.constant 0 : index
    %c0_163 = arith.constant 0 : index
    %108 = vector.load %arg3[%c2_161, %c0_162, %c0_163] : memref<9x128x128xbf16, #tpu.memory_space<vmem>>, vector<1x128x128xbf16>
    %109 = vector.shape_cast %108 : vector<1x128x128xbf16> to vector<128x128xbf16>
    %cst_164 = arith.constant dense<0.000000e+00> : vector<64x128xf32>
    %110 = tpu.matmul %107, %109, %cst_164 {dimension_numbers = #tpu.dot_dimension_numbers<[1], [0], [0], [1], [0, 0, 1, 1], [], []>} : vector<64x128xbf16>, vector<128x128xbf16>, vector<64x128xf32> -> vector<64x128xf32>
    %111 = arith.addf %105, %110 : vector<64x128xf32>
    %c0_165 = arith.constant 0 : index
    %c1_166 = arith.constant 1 : index
    %c0_167 = arith.constant 0 : index
    %c0_168 = arith.constant 0 : index
    %112 = vector.load %arg11[%c0_165, %c1_166, %c0_167, %c0_168] : memref<1x10x10x128xbf16, #tpu.memory_space<vmem>>, vector<1x8x8x128xbf16>
    %113 = vector.shape_cast %112 : vector<1x8x8x128xbf16> to vector<64x128xbf16>
    %c3_169 = arith.constant 3 : index
    %c0_170 = arith.constant 0 : index
    %c0_171 = arith.constant 0 : index
    %114 = vector.load %arg3[%c3_169, %c0_170, %c0_171] : memref<9x128x128xbf16, #tpu.memory_space<vmem>>, vector<1x128x128xbf16>
    %115 = vector.shape_cast %114 : vector<1x128x128xbf16> to vector<128x128xbf16>
    %cst_172 = arith.constant dense<0.000000e+00> : vector<64x128xf32>
    %116 = tpu.matmul %113, %115, %cst_172 {dimension_numbers = #tpu.dot_dimension_numbers<[1], [0], [0], [1], [0, 0, 1, 1], [], []>} : vector<64x128xbf16>, vector<128x128xbf16>, vector<64x128xf32> -> vector<64x128xf32>
    %117 = arith.addf %111, %116 : vector<64x128xf32>
    %c0_173 = arith.constant 0 : index
    %c1_174 = arith.constant 1 : index
    %c1_175 = arith.constant 1 : index
    %c0_176 = arith.constant 0 : index
    %118 = vector.load %arg11[%c0_173, %c1_174, %c1_175, %c0_176] : memref<1x10x10x128xbf16, #tpu.memory_space<vmem>>, vector<1x8x8x128xbf16>
    %119 = vector.shape_cast %118 : vector<1x8x8x128xbf16> to vector<64x128xbf16>
    %c4_177 = arith.constant 4 : index
    %c0_178 = arith.constant 0 : index
    %c0_179 = arith.constant 0 : index
    %120 = vector.load %arg3[%c4_177, %c0_178, %c0_179] : memref<9x128x128xbf16, #tpu.memory_space<vmem>>, vector<1x128x128xbf16>
    %121 = vector.shape_cast %120 : vector<1x128x128xbf16> to vector<128x128xbf16>
    %cst_180 = arith.constant dense<0.000000e+00> : vector<64x128xf32>
    %122 = tpu.matmul %119, %121, %cst_180 {dimension_numbers = #tpu.dot_dimension_numbers<[1], [0], [0], [1], [0, 0, 1, 1], [], []>} : vector<64x128xbf16>, vector<128x128xbf16>, vector<64x128xf32> -> vector<64x128xf32>
    %123 = arith.addf %117, %122 : vector<64x128xf32>
    %c0_181 = arith.constant 0 : index
    %c1_182 = arith.constant 1 : index
    %c2_183 = arith.constant 2 : index
    %c0_184 = arith.constant 0 : index
    %124 = vector.load %arg11[%c0_181, %c1_182, %c2_183, %c0_184] : memref<1x10x10x128xbf16, #tpu.memory_space<vmem>>, vector<1x8x8x128xbf16>
    %125 = vector.shape_cast %124 : vector<1x8x8x128xbf16> to vector<64x128xbf16>
    %c5_185 = arith.constant 5 : index
    %c0_186 = arith.constant 0 : index
    %c0_187 = arith.constant 0 : index
    %126 = vector.load %arg3[%c5_185, %c0_186, %c0_187] : memref<9x128x128xbf16, #tpu.memory_space<vmem>>, vector<1x128x128xbf16>
    %127 = vector.shape_cast %126 : vector<1x128x128xbf16> to vector<128x128xbf16>
    %cst_188 = arith.constant dense<0.000000e+00> : vector<64x128xf32>
    %128 = tpu.matmul %125, %127, %cst_188 {dimension_numbers = #tpu.dot_dimension_numbers<[1], [0], [0], [1], [0, 0, 1, 1], [], []>} : vector<64x128xbf16>, vector<128x128xbf16>, vector<64x128xf32> -> vector<64x128xf32>
    %129 = arith.addf %123, %128 : vector<64x128xf32>
    %c0_189 = arith.constant 0 : index
    %c2_190 = arith.constant 2 : index
    %c0_191 = arith.constant 0 : index
    %c0_192 = arith.constant 0 : index
    %130 = vector.load %arg11[%c0_189, %c2_190, %c0_191, %c0_192] : memref<1x10x10x128xbf16, #tpu.memory_space<vmem>>, vector<1x8x8x128xbf16>
    %131 = vector.shape_cast %130 : vector<1x8x8x128xbf16> to vector<64x128xbf16>
    %c6_193 = arith.constant 6 : index
    %c0_194 = arith.constant 0 : index
    %c0_195 = arith.constant 0 : index
    %132 = vector.load %arg3[%c6_193, %c0_194, %c0_195] : memref<9x128x128xbf16, #tpu.memory_space<vmem>>, vector<1x128x128xbf16>
    %133 = vector.shape_cast %132 : vector<1x128x128xbf16> to vector<128x128xbf16>
    %cst_196 = arith.constant dense<0.000000e+00> : vector<64x128xf32>
    %134 = tpu.matmul %131, %133, %cst_196 {dimension_numbers = #tpu.dot_dimension_numbers<[1], [0], [0], [1], [0, 0, 1, 1], [], []>} : vector<64x128xbf16>, vector<128x128xbf16>, vector<64x128xf32> -> vector<64x128xf32>
    %135 = arith.addf %129, %134 : vector<64x128xf32>
    %c0_197 = arith.constant 0 : index
    %c2_198 = arith.constant 2 : index
    %c1_199 = arith.constant 1 : index
    %c0_200 = arith.constant 0 : index
    %136 = vector.load %arg11[%c0_197, %c2_198, %c1_199, %c0_200] : memref<1x10x10x128xbf16, #tpu.memory_space<vmem>>, vector<1x8x8x128xbf16>
    %137 = vector.shape_cast %136 : vector<1x8x8x128xbf16> to vector<64x128xbf16>
    %c7_201 = arith.constant 7 : index
    %c0_202 = arith.constant 0 : index
    %c0_203 = arith.constant 0 : index
    %138 = vector.load %arg3[%c7_201, %c0_202, %c0_203] : memref<9x128x128xbf16, #tpu.memory_space<vmem>>, vector<1x128x128xbf16>
    %139 = vector.shape_cast %138 : vector<1x128x128xbf16> to vector<128x128xbf16>
    %cst_204 = arith.constant dense<0.000000e+00> : vector<64x128xf32>
    %140 = tpu.matmul %137, %139, %cst_204 {dimension_numbers = #tpu.dot_dimension_numbers<[1], [0], [0], [1], [0, 0, 1, 1], [], []>} : vector<64x128xbf16>, vector<128x128xbf16>, vector<64x128xf32> -> vector<64x128xf32>
    %141 = arith.addf %135, %140 : vector<64x128xf32>
    %c0_205 = arith.constant 0 : index
    %c2_206 = arith.constant 2 : index
    %c2_207 = arith.constant 2 : index
    %c0_208 = arith.constant 0 : index
    %142 = vector.load %arg11[%c0_205, %c2_206, %c2_207, %c0_208] : memref<1x10x10x128xbf16, #tpu.memory_space<vmem>>, vector<1x8x8x128xbf16>
    %143 = vector.shape_cast %142 : vector<1x8x8x128xbf16> to vector<64x128xbf16>
    %c8_209 = arith.constant 8 : index
    %c0_210 = arith.constant 0 : index
    %c0_211 = arith.constant 0 : index
    %144 = vector.load %arg3[%c8_209, %c0_210, %c0_211] : memref<9x128x128xbf16, #tpu.memory_space<vmem>>, vector<1x128x128xbf16>
    %145 = vector.shape_cast %144 : vector<1x128x128xbf16> to vector<128x128xbf16>
    %cst_212 = arith.constant dense<0.000000e+00> : vector<64x128xf32>
    %146 = tpu.matmul %143, %145, %cst_212 {dimension_numbers = #tpu.dot_dimension_numbers<[1], [0], [0], [1], [0, 0, 1, 1], [], []>} : vector<64x128xbf16>, vector<128x128xbf16>, vector<64x128xf32> -> vector<64x128xf32>
    %147 = arith.addf %141, %146 : vector<64x128xf32>
    %148 = vector.shape_cast %147 : vector<64x128xf32> to vector<1x8x8x128xf32>
    %c0_213 = arith.constant 0 : index
    %c0_214 = arith.constant 0 : index
    %c0_215 = arith.constant 0 : index
    %c0_216 = arith.constant 0 : index
    %149 = vector.load %arg9[%c0_213, %c0_214, %c0_215, %c0_216] : memref<1x8x8x128xf32, #tpu.memory_space<vmem>>, vector<1x8x8x128xf32>
    tpu.vector_store %arg9[%c0_213, %c0_214, %c0_215, %c0_216], %148 {strides = array<i32>} : memref<1x8x8x128xf32, #tpu.memory_space<vmem>>, vector<1x8x8x128xf32>,
    return
  }
  func.func @transform_0(%arg0: i32) -> (i32, i32, i32, i32, i32, i32) {
    %c0_i32 = arith.constant 0 : i32
    %c0_i32_0 = arith.constant 0 : i32
    %c0_i32_1 = arith.constant 0 : i32
    %c0_i32_2 = arith.constant 0 : i32
    %c0_i32_3 = arith.constant 0 : i32
    %c0_i32_4 = arith.constant 0 : i32
    return %arg0, %c0_i32, %c0_i32_0, %c0_i32_1, %c0_i32_2, %c0_i32_3 : i32, i32, i32, i32, i32, i32
  }
  func.func @transform_1(%arg0: i32) -> (i32, i32, i32) {
    %c0_i32 = arith.constant 0 : i32
    %c0_i32_0 = arith.constant 0 : i32
    %c0_i32_1 = arith.constant 0 : i32
    %c0_i32_2 = arith.constant 0 : i32
    return %c0_i32, %c0_i32_0, %c0_i32_1 : i32, i32, i32
  }
  func.func @transform_2(%arg0: i32) -> (i32, i32, i32) {
    %c0_i32 = arith.constant 0 : i32
    %c0_i32_0 = arith.constant 0 : i32
    %c0_i32_1 = arith.constant 0 : i32
    %c0_i32_2 = arith.constant 0 : i32
    return %c0_i32, %c0_i32_0, %c0_i32_1 : i32, i32, i32
  }
  func.func @transform_3(%arg0: i32) -> (i32, i32) {
    %c0_i32 = arith.constant 0 : i32
    %c0_i32_0 = arith.constant 0 : i32
    %c0_i32_1 = arith.constant 0 : i32
    return %c0_i32, %c0_i32_0 : i32, i32
  }
  func.func @transform_4(%arg0: i32) -> (i32, i32) {
    %c0_i32 = arith.constant 0 : i32
    %c0_i32_0 = arith.constant 0 : i32
    %c0_i32_1 = arith.constant 0 : i32
    return %c0_i32, %c0_i32_0 : i32, i32
  }
  func.func @transform_5(%arg0: i32) -> (i32, i32) {
    %c0_i32 = arith.constant 0 : i32
    %c0_i32_0 = arith.constant 0 : i32
    %c0_i32_1 = arith.constant 0 : i32
    return %c0_i32, %c0_i32_0 : i32, i32
  }
  func.func @transform_6(%arg0: i32) -> (i32, i32) {
    %c0_i32 = arith.constant 0 : i32
    %c0_i32_0 = arith.constant 0 : i32
    %c0_i32_1 = arith.constant 0 : i32
    return %c0_i32, %c0_i32_0 : i32, i32
  }
  func.func @transform_7(%arg0: i32) -> (i32, i32) {
    %c0_i32 = arith.constant 0 : i32
    %c0_i32_0 = arith.constant 0 : i32
    %c0_i32_1 = arith.constant 0 : i32
    return %c0_i32, %c0_i32_0 : i32, i32
  }
  func.func @transform_8(%arg0: i32) -> (i32, i32, i32, i32) {
    %c0_i32 = arith.constant 0 : i32
    %c0_i32_0 = arith.constant 0 : i32
    %c0_i32_1 = arith.constant 0 : i32
    %c0_i32_2 = arith.constant 0 : i32
    return %arg0, %c0_i32, %c0_i32_0, %c0_i32_1 : i32, i32, i32, i32
  }
}

</mosaic_0001>

<bundles_post_ra>
// kernel: basic_block_forward.1
= control target key start
LH: loop header
LB: loop body
LE: loop exit
PB: predicated region body
PF: predicated region fallthrough
CT: control target
= control target key end

     0   :  { %s6586_s27 = smov 0   ;;  %s8033_s0 = inlined_call_operand.vmem [shape: f32[2,2,2,8,8,4], index: 0, kind: input, shape index: {}]   ;;  %s8034_s1 = inlined_call_operand.vmem [shape: bf16[9,4,128], index: 1, kind: input, shape index: {}]   ;;  %s8035_s2 = inlined_call_operand.vmem [shape: bf16[9,128,128], index: 2, kind: input, shape index: {}]   ;;  %s8036_s3 = inlined_call_operand.vmem [shape: bf16[4,128], index: 3, kind: input, shape index: {}]   ;;  %s8037_s4 = inlined_call_operand.vmem [shape: f32[1,4], index: 4, kind: input, shape index: {}]   ;;  %s8038_s5 = inlined_call_operand.vmem [shape: f32[1,4], index: 5, kind: input, shape index: {}]   ;;  %s8039_s6 = inlined_call_operand.vmem [shape: f32[1,128], index: 6, kind: input, shape index: {}]   ;;  %s8040_s7 = inlined_call_operand.vmem [shape: f32[1,128], index: 7, kind: input, shape index: {}]   ;;  %s8041_s8 = inlined_call_operand.vmem [shape: f32[2,8,8,128], index: 8, kind: output, shape index: {}]  }
   0x1 LB: > { %s5338_s28 = sadd.s32 4294967295, %s6538_s27   ;;  %p5342_p0 = scmp.ge.s32.totalorder %s6538_s27, 1  ;;  %s6538_s27 = sphi %s6586_s27, %s18_s27  }
   0x2   : > { %p262_p1 = scmp.lt.s32.totalorder %s6538_s27, 3 }
   0x4   : > { %p263_p2 = pnand %p5342_p0, %p262_p1 }
   0x5   : > { %v312_v0 = vld [vmem:[#allocation2 + $0x4] sm:$0x1] (!%p263_p2)  ;;  %v316_v1 = vld [vmem:[#allocation2 + $0x4c] sm:$0x1] (!%p263_p2)  ;;  %v5381_v2 = vld [vmem:[%s8034_s1 + $0x2] sm:$0x3] (!%p263_p2) }
   0x6   : > { %266 = sbr.rel (%p263_p2) target bundleno = 903 (0x387), region = 52  ;;  %vm1459_vm0 = vcmask (!%p263_p2), 1041408   ;;  %p6597_p3 = scmp.lt.s32.totalorder (!%p263_p2), %s5338_s28, 1  ;;  %vm307_vm1 = vcmask (!%p263_p2), 27648   ;;  %vm309_vm2 = vcmask (!%p263_p2), 24576   ;;  %v6540_v4 = vmov (!%p263_p2), 0  }
   0x7   : > { %6413 = vmatprep.subr.msk.bf16.mxu0 (!%p263_p2), %vm1459_vm0, %v5381_v2  ;;  %v1461_v3 = vsel (!%p263_p2), %vm1459_vm0, %v5381_v2, 0  ;;  %308 = vst.msk [vmem:[#allocation2] sm:$0xf] (!%p263_p2), %vm307_vm1, %v6540_v4  ;;  %vm310_vm3 = vsmask.f32 (!%p263_p2), 256  ;;  %vm1446_vm10 = vcmask (!%p263_p2), 31744  }
   0x8   : > { %315 = vst.msk [vmem:[#allocation2 + $0x48] sm:$0xf] (!%p263_p2), %vm307_vm1, %v6540_v4  ;;  %319 = vst.msk [vmem:[#allocation2 + $0x90] sm:$0xf] (!%p263_p2), %vm307_vm1, %v6540_v4  ;;  %v320_v5 = vld [vmem:[#allocation2 + $0x94] sm:$0x1] (!%p263_p2)  ;;  %5946 = vmatpush3.bf16.msra.mxu0 (!%p263_p2), %v1461_v3 }
   0x9   : > { %323 = vst.msk [vmem:[#allocation2 + $0xd8] sm:$0xf] (!%p263_p2), %vm307_vm1, %v6540_v4  ;;  %435 = vst [vmem:[#allocation3] sm:$0xf] (!%p263_p2), %v6540_v4  ;;  %v384_v7 = vld [vmem:[#allocation2 + $0x98] sm:$0x1] (!%p263_p2) }
   0xa   : > { %436 = vst [vmem:[#allocation3 + $0x4] sm:$0x1] (!%p263_p2), %v6540_v4  ;;  %438 = vst [vmem:[#allocation3 + $0x48] sm:$0xf] (!%p263_p2), %v6540_v4  ;;  %v6629_v12 = vld [vmem:[%s8037_s4] ss:$0 sm:$0xff] (!%p263_p2) }
   0xb   : > { %439 = vst [vmem:[#allocation3 + $0x4c] sm:$0x1] (!%p263_p2), %v6540_v4  ;;  %vm6613_vm4 = vmand (!%p263_p2), %vm309_vm2, %vm310_vm3  ;;  %v1299_v13 = vld [vmem:[%s8034_s1] sm:$0x3] (!%p263_p2)  ;;  %vm472_vm5 = vsmask.f32 (!%p263_p2), 7938 }
   0xc   : > { %v313_v8 = vsel (!%p263_p2), %vm6613_vm4, 0, %v312_v0  ;;  %v317_v9 = vsel (!%p263_p2), %vm6613_vm4, 0, %v316_v1  ;;  %v321_v10 = vsel (!%p263_p2), %vm6613_vm4, 0, %v320_v5  ;;  %v385_v11 = vsel (!%p263_p2), %vm6613_vm4, 0, %v384_v7  ;;  %v6643_v15 = vld [vmem:[%s8038_s5] ss:$0 sm:$0xff] (!%p263_p2)  ;;  %6414 = vmatprep.subr.msk.bf16.mxu0 (!%p263_p2), %vm1459_vm0, %v1299_v13  ;;  %vm6691_vm8 = vmand (!%p263_p2), %vm307_vm1, %vm472_vm5 }
   0xd   : > { %s8058_s28 = smov (!%p6597_p3, %s5338_s28), 1  ;;  %314 = vst [vmem:[#allocation2 + $0x4] sm:$0x1] %v313_v8  ;;  %318 = vst [vmem:[#allocation2 + $0x4c] sm:$0x1] %v317_v9  ;;  %v6668_v40 = vsel %vm1459_vm0, %v1299_v13, 0 }
   0xe   : > { %s5741_s10 = sshll.u32 %s8058_s28, 8  ;;  %322 = vst [vmem:[#allocation2 + $0x94] sm:$0x1] %v321_v10  ;;  %386 = vst [vmem:[#allocation2 + $0x98] sm:$0x1] %v385_v11  ;;  %vm440_vm11 = vcmask 1040384  }
   0xf   : > { %s6634_s15 = scalar_lea.vmem %s8033_s0, %s5741_s10  ;;  %v387_v16 = vld [vmem:[#allocation2 + $0xa0] sm:$0x1]  ;;  %v390_v19 = vld [vmem:[#allocation2 + $0xa8] sm:$0x1]  ;;  %v381_v24 = vld [vmem:[#allocation2 + $0x90] sm:$0x1] }
  0x10   : > { %v520_v14 = vld [vmem:[%s6634_s15 + $0x80] sm:$0xff]  ;;  %v388_v18 = vsel %vm6613_vm4, 0, %v387_v16  ;;  %v521_v20 = vld [vmem:[%s6634_s15 + $0x88] sm:$0xff]  ;;  %v522_v21 = vld [vmem:[%s6634_s15 + $0x90] sm:$0xff]  ;;  %v382_v29 = vsel %vm6613_vm4, 0, %v381_v24  ;;  %v391_v32 = vsel %vm6613_vm4, 0, %v390_v19 }
  0x11   : > { %v559_v17 = vmul.f32 %v6629_v12, %v520_v14  ;;  %v327_v22 = vld [vmem:[#allocation2] sm:$0x1]  ;;  %v354_v23 = vld [vmem:[#allocation2 + $0x48] sm:$0x1]  ;;  %389 = vst [vmem:[#allocation2 + $0xa0] sm:$0x1] %v388_v18  ;;  %v560_v25 = vmul.f32 %v6629_v12, %v521_v20  ;;  %v561_v26 = vmul.f32 %v6629_v12, %v522_v21  ;;  %vm7344_vm12 = vmand %vm440_vm11, %vm310_vm3 }
  0x12   : > { %v328_v27 = vsel %vm6613_vm4, 0, %v327_v22  ;;  %v355_v28 = vsel %vm6613_vm4, 0, %v354_v23  ;;  %v523_v31 = vld [vmem:[%s6634_s15 + $0x98] sm:$0xff]  ;;  %383 = vst [vmem:[#allocation2 + $0x90] sm:$0x1] %v382_v29  ;;  %v524_v36 = vld [vmem:[%s6634_s15 + $0xa0] sm:$0xff]  ;;  %vm7355_vm13 = vmand %vm440_vm11, %vm472_vm5 }
  0x13   : > { %v598_v30 = vadd.f32 %v6643_v15, %v559_v17  ;;  %329 = vst [vmem:[#allocation2] sm:$0x1] %v328_v27  ;;  %356 = vst [vmem:[#allocation2 + $0x48] sm:$0x1] %v355_v28  ;;  %v599_v33 = vadd.f32 %v6643_v15, %v560_v25  ;;  %v600_v34 = vadd.f32 %v6643_v15, %v561_v26  ;;  %v393_v35 = vld [vmem:[#allocation2 + $0xb0] sm:$0x1] }
  0x14   : > { %v562_v37 = vmul.f32 %v6629_v12, %v523_v31  ;;  %392 = vst [vmem:[#allocation2 + $0xa8] sm:$0x1] %v391_v32  ;;  %v394_v41 = vsel %vm6613_vm4, 0, %v393_v35  ;;  %v563_v42 = vmul.f32 %v6629_v12, %v524_v36  ;;  %vm1317_vm6 = vsmask.f32 3328  ;;  %v525_v48 = vld [vmem:[%s6634_s15 + $0xa8] sm:$0xff] }
  0x15   : > { %v630_v38 = vmax.f32 %v598_v30, 0.0  ;;  %v1302_v39 = vld [vmem:[#allocation2 + $0x94] sm:$0x1]  ;;  %vm1318_vm7 = vsmask.f32 7440  ;;  %v631_v44 = vmax.f32 %v599_v33, 0.0  ;;  %v6679_v52 = vmul.f32 %v6629_v12, %v525_v48 }
  0x16   : > { %v1330_v43 = vshll.u32 %v1302_v39, 16  ;;  %v632_v45 = vmax.f32 %v600_v34, 0.0  ;;  %395 = vst [vmem:[#allocation2 + $0xb0] sm:$0x1] %v394_v41  ;;  %v396_v46 = vld [vmem:[#allocation2 + $0xb8] sm:$0x1]  ;;  %v601_v47 = vadd.f32 %v6643_v15, %v562_v37  ;;  %v602_v51 = vadd.f32 %v6643_v15, %v563_v42  ;;  %vm6706_vm9 = vmor %vm1317_vm6, %vm1318_vm7 }
  0x17   : > { %v5759_v49 = vpack.c.bf16 %v630_v38, %v630_v38  ;;  %v397_v50 = vsel %vm6613_vm4, 0, %v396_v46  ;;  %v5760_v54 = vpack.c.bf16 %v631_v44, %v631_v44  ;;  %v399_v57 = vld [vmem:[#allocation2 + $0xc0] sm:$0x1]  ;;  %v402_v58 = vld [vmem:[#allocation2 + $0xc8] sm:$0x1]  ;;  %v526_v34 = vld [vmem:[%s6634_s15 + $0xb0] sm:$0xff] }
  0x18   : > { %v6681_v53 = vrot.slane %v1330_v43, 5  ;;  %v5761_v55 = vpack.c.bf16 %v632_v45, %v632_v45  ;;  %398 = vst [vmem:[#allocation2 + $0xb8] sm:$0x1] %v397_v50  ;;  %v633_v56 = vmax.f32 %v601_v47, 0.0  ;;  %v634_v61 = vmax.f32 %v602_v51, 0.0  ;;  %s5742_s12 = sshll.u32 %s8058_s28, 6 }
  0x19   : > { %v903_v59 = vshrl.u32 %v5759_v49, 16  ;;  %v906_v60 = vshll.u32 %v5759_v49, 16  ;;  %v400_v62 = vsel %vm6613_vm4, 0, %v399_v57  ;;  %v1196_v63 = vld [vmem:[#allocation2 + $0x9c] sm:$0x1]  ;;  %v911_v0 = vshrl.u32 %v5760_v54, 16  ;;  %s305_s16 = scalar_lea.vmem %s8041_s8, %s5742_s12 }
  0x1a   : > { %v914_v1 = vshll.u32 %v5760_v54, 16  ;;  %v919_v2 = vshrl.u32 %v5761_v55, 16  ;;  %v922_v3 = vshll.u32 %v5761_v55, 16  ;;  %401 = vst [vmem:[#allocation2 + $0xc0] sm:$0x1] %v400_v62  ;;  %v5762_v8 = vpack.c.bf16 %v633_v56, %v633_v56  ;;  %v528_v55 = vld [vmem:[%s6634_s15 + $0xc0] sm:$0xff] }
  0x1b   : > { %v905_v4 = vrot.slane %v903_v59, 7  ;;  %v1301_v5 = vld [vmem:[#allocation2 + $0x90] sm:$0xf]  ;;  %v1202_v7 = vld [vmem:[#allocation2 + $0xa4] sm:$0x1]  ;;  %v6685_v9 = vpack.c.bf16 %v634_v61, %v634_v61  ;;  %v403_v10 = vsel %vm6613_vm4, 0, %v402_v58  ;;  %v565_v54 = vmul.f32 %v6629_v12, %v526_v34 }
  0x1c   : > { %v1193_v13 = vld [vmem:[#allocation2 + $0x98] sm:$0xf]  ;;  %v1321_v14 = vshrl.u32 %v1301_v5, 16  ;;  %v1324_v16 = vshll.u32 %v1301_v5, 16  ;;  %v913_v17 = vrot.slane %v911_v0, 7  ;;  %v921_v18 = vrot.slane %v919_v2, 7 }
  0x1d   : > { %v1208_v19 = vld [vmem:[#allocation2 + $0xac] sm:$0x1]  ;;  %404 = vst [vmem:[#allocation2 + $0xc8] sm:$0x1] %v403_v10  ;;  %v908_v20 = vor.u32 %v906_v60, %v905_v4  ;;  %v909_v21 = vrot.slane %v905_v4, 4  ;;  %v927_v23 = vshrl.u32 %v5762_v8, 16  ;;  %v603_v58 = vadd.f32 %v6643_v15, %v6679_v52 }
  0x1e   : > { %v1199_v22 = vld [vmem:[#allocation2 + $0xa0] sm:$0xf]  ;;  %v930_v24 = vshll.u32 %v5762_v8, 16  ;;  %v1323_v25 = vrot.slane %v1321_v14, 4  ;;  %v1326_v26 = vrot.slane %v1324_v16, 5  ;;  %v916_v27 = vor.u32 %v914_v1, %v913_v17  ;;  %v529_v62 = vld [vmem:[%s6634_s15 + $0xc8] sm:$0xff] }
  0x1f   : > { %v917_v28 = vrot.slane %v913_v17, 4  ;;  %v1205_v29 = vld [vmem:[#allocation2 + $0xa8] sm:$0xf]  ;;  %v1194_v30 = vsel %vm6691_vm8, %v908_v20, %v1193_v13  ;;  %v1197_v31 = vsel %vm6613_vm4, %v909_v21, %v1196_v63  ;;  %v924_v32 = vor.u32 %v922_v3, %v921_v18  ;;  %v408_v39 = vld [vmem:[#allocation2 + $0xd8] sm:$0x1]  ;;  %v530_v14 = vld [vmem:[%s6634_s15 + $0xd0] sm:$0xff] }
  0x20   : > { %v925_v33 = vrot.slane %v921_v18, 4  ;;  %1195 = vst [vmem:[#allocation2 + $0x98] sm:$0xf] %v1194_v30  ;;  %1198 = vst [vmem:[#allocation2 + $0x9c] sm:$0x1] %v1197_v31  ;;  %v1327_v35 = vor.u32 %v1326_v26, %v1323_v25  ;;  %v1200_v36 = vsel %vm6691_vm8, %v916_v27, %v1199_v22  ;;  %v929_v38 = vrot.slane %v927_v23, 7 }
  0x21   : > { %v1203_v37 = vsel %vm6613_vm4, %v917_v28, %v1202_v7  ;;  %v411_v41 = vld [vmem:[#allocation2 + $0xe0] sm:$0x1]  ;;  %1201 = vst [vmem:[#allocation2 + $0xa0] sm:$0xf] %v1200_v36  ;;  %v1206_v43 = vsel %vm6691_vm8, %v924_v32, %v1205_v29  ;;  %v935_v45 = vshrl.u32 %v6685_v9, 16  ;;  %v938_v46 = vshll.u32 %v6685_v9, 16 }
  0x22   : > { %1204 = vst [vmem:[#allocation2 + $0xa4] sm:$0x1] %v1203_v37  ;;  %v1209_v44 = vsel %vm6613_vm4, %v925_v33, %v1208_v19  ;;  %v1211_v47 = vld [vmem:[#allocation2 + $0xb0] sm:$0xf]  ;;  %v1214_v48 = vld [vmem:[#allocation2 + $0xb4] sm:$0x1]  ;;  %v932_v50 = vor.u32 %v930_v24, %v929_v38  ;;  %v604_v3 = vadd.f32 %v6643_v15, %v565_v54  ;;  %v567_v8 = vmul.f32 %v6629_v12, %v528_v55 }
  0x23   : > { %v6716_v49 = vrot.slane %v1327_v35, 4  ;;  %1207 = vst [vmem:[#allocation2 + $0xa8] sm:$0xf] %v1206_v43  ;;  %1210 = vst [vmem:[#allocation2 + $0xac] sm:$0x1] %v1209_v44  ;;  %v933_v51 = vrot.slane %v929_v38, 4  ;;  %v568_v16 = vmul.f32 %v6629_v12, %v529_v62  ;;  %v569_v33 = vmul.f32 %v6629_v12, %v530_v14 }
  0x24   : > { %v414_v56 = vld [vmem:[#allocation2 + $0xe8] sm:$0x1]  ;;  %v937_v57 = vrot.slane %v935_v45, 7  ;;  %v409_v59 = vsel %vm6613_vm4, 0, %v408_v39  ;;  %v412_v60 = vsel %vm6613_vm4, 0, %v411_v41  ;;  %v1212_v0 = vsel %vm6691_vm8, %v932_v50, %v1211_v47  ;;  %v531_v17 = vld [vmem:[%s6634_s15 + $0xd8] sm:$0xff] }
  0x25   : > { %v417_v61 = vld [vmem:[#allocation2 + $0xf0] sm:$0x1]  ;;  %v1333_v63 = vsel %vm6706_vm9, %v6716_v49, %v6681_v53  ;;  %v1215_v52 = vsel %vm6613_vm4, %v933_v51, %v1214_v48  ;;  %v1217_v1 = vld [vmem:[#allocation2 + $0xb8] sm:$0xf]  ;;  %v1220_v2 = vld [vmem:[#allocation2 + $0xbc] sm:$0x1]  ;;  %v6752_v24 = vadd.f32 %v6643_v15, %v567_v8  ;;  %v6758_v34 = vadd.f32 %v6643_v15, %v568_v16 }
  0x26   : > { %410 = vst [vmem:[#allocation2 + $0xd8] sm:$0x1] %v409_v59  ;;  %413 = vst [vmem:[#allocation2 + $0xe0] sm:$0x1] %v412_v60  ;;  %v940_v4 = vor.u32 %v938_v46, %v937_v57  ;;  %v941_v5 = vrot.slane %v937_v57, 4  ;;  %v635_v7 = vmax.f32 %v603_v58, 0.0  ;;  %v6761_v35 = vmul.f32 %v6629_v12, %v531_v17 }
  0x27   : > { %1213 = vst [vmem:[#allocation2 + $0xb0] sm:$0xf] %v1212_v0  ;;  %1216 = vst [vmem:[#allocation2 + $0xb4] sm:$0x1] %v1215_v52  ;;  %v636_v9 = vmax.f32 %v604_v3, 0.0  ;;  %v415_v10 = vsel %vm6613_vm4, 0, %v414_v56  ;;  %v6767_v55 = vadd.f32 %v6643_v15, %v569_v33 }
  0x28   : > { %v418_v13 = vsel %vm6613_vm4, 0, %v417_v61  ;;  %v532_v18 = vld [vmem:[%s6634_s15 + $0xe0] sm:$0xff]  ;;  %v1303_v19 = vld [vmem:[#allocation2 + $0x98] sm:$0xf]  ;;  %v1304_v20 = vld [vmem:[#allocation2 + $0x9c] sm:$0x1]  ;;  %v1218_v21 = vsel %vm6691_vm8, %v940_v4, %v1217_v1  ;;  %v1221_v22 = vsel %vm6613_vm4, %v941_v5, %v1220_v2  ;;  %v6749_v23 = vpack.c.bf16 %v635_v7, %v635_v7 }
  0x29   : > { %416 = vst [vmem:[#allocation2 + $0xe8] sm:$0x1] %v415_v10  ;;  %419 = vst [vmem:[#allocation2 + $0xf0] sm:$0x1] %v418_v13  ;;  %v1335_v25 = vshrl.u32 %v1303_v19, 16  ;;  %v1338_v26 = vshll.u32 %v1303_v19, 16  ;;  %v6754_v29 = vpack.c.bf16 %v636_v9, %v636_v9  ;;  %v6764_v36 = vmul.f32 %v6629_v12, %v532_v18 }
  0x2a   : > { %v1344_v27 = vshll.u32 %v1304_v20, 16  ;;  %v1305_v28 = vld [vmem:[#allocation2 + $0xa0] sm:$0xf]  ;;  %1219 = vst [vmem:[#allocation2 + $0xb8] sm:$0xf] %v1218_v21  ;;  %v943_v5 = vshrl.u32 %v6749_v23, 16 }
  0x2b   : > { %1222 = vst [vmem:[#allocation2 + $0xbc] sm:$0x1] %v1221_v22  ;;  %v1306_v30 = vld [vmem:[#allocation2 + $0xa4] sm:$0x1]  ;;  %v1307_v31 = vld [vmem:[#allocation2 + $0xa8] sm:$0xf] }
  0x2c   : > { %v1308_v32 = vld [vmem:[#allocation2 + $0xac] sm:$0x1]  ;;  %v1337_v37 = vrot.slane %v1335_v25, 4  ;;  %v1340_v38 = vrot.slane %v1338_v26, 5  ;;  %v1346_v39 = vrot.slane %v1344_v27, 5  ;;  %v1349_v41 = vshrl.u32 %v1305_v28, 16 }
  0x2d   : > { %v1352_v43 = vshll.u32 %v1305_v28, 16  ;;  %v1358_v44 = vshll.u32 %v1306_v30, 16  ;;  %v1363_v45 = vshrl.u32 %v1307_v31, 16  ;;  %v1366_v46 = vshll.u32 %v1307_v31, 16  ;;  %v1226_v53 = vld [vmem:[#allocation2 + $0xc4] sm:$0x1] }
  0x2e   : > { %v1341_v47 = vor.u32 %v1340_v38, %v1337_v37  ;;  %v1351_v48 = vrot.slane %v1349_v41, 4  ;;  %v1372_v50 = vshll.u32 %v1308_v32, 16  ;;  %v1309_v51 = vld [vmem:[#allocation2 + $0xb0] sm:$0xf]  ;;  %v1310_v54 = vld [vmem:[#allocation2 + $0xb4] sm:$0x1] }
  0x2f   : > { %v1354_v56 = vrot.slane %v1352_v43, 5  ;;  %v1360_v57 = vrot.slane %v1358_v44, 5  ;;  %v1365_v58 = vrot.slane %v1363_v45, 4  ;;  %v1368_v59 = vrot.slane %v1366_v46, 5  ;;  %v1223_v31 = vld [vmem:[#allocation2 + $0xc0] sm:$0xf] }
  0x30   : > { %v1342_v60 = vrot.slane %v1341_v47, 4  ;;  %v1374_v61 = vrot.slane %v1372_v50, 5  ;;  %v1377_v62 = vshrl.u32 %v1309_v51, 16  ;;  %v1380_v0 = vshll.u32 %v1309_v51, 16  ;;  %v420_v45 = vld [vmem:[#allocation2 + $0xf8] sm:$0x1] }
  0x31   : > { %v1355_v52 = vor.u32 %v1354_v56, %v1351_v48  ;;  %v1369_v1 = vor.u32 %v1368_v59, %v1365_v58  ;;  %v1311_v2 = vld [vmem:[#allocation2 + $0xb8] sm:$0xf]  ;;  %v1386_v4 = vshll.u32 %v1310_v54, 16  ;;  %v945_v26 = vrot.slane %v943_v5, 7  ;;  %v1229_v51 = vld [vmem:[#allocation2 + $0xc8] sm:$0xf] }
  0x32   : > { %v1312_v3 = vld [vmem:[#allocation2 + $0xbc] sm:$0x1]  ;;  %v1347_v7 = vsel %vm6706_vm9, %v1342_v60, %v1346_v39  ;;  %v1379_v8 = vrot.slane %v1377_v62, 4  ;;  %v1382_v9 = vrot.slane %v1380_v0, 5  ;;  %v1391_v10 = vshrl.u32 %v1311_v2, 16 }
  0x33   : > { %v5382_v13 = vcombine.low %v1333_v63, %v1347_v7  ;;  %v1356_v14 = vrot.slane %v1355_v52, 4  ;;  %v1370_v16 = vrot.slane %v1369_v1, 4  ;;  %v1388_v17 = vrot.slane %v1386_v4, 5  ;;  %v5398_v39 = vld [vmem:[%s8034_s1 + $0x4] sm:$0x3] }
  0x34   : > { %v1383_v18 = vor.u32 %v1382_v9, %v1379_v8  ;;  %v1393_v19 = vrot.slane %v1391_v10, 4  ;;  %v1394_v20 = vshll.u32 %v1311_v2, 16  ;;  %v1400_v21 = vshll.u32 %v1312_v3, 16  ;;  %v1232_v54 = vld [vmem:[#allocation2 + $0xcc] sm:$0x1] }
  0x35   : > { %5947 = vmatprep.mubr.msk.bf16.mxu0 %vm1446_vm10, %v5382_v13  ;;  %v1361_v22 = vsel %vm6706_vm9, %v1356_v14, %v1360_v57  ;;  %v1375_v25 = vsel %vm6706_vm9, %v1370_v16, %v1374_v61  ;;  %v946_v27 = vshll.u32 %v6749_v23, 16  ;;  %v949_v33 = vrot.slane %v945_v26, 4  ;;  %v423_v60 = vld [vmem:[#allocation2 + $0x100] sm:$0x1]  ;;  %v426_v52 = vld [vmem:[#allocation2 + $0x108] sm:$0x1] }
  0x36   : > { %v5383_v49 = vcombine.low %v1361_v22, %v1375_v25  ;;  %v1384_v63 = vrot.slane %v1383_v18, 4  ;;  %v1396_v28 = vrot.slane %v1394_v20, 5  ;;  %v1402_v30 = vrot.slane %v1400_v21, 5  ;;  %v429_v5 = vld [vmem:[#allocation2 + $0x110] sm:$0x1]  ;;  %v533_v13 = vld [vmem:[%s6634_s15 + $0xe8] sm:$0xff] }
  0x37   : > { %v948_v32 = vor.u32 %v946_v27, %v945_v26  ;;  %v951_v37 = vshrl.u32 %v6754_v29, 16  ;;  %v954_v38 = vshll.u32 %v6754_v29, 16  ;;  %v638_v43 = vmax.f32 %v6752_v24, 0.0  ;;  %v534_v14 = vld [vmem:[%s6634_s15 + $0xf0] sm:$0xff]  ;;  %v1241_v16 = vld [vmem:[#allocation2 + $0xe0] sm:$0xf] }
  0x38   : > { %5948 = vmatmul.mubr.msk.bf16.vlgmr.msra.gmra.mrb[0].mxu0 %vm1446_vm10, %v5383_v49  ;;  %v1389_v23 = vsel %vm6706_vm9, %v1384_v63, %v1388_v17  ;;  %v1397_v41 = vor.u32 %v1396_v28, %v1393_v19  ;;  %v639_v44 = vmax.f32 %v6758_v34, 0.0  ;;  %v1227_v47 = vsel %vm6613_vm4, %v949_v33, %v1226_v53  ;;  %v1247_v26 = vld [vmem:[#allocation2 + $0xe8] sm:$0xf]  ;;  %v451_v6 = vld [vmem:[#allocation3 + $0x18] sm:$0x1] }
  0x39   : > { %5956 = vmatpush3.bf16.msra.mxu0 %v6668_v40  ;;  %v953_v46 = vrot.slane %v951_v37, 7  ;;  %v1224_v29 = vsel %vm6691_vm8, %v948_v32, %v1223_v31  ;;  %v640_v48 = vmax.f32 %v6767_v55, 0.0  ;;  %1228 = vst [vmem:[#allocation2 + $0xc4] sm:$0x1] %v1227_v47  ;;  %v5767_v24 = vpack.c.bf16 %v638_v43, %v638_v43  ;;  %v1253_v37 = vld [vmem:[#allocation2 + $0xf0] sm:$0xf] }
  0x3a   : > { %v1398_v50 = vrot.slane %v1397_v41, 4  ;;  %1225 = vst [vmem:[#allocation2 + $0xc0] sm:$0xf] %v1224_v29  ;;  %6415 = vmatprep.subr.msk.bf16.mxu0 %vm1459_vm0, %v5398_v39  ;;  %v5768_v34 = vpack.c.bf16 %v639_v44, %v639_v44  ;;  %v6801_v40 = vsel %vm1459_vm0, %v5398_v39, 0  ;;  %v421_v59 = vsel %vm6613_vm4, 0, %v420_v45 }
  0x3b   : > { %v956_v56 = vor.u32 %v954_v38, %v953_v46  ;;  %v957_v57 = vrot.slane %v953_v46, 4  ;;  %v5769_v58 = vpack.c.bf16 %v640_v48, %v640_v48  ;;  %v967_v61 = vshrl.u32 %v5767_v24, 16  ;;  %422 = vst [vmem:[#allocation2 + $0xf8] sm:$0x1] %v421_v59 }
  0x3c   : > { %v1403_v55 = vsel %vm6706_vm9, %v1398_v50, %v1402_v30  ;;  %v970_v62 = vshll.u32 %v5767_v24, 16  ;;  %v975_v0 = vshrl.u32 %v5768_v34, 16  ;;  %v978_v4 = vshll.u32 %v5768_v34, 16 }
  0x3d   : > { %v5384_v1 = vcombine.low %v1389_v23, %v1403_v55  ;;  %v1230_v2 = vsel %vm6691_vm8, %v956_v56, %v1229_v51  ;;  %v1233_v3 = vsel %vm6613_vm4, %v957_v57, %v1232_v54  ;;  %v6811_v7 = vrot.slane %v967_v61, 7  ;;  %v324_v61 = vld [vmem:[#allocation2 + $0xdc] sm:$0x1] }
  0x3e   : > { %1231 = vst [vmem:[#allocation2 + $0xc8] sm:$0xf] %v1230_v2  ;;  %1234 = vst [vmem:[#allocation2 + $0xcc] sm:$0x1] %v1233_v3  ;;  %v6813_v8 = vrot.slane %v975_v0, 7  ;;  %v983_v9 = vshrl.u32 %v5769_v58, 16  ;;  %v609_v18 = vadd.f32 %v6643_v15, %v6761_v35  ;;  %v610_v19 = vadd.f32 %v6643_v15, %v6764_v36 }
  0x3f   : > { %v986_v10 = vshll.u32 %v5769_v58, 16  ;;  %5951 = vmatprep.mubr.msk.bf16.mxu0 %vm1446_vm10, %v5384_v1  ;;  %v424_v17 = vsel %vm6613_vm4, 0, %v423_v60  ;;  %v427_v20 = vsel %vm6613_vm4, 0, %v426_v52  ;;  %v972_v21 = vor.u32 %v970_v62, %v6811_v7  ;;  %v512_v3 = vld [vmem:[%s6634_s15 + $0x40] sm:$0xff] }
  0x40   : > { %v980_v22 = vor.u32 %v978_v4, %v6813_v8  ;;  %v6828_v25 = vrot.slane %v983_v9, 7  ;;  %425 = vst [vmem:[#allocation2 + $0x100] sm:$0x1] %v424_v17  ;;  %428 = vst [vmem:[#allocation2 + $0x108] sm:$0x1] %v427_v20  ;;  %v430_v27 = vsel %vm6613_vm4, 0, %v429_v5  ;;  %v572_v36 = vmul.f32 %v6629_v12, %v533_v13 }
  0x41   : > { %v1313_v53 = vld [vmem:[#allocation2 + $0xc0] sm:$0xf]  ;;  %v1314_v35 = vld [vmem:[#allocation2 + $0xc4] sm:$0x1]  ;;  %v641_v49 = vmax.f32 %v609_v18, 0.0  ;;  %v642_v63 = vmax.f32 %v610_v19, 0.0  ;;  %v573_v28 = vmul.f32 %v6629_v12, %v534_v14  ;;  %v1242_v33 = vsel %vm6691_vm8, %v972_v21, %v1241_v16 }
  0x42   : > { %431 = vst [vmem:[#allocation2 + $0x110] sm:$0x1] %v430_v27  ;;  %v1405_v30 = vshrl.u32 %v1313_v53, 16  ;;  %v1408_v31 = vshll.u32 %v1313_v53, 16  ;;  %v1414_v32 = vshll.u32 %v1314_v35, 16  ;;  %v988_v38 = vor.u32 %v986_v10, %v6828_v25 }
  0x43   : > { %1243 = vst [vmem:[#allocation2 + $0xe0] sm:$0xf] %v1242_v33  ;;  %v1248_v39 = vsel %vm6691_vm8, %v980_v22, %v1247_v26  ;;  %v5770_v23 = vpack.c.bf16 %v641_v49, %v641_v49  ;;  %v5771_v41 = vpack.c.bf16 %v642_v63, %v642_v63  ;;  %v611_v46 = vadd.f32 %v6643_v15, %v572_v36  ;;  %v1259_v2 = vld [vmem:[#allocation2 + $0xf8] sm:$0xf]  ;;  %v1244_v13 = vld [vmem:[#allocation2 + $0xe4] sm:$0x1] }
  0x44   : > { %v1407_v43 = vrot.slane %v1405_v30, 4  ;;  %v1410_v44 = vrot.slane %v1408_v31, 5  ;;  %v1416_v45 = vrot.slane %v1414_v32, 5  ;;  %1249 = vst [vmem:[#allocation2 + $0xe8] sm:$0xf] %v1248_v39  ;;  %v1254_v48 = vsel %vm6691_vm8, %v988_v38, %v1253_v37 }
  0x45   : > { %v1315_v29 = vld [vmem:[#allocation2 + $0xc8] sm:$0xf]  ;;  %v1316_v47 = vld [vmem:[#allocation2 + $0xcc] sm:$0x1]  ;;  %v991_v50 = vshrl.u32 %v5770_v23, 16  ;;  %v994_v51 = vshll.u32 %v5770_v23, 16  ;;  %v612_v54 = vadd.f32 %v6643_v15, %v573_v28  ;;  %v551_v33 = vmul.f32 %v6629_v12, %v512_v3 }
  0x46   : > { %v1411_v24 = vor.u32 %v1410_v44, %v1407_v43  ;;  %v1419_v34 = vshrl.u32 %v1315_v29, 16  ;;  %v1422_v56 = vshll.u32 %v1315_v29, 16  ;;  %v1428_v57 = vshll.u32 %v1316_v47, 16  ;;  %1255 = vst [vmem:[#allocation2 + $0xf0] sm:$0xf] %v1254_v48 }
  0x47   : > { %v6843_v58 = vrot.slane %v991_v50, 7  ;;  %v999_v59 = vshrl.u32 %v5771_v41, 16  ;;  %v1002_v60 = vshll.u32 %v5771_v41, 16  ;;  %v643_v55 = vmax.f32 %v611_v46, 0.0  ;;  %v1628_v14 = vld [vmem:[#allocation2 + $0xd8] sm:$0xf] }
  0x48   : > { %v1412_v62 = vrot.slane %v1411_v24, 4  ;;  %v1421_v0 = vrot.slane %v1419_v34, 4  ;;  %v1424_v52 = vrot.slane %v1422_v56, 5  ;;  %v1430_v1 = vrot.slane %v1428_v57, 5  ;;  %v1265_v18 = vld [vmem:[#allocation2 + $0x100] sm:$0xf] }
  0x49   : > { %v996_v4 = vor.u32 %v994_v51, %v6843_v58  ;;  %v6847_v5 = vrot.slane %v999_v59, 7  ;;  %v644_v9 = vmax.f32 %v612_v54, 0.0  ;;  %v5772_v10 = vpack.c.bf16 %v643_v55, %v643_v55  ;;  %v1271_v49 = vld [vmem:[#allocation2 + $0x108] sm:$0xf]  ;;  %v1250_v29 = vld [vmem:[#allocation2 + $0xec] sm:$0x1] }
  0x4a   : > { %v1417_v16 = vsel %vm6706_vm9, %v1412_v62, %v1416_v45  ;;  %v1425_v17 = vor.u32 %v1424_v52, %v1421_v0  ;;  %v325_v19 = vsel %vm6613_vm4, 0, %v324_v61  ;;  %v973_v20 = vrot.slane %v6811_v7, 4  ;;  %v1630_v36 = vld [vmem:[#allocation2 + $0xe0] sm:$0xf]  ;;  %v1256_v47 = vld [vmem:[#allocation2 + $0xf4] sm:$0x1] }
  0x4b   : > { %v1004_v21 = vor.u32 %v1002_v60, %v6847_v5  ;;  %v1260_v22 = vsel %vm6691_vm8, %v996_v4, %v1259_v2  ;;  %v5773_v26 = vpack.c.bf16 %v644_v9, %v644_v9  ;;  %v1007_v27 = vshrl.u32 %v5772_v10, 16  ;;  %326 = vst [vmem:[#allocation2 + $0xdc] sm:$0x1] %v325_v19  ;;  %v6432_v30 = vld [vmem:[#allocation2 + $0xd8] ss:$8 sps:$4 sm:$0xff]   ;;  %v513_v52 = vld [vmem:[%s6634_s15 + $0x48] sm:$0xff] }
  0x4c   : > { %v1426_v53 = vrot.slane %v1425_v17, 4  ;;  %1261 = vst [vmem:[#allocation2 + $0xf8] sm:$0xf] %v1260_v22  ;;  %v1010_v35 = vshll.u32 %v5772_v10, 16  ;;  %v1245_v63 = vsel %vm6613_vm4, %v973_v20, %v1244_v13  ;;  %v1645_v28 = vshrl.u32 %v1628_v14, 16 }
  0x4d   : > { %v1266_v7 = vsel %vm6691_vm8, %v1004_v21, %v1265_v18  ;;  %v6861_v31 = vrot.slane %v1007_v27, 7  ;;  %v1015_v32 = vshrl.u32 %v5773_v26, 16  ;;  %1246 = vst [vmem:[#allocation2 + $0xe4] sm:$0x1] %v1245_v63  ;;  %v1018_v38 = vshll.u32 %v5773_v26, 16 }
  0x4e   : > { %v1431_v37 = vsel %vm6706_vm9, %v1426_v53, %v1430_v1  ;;  %1267 = vst [vmem:[#allocation2 + $0x100] sm:$0xf] %v1266_v7  ;;  %v1647_v39 = vrot.slane %v1645_v28, 4  ;;  %v1648_v23 = vshll.u32 %v1628_v14, 16  ;;  %v1632_v41 = vld [vmem:[#allocation2 + $0xe8] sm:$0xf]  ;;  %v552_v26 = vmul.f32 %v6629_v12, %v513_v52 }
  0x4f   : > { %v5385_v43 = vcombine.low %v1417_v16, %v1431_v37  ;;  %v1012_v44 = vor.u32 %v1010_v35, %v6861_v31  ;;  %v6867_v45 = vrot.slane %v1015_v32, 7  ;;  %v1659_v46 = vshrl.u32 %v1630_v36, 16  ;;  %v1277_v48 = vld [vmem:[#allocation2 + $0x110] sm:$0xf]  ;;  %v1262_v18 = vld [vmem:[#allocation2 + $0xfc] sm:$0x1] }
  0x50   : > { %v1650_v50 = vrot.slane %v1648_v23, 5  ;;  %v1662_v51 = vshll.u32 %v1630_v36, 16  ;;  %v981_v54 = vrot.slane %v6813_v8, 4  ;;  %v989_v24 = vrot.slane %v6828_v25, 4  ;;  %v1634_v59 = vld [vmem:[#allocation2 + $0xf0] sm:$0xf] }
  0x51   : > { %5952 = vmatmul.mubr.msk.bf16.gmra.mrb[4].mxu0 %vm1446_vm10, %v5385_v43  ;;  %v1020_v34 = vor.u32 %v1018_v38, %v6867_v45  ;;  %v1272_v56 = vsel %vm6691_vm8, %v1012_v44, %v1271_v49  ;;  %v1661_v57 = vrot.slane %v1659_v46, 4  ;;  %v1673_v60 = vshrl.u32 %v1632_v41, 16  ;;  %v5407_v8 = vld [vmem:[%s8034_s1 + $0x6] sm:$0x3]  ;;  %v6433_v1 = vld [vmem:[#allocation2 + $0xe8] ss:$8 sps:$4 sm:$0xff]  }
  0x52   : > { %5957 = vmatprep.mubr.msk.bf16.mxu0 %vm1446_vm10, %v6432_v30  ;;  %1273 = vst [vmem:[#allocation2 + $0x108] sm:$0xf] %v1272_v56  ;;  %v1629_v55 = vld [vmem:[#allocation2 + $0xdc] sm:$0x1]  ;;  %v1651_v61 = vor.u32 %v1650_v50, %v1647_v39  ;;  %v1664_v62 = vrot.slane %v1662_v51, 5  ;;  %v1251_v25 = vsel %vm6613_vm4, %v981_v54, %v1250_v29  ;;  %v1257_v0 = vsel %vm6613_vm4, %v989_v24, %v1256_v47 }
  0x53   : > { %v1278_v2 = vsel %vm6691_vm8, %v1020_v34, %v1277_v48  ;;  %v1654_v3 = vshll.u32 %v1629_v55, 16  ;;  %1252 = vst [vmem:[#allocation2 + $0xec] sm:$0x1] %v1251_v25  ;;  %1258 = vst [vmem:[#allocation2 + $0xf4] sm:$0x1] %v1257_v0  ;;  %v1675_v4 = vrot.slane %v1673_v60, 4  ;;  %v6888_v27 = vadd.f32 %v6643_v15, %v551_v33 }
  0x54   : > { %v1676_v9 = vshll.u32 %v1632_v41, 16  ;;  %1279 = vst [vmem:[#allocation2 + $0x110] sm:$0xf] %v1278_v2  ;;  %v1631_v10 = vld [vmem:[#allocation2 + $0xe4] sm:$0x1]  ;;  %v1652_v13 = vrot.slane %v1651_v61, 4  ;;  %v1665_v14 = vor.u32 %v1664_v62, %v1661_v57 }
  0x55   : > { %v1687_v16 = vshrl.u32 %v1634_v59, 16  ;;  %v1690_v17 = vshll.u32 %v1634_v59, 16  ;;  %v6434_v19 = vld [vmem:[#allocation2 + $0xf8] ss:$8 sps:$4 sm:$0xff]   ;;  %v1656_v20 = vrot.slane %v1654_v3, 5  ;;  %v1668_v21 = vshll.u32 %v1631_v10, 16 }
  0x56   : > { %v1268_v22 = vld [vmem:[#allocation2 + $0x104] sm:$0x1]  ;;  %v1666_v53 = vrot.slane %v1665_v14, 4  ;;  %v1678_v35 = vrot.slane %v1676_v9, 5  ;;  %v1636_v36 = vld [vmem:[#allocation2 + $0xf8] sm:$0xf] }
  0x57   : > { %v1689_v49 = vrot.slane %v1687_v16, 4  ;;  %v1692_v63 = vrot.slane %v1690_v17, 5  ;;  %v1657_v28 = vsel %vm6706_vm9, %v1652_v13, %v1656_v20  ;;  %v1670_v30 = vrot.slane %v1668_v21, 5  ;;  %v1638_v37 = vld [vmem:[#allocation2 + $0x100] sm:$0xf]  ;;  %v514_v41 = vld [vmem:[%s6634_s15 + $0x50] sm:$0xff] }
  0x58   : > { %v6893_v7 = vsel %vm1459_vm0, %v5407_v8, 0  ;;  %v997_v32 = vrot.slane %v6843_v58, 4  ;;  %v1679_v38 = vor.u32 %v1678_v35, %v1675_v4  ;;  %v1005_v33 = vrot.slane %v6847_v5, 4  ;;  %v1274_v54 = vld [vmem:[#allocation2 + $0x10c] sm:$0x1] }
  0x59   : > { %v1693_v39 = vor.u32 %v1692_v63, %v1689_v49  ;;  %v1701_v23 = vshrl.u32 %v1636_v36, 16  ;;  %5958 = vmatmul.mubr.msk.bf16.vlgmr.msra.gmra.mrb[0].mxu0 %vm1446_vm10, %v6433_v1  ;;  %v1671_v43 = vsel %vm6706_vm9, %v1666_v53, %v1670_v30  ;;  %v1704_v46 = vshll.u32 %v1636_v36, 16  ;;  %v1280_v24 = vld [vmem:[#allocation2 + $0x114] sm:$0x1]  ;;  %v1640_v57 = vld [vmem:[#allocation2 + $0x108] sm:$0xf] }
  0x5a   : > { %v1263_v44 = vsel %vm6613_vm4, %v997_v32, %v1262_v18  ;;  %v1715_v29 = vshrl.u32 %v1638_v37, 16  ;;  %5966 = vmatpush3.bf16.msra.mxu0 %v6801_v40  ;;  %5961 = vmatprep.mubr.msk.bf16.mxu0 %vm1446_vm10, %v6434_v19  ;;  %v5399_v58 = vcombine.low %v1657_v28, %v1671_v43  ;;  %v1633_v47 = vld [vmem:[#allocation2 + $0xec] sm:$0x1]  ;;  %v1635_v48 = vld [vmem:[#allocation2 + $0xf4] sm:$0x1]  ;;  %v1680_v5 = vrot.slane %v1679_v38, 4 }
  0x5b   : > { %v1694_v50 = vrot.slane %v1693_v39, 4  ;;  %1264 = vst [vmem:[#allocation2 + $0xfc] sm:$0x1] %v1263_v44  ;;  %v1269_v51 = vsel %vm6613_vm4, %v1005_v33, %v1268_v22  ;;  %6416 = vmatprep.subr.msk.bf16.mxu0 %vm1459_vm0, %v5407_v8  ;;  %v1682_v34 = vshll.u32 %v1633_v47, 16  ;;  %v1696_v56 = vshll.u32 %v1635_v48, 16 }
  0x5c   : > { %1270 = vst [vmem:[#allocation2 + $0x104] sm:$0x1] %v1269_v51  ;;  %v591_v40 = vadd.f32 %v6643_v15, %v552_v26  ;;  %v6910_v59 = vmul.f32 %v6629_v12, %v514_v41  ;;  %v1703_v60 = vrot.slane %v1701_v23, 4  ;;  %v1706_v55 = vrot.slane %v1704_v46, 5  ;;  %v357_v25 = vld [vmem:[#allocation2 + $0x50] sm:$0x1] }
  0x5d   : > { %v1717_v61 = vrot.slane %v1715_v29, 4  ;;  %v1718_v62 = vshll.u32 %v1638_v37, 16  ;;  %v6435_v0 = vld [vmem:[#allocation2 + $0x108] ss:$8 sps:$4 sm:$0xff]   ;;  %v1684_v52 = vrot.slane %v1682_v34, 5  ;;  %v1698_v1 = vrot.slane %v1696_v56, 5 }
  0x5e   : > { %v1013_v2 = vrot.slane %v6861_v31, 4  ;;  %v1021_v8 = vrot.slane %v6867_v45, 4  ;;  %v1707_v3 = vor.u32 %v1706_v55, %v1703_v60  ;;  %v1642_v9 = vld [vmem:[#allocation2 + $0x110] sm:$0xf]  ;;  %v1729_v10 = vshrl.u32 %v1640_v57, 16  ;;  %v515_v46 = vld [vmem:[%s6634_s15 + $0x58] sm:$0xff] }
  0x5f   : > { %v1720_v4 = vrot.slane %v1718_v62, 5  ;;  %v1732_v15 = vshll.u32 %v1640_v57, 16  ;;  %v1685_v12 = vsel %vm6706_vm9, %v1680_v5, %v1684_v52  ;;  %v1699_v13 = vsel %vm6706_vm9, %v1694_v50, %v1698_v1  ;;  %v360_v31 = vld [vmem:[#allocation2 + $0x58] sm:$0x1]  ;;  %v363_v17 = vld [vmem:[#allocation2 + $0x60] sm:$0x1] }
  0x60   : > { %v1275_v14 = vsel %vm6613_vm4, %v1013_v2, %v1274_v54  ;;  %v1281_v16 = vsel %vm6613_vm4, %v1021_v8, %v1280_v24  ;;  %v5400_v45 = vcombine.low %v1685_v12, %v1699_v13  ;;  %v1708_v18 = vrot.slane %v1707_v3, 4  ;;  %v366_v21 = vld [vmem:[#allocation2 + $0x68] sm:$0x1]  ;;  %v369_v24 = vld [vmem:[#allocation2 + $0x70] sm:$0x1] }
  0x61   : > { %v1721_v19 = vor.u32 %v1720_v4, %v1717_v61  ;;  %1276 = vst [vmem:[#allocation2 + $0x10c] sm:$0x1] %v1275_v14  ;;  %1282 = vst [vmem:[#allocation2 + $0x114] sm:$0x1] %v1281_v16  ;;  %v1731_v20 = vrot.slane %v1729_v10, 4  ;;  %5962 = vmatmul.mubr.msk.bf16.gmra.mrb[4].mxu0 %vm1446_vm10, %v6435_v0  ;;  %v1734_v26 = vrot.slane %v1732_v15, 5 }
  0x62   : > { %v1637_v22 = vld [vmem:[#allocation2 + $0xfc] sm:$0x1]  ;;  %v1743_v53 = vshrl.u32 %v1642_v9, 16  ;;  %v1746_v35 = vshll.u32 %v1642_v9, 16  ;;  %v358_v49 = vsel %vm6613_vm4, 0, %v357_v25  ;;  %5967 = vmatprep.mubr.msk.bf16.mxu0 %vm1446_vm10, %v5399_v58  ;;  %v361_v30 = vsel %vm6613_vm4, 0, %v360_v31 }
  0x63   : > { %v1639_v63 = vld [vmem:[#allocation2 + $0x104] sm:$0x1]  ;;  %v1710_v36 = vshll.u32 %v1637_v22, 16  ;;  %v1722_v28 = vrot.slane %v1721_v19, 4  ;;  %359 = vst [vmem:[#allocation2 + $0x50] sm:$0x1] %v358_v49  ;;  %v1735_v38 = vor.u32 %v1734_v26, %v1731_v20 }
  0x64   : > { %v622_v32 = vmax.f32 %v6888_v27, 0.0  ;;  %v1724_v37 = vshll.u32 %v1639_v63, 16  ;;  %v1745_v39 = vrot.slane %v1743_v53, 4  ;;  %v1748_v33 = vrot.slane %v1746_v35, 5  ;;  %362 = vst [vmem:[#allocation2 + $0x58] sm:$0x1] %v361_v30 }
  0x65   : > { %v1712_v23 = vrot.slane %v1710_v36, 5  ;;  %v623_v41 = vmax.f32 %v591_v40, 0.0  ;;  %v364_v44 = vsel %vm6613_vm4, 0, %v363_v17  ;;  %v1736_v58 = vrot.slane %v1735_v38, 4  ;;  %v5416_v48 = vld [vmem:[%s8034_s1 + $0x8] sm:$0x3] }
  0x66   : > { %v5751_v43 = vpack.c.bf16 %v622_v32, %v622_v32  ;;  %v1726_v29 = vrot.slane %v1724_v37, 5  ;;  %v1749_v47 = vor.u32 %v1748_v33, %v1745_v39  ;;  %365 = vst [vmem:[#allocation2 + $0x60] sm:$0x1] %v364_v44  ;;  %v367_v27 = vsel %vm6613_vm4, 0, %v366_v21  ;;  %v6944_v60 = vld [vmem:[%s8037_s4] ss:$0 sm:$0xff] }
  0x67   : > { %v1713_v5 = vsel %vm6706_vm9, %v1708_v18, %v1712_v23  ;;  %v5752_v50 = vpack.c.bf16 %v623_v41, %v623_v41  ;;  %368 = vst [vmem:[#allocation2 + $0x68] sm:$0x1] %v367_v27  ;;  %v554_v55 = vmul.f32 %v6944_v60, %v515_v46  ;;  %v6950_v61 = vld [vmem:[%s8038_s5] ss:$0 sm:$0xff]  ;;  %v372_v2 = vld [vmem:[#allocation2 + $0x78] sm:$0x1] }
  0x68   : > { %v839_v51 = vshrl.u32 %v5751_v43, 16  ;;  %v842_v54 = vshll.u32 %v5751_v43, 16  ;;  %v1727_v34 = vsel %vm6706_vm9, %v1722_v28, %v1726_v29  ;;  %v1641_v56 = vld [vmem:[#allocation2 + $0x10c] sm:$0x1]  ;;  %v1643_v57 = vld [vmem:[#allocation2 + $0x114] sm:$0x1]  ;;  %v592_v62 = vadd.f32 %v6950_v61, %v6910_v59 }
  0x69   : > { %v1750_v40 = vrot.slane %v1749_v47, 4  ;;  %v5401_v25 = vcombine.low %v1713_v5, %v1727_v34  ;;  %v1738_v0 = vshll.u32 %v1641_v56, 16  ;;  %v1752_v52 = vshll.u32 %v1643_v57, 16  ;;  %5968 = vmatmul.mubr.msk.bf16.vlgmr.msra.gmra.mrb[0].mxu0 %vm1446_vm10, %v5400_v45  ;;  %v516_v14 = vld [vmem:[%s6634_s15 + $0x60] sm:$0xff]  ;;  %v517_v18 = vld [vmem:[%s6634_s15 + $0x68] sm:$0xff]  ;;  %v518_v28 = vld [vmem:[%s6634_s15 + $0x70] sm:$0xff] }
  0x6a   : > { %v6954_v1 = vrot.slane %v839_v51, 7  ;;  %v847_v8 = vshrl.u32 %v5752_v50, 16  ;;  %v850_v3 = vshll.u32 %v5752_v50, 16  ;;  %v1145_v4 = vld [vmem:[#allocation2 + $0x50] sm:$0xf]  ;;  %v593_v9 = vadd.f32 %v6950_v61, %v554_v55  ;;  %5976 = vmatpush3.bf16.msra.mxu0 %v6893_v7  ;;  %v519_v30 = vld [vmem:[%s6634_s15 + $0x78] sm:$0xff] }
  0x6b   : > { %v624_v10 = vmax.f32 %v592_v62, 0.0  ;;  %5971 = vmatprep.mubr.msk.bf16.mxu0 %vm1446_vm10, %v5401_v25  ;;  %v1740_v59 = vrot.slane %v1738_v0, 5  ;;  %v1754_v15 = vrot.slane %v1752_v52, 5  ;;  %v6962_v13 = vsel %vm1459_vm0, %v5416_v48, 0  ;;  %v375_v16 = vld [vmem:[#allocation2 + $0x80] sm:$0x1]  ;;  %6417 = vmatprep.subr.msk.bf16.mxu0 %vm1459_vm0, %v5416_v48 }
  0x6c   : > { %v844_v12 = vor.u32 %v842_v54, %v6954_v1  ;;  %v6965_v31 = vrot.slane %v847_v8, 7  ;;  %v625_v17 = vmax.f32 %v593_v9, 0.0  ;;  %v370_v7 = vsel %vm6613_vm4, 0, %v369_v24  ;;  %v1151_v22 = vld [vmem:[#allocation2 + $0x58] sm:$0xf]  ;;  %v504_v5 = vld [vmem:[%s6634_s15] sm:$0xff] }
  0x6d   : > { %v5753_v45 = vpack.c.bf16 %v624_v10, %v624_v10  ;;  %v1741_v19 = vsel %vm6706_vm9, %v1736_v58, %v1740_v59  ;;  %v1755_v20 = vsel %vm6706_vm9, %v1750_v40, %v1754_v15  ;;  %371 = vst [vmem:[#allocation2 + $0x70] sm:$0x1] %v370_v7  ;;  %v373_v26 = vsel %vm6613_vm4, 0, %v372_v2  ;;  %v378_v36 = vld [vmem:[#allocation2 + $0x88] sm:$0x1] }
  0x6e   : > { %v1146_v21 = vsel %vm6691_vm8, %v844_v12, %v1145_v4  ;;  %v5402_v53 = vcombine.low %v1741_v19, %v1755_v20  ;;  %v852_v35 = vor.u32 %v850_v3, %v6965_v31  ;;  %v5754_v49 = vpack.c.bf16 %v625_v17, %v625_v17  ;;  %374 = vst [vmem:[#allocation2 + $0x78] sm:$0x1] %v373_v26  ;;  %v330_v33 = vld [vmem:[#allocation2 + $0x8] sm:$0x1]  ;;  %v333_v46 = vld [vmem:[#allocation2 + $0x10] sm:$0x1] }
  0x6f   : > { %1147 = vst [vmem:[#allocation2 + $0x50] sm:$0xf] %v1146_v21  ;;  %v855_v63 = vshrl.u32 %v5753_v45, 16  ;;  %v858_v32 = vshll.u32 %v5753_v45, 16  ;;  %v555_v37 = vmul.f32 %v6944_v60, %v516_v14  ;;  %v556_v38 = vmul.f32 %v6944_v60, %v517_v18  ;;  %v1157_v29 = vld [vmem:[#allocation2 + $0x60] sm:$0xf] }
  0x70   : > { %v376_v39 = vsel %vm6613_vm4, 0, %v375_v16  ;;  %v1152_v23 = vsel %vm6691_vm8, %v852_v35, %v1151_v22  ;;  %v863_v43 = vshrl.u32 %v5754_v49, 16  ;;  %v866_v44 = vshll.u32 %v5754_v49, 16  ;;  %v505_v34 = vld [vmem:[%s6634_s15 + $0x8] sm:$0xff]  ;;  %v336_v56 = vld [vmem:[#allocation2 + $0x18] sm:$0x1] }
  0x71   : > { %v6988_v41 = vrot.slane %v855_v63, 7  ;;  %377 = vst [vmem:[#allocation2 + $0x80] sm:$0x1] %v376_v39  ;;  %1153 = vst [vmem:[#allocation2 + $0x58] sm:$0xf] %v1152_v23  ;;  %v594_v58 = vadd.f32 %v6950_v61, %v555_v37  ;;  %v595_v47 = vadd.f32 %v6950_v61, %v556_v38  ;;  %v379_v48 = vsel %vm6613_vm4, 0, %v378_v36  ;;  %5972 = vmatmul.mubr.msk.bf16.gmra.mrb[4].mxu0 %vm1446_vm10, %v5402_v53 }
  0x72   : > { %v557_v27 = vmul.f32 %v6944_v60, %v518_v28  ;;  %v6998_v51 = vrot.slane %v863_v43, 7  ;;  %380 = vst [vmem:[#allocation2 + $0x88] sm:$0x1] %v379_v48  ;;  %v558_v54 = vmul.f32 %v6944_v60, %v519_v30  ;;  %v331_v24 = vsel %vm6613_vm4, 0, %v330_v33  ;;  %v1163_v57 = vld [vmem:[#allocation2 + $0x68] sm:$0xf] }
  0x73   : > { %v860_v50 = vor.u32 %v858_v32, %v6988_v41  ;;  %v626_v40 = vmax.f32 %v594_v58, 0.0  ;;  %v627_v55 = vmax.f32 %v595_v47, 0.0  ;;  %332 = vst [vmem:[#allocation2 + $0x8] sm:$0x1] %v331_v24  ;;  %v334_v25 = vsel %vm6613_vm4, 0, %v333_v46  ;;  %v506_v17 = vld [vmem:[%s6634_s15 + $0x10] sm:$0xff] }
  0x74   : > { %v596_v62 = vadd.f32 %v6950_v61, %v557_v27  ;;  %v868_v0 = vor.u32 %v866_v44, %v6998_v51  ;;  %v597_v2 = vadd.f32 %v6950_v61, %v558_v54  ;;  %335 = vst [vmem:[#allocation2 + $0x10] sm:$0x1] %v334_v25  ;;  %v543_v8 = vmul.f32 %v6944_v60, %v504_v5  ;;  %v339_v16 = vld [vmem:[#allocation2 + $0x20] sm:$0x1]  ;;  %v1169_v63 = vld [vmem:[#allocation2 + $0x70] sm:$0xf] }
  0x75   : > { %v1158_v52 = vsel %vm6691_vm8, %v860_v50, %v1157_v29  ;;  %v5755_v3 = vpack.c.bf16 %v626_v40, %v626_v40  ;;  %v5756_v4 = vpack.c.bf16 %v627_v55, %v627_v55  ;;  %v544_v10 = vmul.f32 %v6944_v60, %v505_v34  ;;  %v507_v28 = vld [vmem:[%s6634_s15 + $0x18] sm:$0xff] }
  0x76   : > { %1159 = vst [vmem:[#allocation2 + $0x60] sm:$0xf] %v1158_v52  ;;  %v628_v9 = vmax.f32 %v596_v62, 0.0  ;;  %v1164_v59 = vsel %vm6691_vm8, %v868_v0, %v1163_v57  ;;  %v629_v15 = vmax.f32 %v597_v2, 0.0  ;;  %v582_v12 = vadd.f32 %v6950_v61, %v543_v8  ;;  %v1175_v32 = vld [vmem:[#allocation2 + $0x78] sm:$0xf] }
  0x77   : > { %v337_v14 = vsel %vm6613_vm4, 0, %v336_v56  ;;  %1165 = vst [vmem:[#allocation2 + $0x68] sm:$0xf] %v1164_v59  ;;  %v871_v45 = vshrl.u32 %v5755_v3, 16  ;;  %v874_v7 = vshll.u32 %v5755_v3, 16  ;;  %v879_v18 = vshrl.u32 %v5756_v4, 16 }
  0x78   : > { %v882_v19 = vshll.u32 %v5756_v4, 16  ;;  %338 = vst [vmem:[#allocation2 + $0x18] sm:$0x1] %v337_v14  ;;  %v6436_v20 = vld [vmem:[#allocation2 + $0x50] ss:$8 sps:$4 sm:$0xff]   ;;  %v5757_v21 = vpack.c.bf16 %v628_v9, %v628_v9  ;;  %v5758_v22 = vpack.c.bf16 %v629_v15, %v629_v15  ;;  %v583_v26 = vadd.f32 %v6950_v61, %v544_v10  ;;  %v508_v52 = vld [vmem:[%s6634_s15 + $0x20] sm:$0xff] }
  0x79   : > { %v7020_v53 = vmax.f32 %v582_v12, 0.0  ;;  %v7022_v35 = vrot.slane %v871_v45, 7  ;;  %v7024_v49 = vrot.slane %v879_v18, 7  ;;  %v340_v36 = vsel %vm6613_vm4, 0, %v339_v16  ;;  %5977 = vmatprep.mubr.msk.bf16.mxu0 %vm1446_vm10, %v6436_v20  ;;  %v1181_v50 = vld [vmem:[#allocation2 + $0x80] sm:$0xf] }
  0x7a   : > { %v545_v30 = vmul.f32 %v6944_v60, %v506_v17  ;;  %v887_v37 = vshrl.u32 %v5757_v21, 16  ;;  %v890_v38 = vshll.u32 %v5757_v21, 16  ;;  %v895_v39 = vshrl.u32 %v5758_v22, 16  ;;  %341 = vst [vmem:[#allocation2 + $0x20] sm:$0x1] %v340_v36 }
  0x7b   : > { %v898_v33 = vshll.u32 %v5758_v22, 16  ;;  %v876_v23 = vor.u32 %v874_v7, %v7022_v35  ;;  %v884_v43 = vor.u32 %v882_v19, %v7024_v49  ;;  %v7033_v44 = vmax.f32 %v583_v26, 0.0  ;;  %v1187_v54 = vld [vmem:[#allocation2 + $0x88] sm:$0xf]  ;;  %v345_v9 = vld [vmem:[#allocation2 + $0x30] sm:$0x1] }
  0x7c   : > { %v5743_v46 = vpack.c.bf16 %v7020_v53, %v7020_v53  ;;  %v7037_v29 = vrot.slane %v887_v37, 7  ;;  %v7039_v58 = vrot.slane %v895_v39, 7  ;;  %v546_v47 = vmul.f32 %v6944_v60, %v507_v28  ;;  %v7052_v56 = vld [vmem:[%s8034_s1 + $0xa] sm:$0x3]  ;;  %v342_v57 = vld [vmem:[#allocation2 + $0x28] sm:$0x1] }
  0x7d   : > { %v584_v48 = vadd.f32 %v6950_v61, %v545_v30  ;;  %v1170_v27 = vsel %vm6691_vm8, %v876_v23, %v1169_v63  ;;  %v1176_v5 = vsel %vm6691_vm8, %v884_v43, %v1175_v32  ;;  %v5744_v24 = vpack.c.bf16 %v7033_v44, %v7033_v44  ;;  %v1097_v15 = vld [vmem:[#allocation2 + $0x8] sm:$0xf]  ;;  %v1100_v12 = vld [vmem:[#allocation2 + $0xc] sm:$0x1]  ;;  %v1106_v7 = vld [vmem:[#allocation2 + $0x14] sm:$0x1] }
  0x7e   : > { %v775_v34 = vshrl.u32 %v5743_v46, 16  ;;  %v6437_v40 = vld [vmem:[#allocation2 + $0x60] ss:$8 sps:$4 sm:$0xff]   ;;  %1171 = vst [vmem:[#allocation2 + $0x70] sm:$0xf] %v1170_v27  ;;  %v892_v55 = vor.u32 %v890_v38, %v7037_v29  ;;  %v900_v62 = vor.u32 %v898_v33, %v7039_v58  ;;  %v778_v25 = vshll.u32 %v5743_v46, 16 }
  0x7f   : > { %1177 = vst [vmem:[#allocation2 + $0x78] sm:$0xf] %v1176_v5  ;;  %v585_v0 = vadd.f32 %v6950_v61, %v546_v47  ;;  %v783_v8 = vshrl.u32 %v5744_v24, 16  ;;  %v786_v3 = vshll.u32 %v5744_v24, 16  ;;  %v7058_v4 = vmax.f32 %v584_v48, 0.0  ;;  %5978 = vmatmul.mubr.msk.bf16.vlgmr.msra.gmra.mrb[0].mxu0 %vm1446_vm10, %v6437_v40  ;;  %v509_v22 = vld [vmem:[%s6634_s15 + $0x28] sm:$0xff] }
  0x80   : > { %v777_v2 = vrot.slane %v775_v34, 7  ;;  %v1182_v10 = vsel %vm6691_vm8, %v892_v55, %v1181_v50  ;;  %v1188_v59 = vsel %vm6691_vm8, %v900_v62, %v1187_v54  ;;  %5986 = vmatpush3.bf16.msra.mxu0 %v6962_v13  ;;  %v1103_v19 = vld [vmem:[#allocation2 + $0x10] sm:$0xf]  ;;  %v343_v21 = vsel %vm6613_vm4, 0, %v342_v57  ;;  %v348_v32 = vld [vmem:[#allocation2 + $0x38] sm:$0x1] }
  0x81   : > { %v7065_v14 = vmax.f32 %v585_v0, 0.0  ;;  %1183 = vst [vmem:[#allocation2 + $0x80] sm:$0xf] %v1182_v10  ;;  %1189 = vst [vmem:[#allocation2 + $0x88] sm:$0xf] %v1188_v59  ;;  %v785_v45 = vrot.slane %v783_v8, 7  ;;  %v5745_v18 = vpack.c.bf16 %v7058_v4, %v7058_v4  ;;  %6418 = vmatprep.subr.msk.bf16.mxu0 %vm1459_vm0, %v7052_v56  ;;  %v547_v26 = vmul.f32 %v6944_v60, %v508_v52 }
  0x82   : > { %v780_v16 = vor.u32 %v778_v25, %v777_v2  ;;  %v781_v17 = vrot.slane %v777_v2, 4  ;;  %v346_v13 = vsel %vm6613_vm4, 0, %v345_v9  ;;  %344 = vst [vmem:[#allocation2 + $0x28] sm:$0x1] %v343_v21  ;;  %v351_v37 = vld [vmem:[#allocation2 + $0x40] sm:$0x1]  ;;  %v548_v5 = vmul.f32 %v6944_v60, %v509_v22 }
  0x83   : > { %v5746_v20 = vpack.c.bf16 %v7065_v14, %v7065_v14  ;;  %v788_v63 = vor.u32 %v786_v3, %v785_v45  ;;  %v789_v36 = vrot.slane %v785_v45, 4  ;;  %347 = vst [vmem:[#allocation2 + $0x30] sm:$0x1] %v346_v13  ;;  %v791_v38 = vshrl.u32 %v5745_v18, 16  ;;  %v510_v43 = vld [vmem:[%s6634_s15 + $0x30] sm:$0xff]  ;;  %v511_v46 = vld [vmem:[%s6634_s15 + $0x38] sm:$0xff] }
  0x84   : > { %v1098_v28 = vsel %vm6691_vm8, %v780_v16, %v1097_v15  ;;  %v1101_v30 = vsel %vm6613_vm4, %v781_v17, %v1100_v12  ;;  %v794_v39 = vshll.u32 %v5745_v18, 16  ;;  %v586_v50 = vadd.f32 %v6950_v61, %v547_v26  ;;  %v1112_v34 = vld [vmem:[#allocation2 + $0x1c] sm:$0x1]  ;;  %v1118_v57 = vld [vmem:[#allocation2 + $0x24] sm:$0x1] }
  0x85   : > { %1099 = vst [vmem:[#allocation2 + $0x8] sm:$0xf] %v1098_v28  ;;  %1102 = vst [vmem:[#allocation2 + $0xc] sm:$0x1] %v1101_v30  ;;  %v799_v33 = vshrl.u32 %v5746_v20, 16  ;;  %v802_v23 = vshll.u32 %v5746_v20, 16  ;;  %v1104_v48 = vsel %vm6691_vm8, %v788_v63, %v1103_v19  ;;  %v1107_v27 = vsel %vm6613_vm4, %v789_v36, %v1106_v7 }
  0x86   : > { %v6438_v47 = vld [vmem:[#allocation2 + $0x70] ss:$8 sps:$4 sm:$0xff]   ;;  %1105 = vst [vmem:[#allocation2 + $0x10] sm:$0xf] %v1104_v48  ;;  %1108 = vst [vmem:[#allocation2 + $0x14] sm:$0x1] %v1107_v27  ;;  %v587_v0 = vadd.f32 %v6950_v61, %v548_v5  ;;  %v549_v9 = vmul.f32 %v6944_v60, %v510_v43  ;;  %v550_v10 = vmul.f32 %v6944_v60, %v511_v46 }
  0x87   : > { %v793_v54 = vrot.slane %v791_v38, 7  ;;  %v801_v24 = vrot.slane %v799_v33, 7  ;;  %v349_v40 = vsel %vm6613_vm4, 0, %v348_v32  ;;  %v352_v55 = vsel %vm6613_vm4, 0, %v351_v37  ;;  %5981 = vmatprep.mubr.msk.bf16.mxu0 %vm1446_vm10, %v6438_v47  ;;  %v1109_v62 = vld [vmem:[#allocation2 + $0x18] sm:$0xf] }
  0x88   : > { %v1115_v25 = vld [vmem:[#allocation2 + $0x20] sm:$0xf]  ;;  %v7098_v52 = vmax.f32 %v586_v50, 0.0  ;;  %350 = vst [vmem:[#allocation2 + $0x38] sm:$0x1] %v349_v40  ;;  %v7102_v12 = vmax.f32 %v587_v0, 0.0  ;;  %v589_v33 = vadd.f32 %v6950_v61, %v550_v10 }
  0x89   : > { %353 = vst [vmem:[#allocation2 + $0x40] sm:$0x1] %v352_v55  ;;  %v6439_v2 = vld [vmem:[#allocation2 + $0x80] ss:$8 sps:$4 sm:$0xff]   ;;  %v796_v8 = vor.u32 %v794_v39, %v793_v54  ;;  %v804_v3 = vor.u32 %v802_v23, %v801_v24  ;;  %v797_v59 = vrot.slane %v793_v54, 4  ;;  %v805_v15 = vrot.slane %v801_v24, 4 }
  0x8a   : > { %v5747_v16 = vpack.c.bf16 %v7098_v52, %v7098_v52  ;;  %5982 = vmatmul.mubr.msk.bf16.gmra.mrb[4].mxu0 %vm1446_vm10, %v6439_v2  ;;  %v7113_v7 = vsel %vm1459_vm0, %v7052_v56, 0  ;;  %v5748_v13 = vpack.c.bf16 %v7102_v12, %v7102_v12  ;;  %v1124_v28 = vld [vmem:[#allocation2 + $0x2c] sm:$0x1]  ;;  %v588_v39 = vadd.f32 %v6950_v61, %v549_v9  ;;  %v1121_v48 = vld [vmem:[#allocation2 + $0x28] sm:$0xf] }
  0x8b   : > { %v1110_v17 = vsel %vm6691_vm8, %v796_v8, %v1109_v62  ;;  %v1116_v45 = vsel %vm6691_vm8, %v804_v3, %v1115_v25  ;;  %v1113_v20 = vsel %vm6613_vm4, %v797_v59, %v1112_v34  ;;  %v1119_v21 = vsel %vm6613_vm4, %v805_v15, %v1118_v57  ;;  %v1127_v2 = vld [vmem:[#allocation2 + $0x30] sm:$0xf] }
  0x8c   : > { %v1977_v18 = vld [vmem:[#allocation2 + $0x8] sm:$0xf]  ;;  %v1978_v19 = vld [vmem:[#allocation2 + $0xc] sm:$0x1]  ;;  %1111 = vst [vmem:[#allocation2 + $0x18] sm:$0xf] %v1110_v17  ;;  %v5783_v15 = vpack.c.bf16 %v7033_v44, %v7020_v53 }
  0x8d   : > { %1117 = vst [vmem:[#allocation2 + $0x20] sm:$0xf] %v1116_v45  ;;  %v807_v22 = vshrl.u32 %v5747_v16, 16  ;;  %v1994_v26 = vshrl.u32 %v1977_v18, 16  ;;  %v1997_v63 = vshll.u32 %v1977_v18, 16  ;;  %v2003_v36 = vshll.u32 %v1978_v19, 16 }
  0x8e   : > { %1114 = vst [vmem:[#allocation2 + $0x1c] sm:$0x1] %v1113_v20  ;;  %1120 = vst [vmem:[#allocation2 + $0x24] sm:$0x1] %v1119_v21  ;;  %v810_v56 = vshll.u32 %v5747_v16, 16  ;;  %v815_v38 = vshrl.u32 %v5748_v13, 16  ;;  %v5784_v20 = vpack.c.bf16 %v7065_v14, %v7058_v4  ;;  %6061 = vmatprep.mubr.msk.bf16.mxu1 %vm1446_vm10, %v5783_v15 }
  0x8f   : > { %v1979_v30 = vld [vmem:[#allocation2 + $0x10] sm:$0xf]  ;;  %v1980_v32 = vld [vmem:[#allocation2 + $0x14] sm:$0x1]  ;;  %v809_v37 = vrot.slane %v807_v22, 7  ;;  %v1996_v23 = vrot.slane %v1994_v26, 4 }
  0x90   : > { %v1999_v43 = vrot.slane %v1997_v63, 5  ;;  %v2005_v46 = vrot.slane %v2003_v36, 5  ;;  %v2008_v47 = vshrl.u32 %v1979_v30, 16  ;;  %v2011_v27 = vshll.u32 %v1979_v30, 16  ;;  %v1130_v63 = vld [vmem:[#allocation2 + $0x34] sm:$0x1] }
  0x91   : > { %v2017_v5 = vshll.u32 %v1980_v32, 16  ;;  %v812_v50 = vor.u32 %v810_v56, %v809_v37  ;;  %v813_v54 = vrot.slane %v809_v37, 4  ;;  %v817_v57 = vrot.slane %v815_v38, 7 }
  0x92   : > { %v2000_v24 = vor.u32 %v1999_v43, %v1996_v23  ;;  %v2010_v34 = vrot.slane %v2008_v47, 4  ;;  %v818_v40 = vshll.u32 %v5748_v13, 16  ;;  %v2013_v55 = vrot.slane %v2011_v27, 5 }
  0x93   : > { %v2019_v62 = vrot.slane %v2017_v5, 5  ;;  %v1122_v25 = vsel %vm6691_vm8, %v812_v50, %v1121_v48  ;;  %v1125_v0 = vsel %vm6613_vm4, %v813_v54, %v1124_v28  ;;  %v1981_v3 = vld [vmem:[#allocation2 + $0x18] sm:$0xf]  ;;  %v821_v59 = vrot.slane %v817_v57, 4 }
  0x94   : > { %v2001_v8 = vrot.slane %v2000_v24, 4  ;;  %v1983_v9 = vld [vmem:[#allocation2 + $0x20] sm:$0xf]  ;;  %v820_v10 = vor.u32 %v818_v40, %v817_v57  ;;  %1123 = vst [vmem:[#allocation2 + $0x28] sm:$0xf] %v1122_v25  ;;  %v2014_v16 = vor.u32 %v2013_v55, %v2010_v34  ;;  %v2022_v18 = vshrl.u32 %v1981_v3, 16 }
  0x95   : > { %1126 = vst [vmem:[#allocation2 + $0x2c] sm:$0x1] %v1125_v0  ;;  %v1982_v17 = vld [vmem:[#allocation2 + $0x1c] sm:$0x1]  ;;  %v1984_v45 = vld [vmem:[#allocation2 + $0x24] sm:$0x1] }
  0x96   : > { %v2025_v19 = vshll.u32 %v1981_v3, 16  ;;  %v2006_v21 = vsel %vm6706_vm9, %v2001_v8, %v2005_v46  ;;  %v2031_v13 = vshll.u32 %v1982_v17, 16  ;;  %v2036_v22 = vshrl.u32 %v1983_v9, 16  ;;  %v1148_v57 = vld [vmem:[#allocation2 + $0x54] sm:$0x1] }
  0x97   : > { %v2039_v26 = vshll.u32 %v1983_v9, 16  ;;  %v2015_v36 = vrot.slane %v2014_v16, 4  ;;  %v2024_v56 = vrot.slane %v2022_v18, 4  ;;  %v2045_v44 = vshll.u32 %v1984_v45, 16  ;;  %v1154_v0 = vld [vmem:[#allocation2 + $0x5c] sm:$0x1] }
  0x98   : > { %v2027_v53 = vrot.slane %v2025_v19, 5  ;;  %v2033_v28 = vrot.slane %v2031_v13, 5  ;;  %v2038_v30 = vrot.slane %v2036_v22, 4  ;;  %v1128_v37 = vsel %vm6691_vm8, %v820_v10, %v1127_v2  ;;  %v7156_v3 = vld [vmem:[%s8036_s3] sm:$0x3] }
  0x99   : > { %v2041_v32 = vrot.slane %v2039_v26, 5  ;;  %v2020_v38 = vsel %vm6706_vm9, %v2015_v36, %v2019_v62  ;;  %v2047_v43 = vrot.slane %v2045_v44, 5  ;;  %1129 = vst [vmem:[#allocation2 + $0x30] sm:$0xf] %v1128_v37  ;;  %v1131_v46 = vsel %vm6613_vm4, %v821_v59, %v1130_v63  ;;  %v7165_v16 = vld [vmem:[%s8034_s1 + $0xc] sm:$0x3]  ;;  %6422 = vmatprep.subr.msk.bf16.mxu1 %vm1459_vm0, %v7156_v3 }
  0x9a   : > { %v2028_v23 = vor.u32 %v2027_v53, %v2024_v56  ;;  %v5417_v47 = vcombine.low %v2006_v21, %v2020_v38  ;;  %1132 = vst [vmem:[#allocation2 + $0x34] sm:$0x1] %v1131_v46  ;;  %v7140_v27 = vmax.f32 %v588_v39, 0.0  ;;  %v7142_v5 = vmax.f32 %v589_v33, 0.0  ;;  %v1133_v22 = vld [vmem:[#allocation2 + $0x38] sm:$0xf] }
  0x9b   : > { %v2042_v48 = vor.u32 %v2041_v32, %v2038_v30  ;;  %v1985_v54 = vld [vmem:[#allocation2 + $0x28] sm:$0xf]  ;;  %v845_v34 = vrot.slane %v6954_v1, 4  ;;  %v853_v8 = vrot.slane %v6965_v31, 4  ;;  %v2207_v1 = vld [vmem:[#allocation2 + $0x50] sm:$0xf] }
  0x9c   : > { %v2029_v50 = vrot.slane %v2028_v23, 4  ;;  %v1986_v24 = vld [vmem:[#allocation2 + $0x2c] sm:$0x1]  ;;  %5987 = vmatprep.mubr.msk.bf16.mxu0 %vm1446_vm10, %v5417_v47  ;;  %v2050_v55 = vshrl.u32 %v1985_v54, 16  ;;  %v2053_v62 = vshll.u32 %v1985_v54, 16  ;;  %v5749_v39 = vpack.c.bf16 %v7140_v27, %v7140_v27 }
  0x9d   : > { %v2043_v40 = vrot.slane %v2042_v48, 4  ;;  %v2059_v25 = vshll.u32 %v1986_v24, 16  ;;  %v5750_v33 = vpack.c.bf16 %v7142_v5, %v7142_v5  ;;  %v1136_v26 = vld [vmem:[#allocation2 + $0x3c] sm:$0x1]  ;;  %v1149_v63 = vsel %vm6613_vm4, %v845_v34, %v1148_v57  ;;  %v1142_v32 = vld [vmem:[#allocation2 + $0x44] sm:$0x1] }
  0x9e   : > { %v2034_v2 = vsel %vm6706_vm9, %v2029_v50, %v2033_v28  ;;  %v2052_v10 = vrot.slane %v2050_v55, 4  ;;  %v2055_v59 = vrot.slane %v2053_v62, 5  ;;  %v823_v17 = vshrl.u32 %v5749_v39, 16  ;;  %1150 = vst [vmem:[#allocation2 + $0x54] sm:$0x1] %v1149_v63 }
  0x9f   : > { %v2048_v9 = vsel %vm6706_vm9, %v2043_v40, %v2047_v43  ;;  %v7160_v15 = vrot.slane %v2059_v25, 5  ;;  %v826_v45 = vshll.u32 %v5749_v39, 16  ;;  %v831_v18 = vshrl.u32 %v5750_v33, 16  ;;  %v2209_v37 = vld [vmem:[#allocation2 + $0x58] sm:$0xf] }
  0xa0   : > { %v5418_v31 = vcombine.low %v2034_v2, %v2048_v9  ;;  %v1987_v19 = vld [vmem:[#allocation2 + $0x30] sm:$0xf]  ;;  %v2056_v21 = vor.u32 %v2055_v59, %v2052_v10  ;;  %v834_v13 = vshll.u32 %v5750_v33, 16  ;;  %v1155_v36 = vsel %vm6613_vm4, %v853_v8, %v1154_v0  ;;  %v1139_v24 = vld [vmem:[#allocation2 + $0x40] sm:$0xf] }
  0xa1   : > { %v1988_v56 = vld [vmem:[#allocation2 + $0x34] sm:$0x1]  ;;  %v2064_v53 = vshrl.u32 %v1987_v19, 16  ;;  %v2067_v44 = vshll.u32 %v1987_v19, 16  ;;  %v825_v28 = vrot.slane %v823_v17, 7  ;;  %v833_v30 = vrot.slane %v831_v18, 7 }
  0xa2   : > { %5988 = vmatmul.mubr.msk.bf16.vlgmr.msra.gmra.mrb[0].mxu0 %vm1446_vm10, %v5418_v31  ;;  %1156 = vst [vmem:[#allocation2 + $0x5c] sm:$0x1] %v1155_v36  ;;  %v2057_v38 = vrot.slane %v2056_v21, 4  ;;  %v2073_v23 = vshll.u32 %v1988_v56, 16  ;;  %v2224_v43 = vshrl.u32 %v2207_v1, 16  ;;  %v2227_v46 = vshll.u32 %v2207_v1, 16 }
  0xa3   : > { %5996 = vmatpush3.bf16.msra.mxu0 %v7113_v7  ;;  %v2066_v47 = vrot.slane %v2064_v53, 4  ;;  %v2069_v48 = vrot.slane %v2067_v44, 5  ;;  %v828_v50 = vor.u32 %v826_v45, %v825_v28  ;;  %v829_v54 = vrot.slane %v825_v28, 4  ;;  %v7180_v7 = vld [vmem:[#allocation2 + $0x60] sm:$0xf] }
  0xa4   : > { %6419 = vmatprep.subr.msk.bf16.mxu0 %vm1459_vm0, %v7165_v16  ;;  %v2062_v34 = vsel %vm6706_vm9, %v2057_v38, %v7160_v15  ;;  %v2075_v57 = vrot.slane %v2073_v23, 5  ;;  %v836_v40 = vor.u32 %v834_v13, %v833_v30  ;;  %v837_v55 = vrot.slane %v833_v30, 4  ;;  %v1160_v39 = vld [vmem:[#allocation2 + $0x64] sm:$0x1]  ;;  %v1166_v33 = vld [vmem:[#allocation2 + $0x6c] sm:$0x1] }
  0xa5   : > { %v2070_v62 = vor.u32 %v2069_v48, %v2066_v47  ;;  %v1134_v25 = vsel %vm6691_vm8, %v828_v50, %v1133_v22  ;;  %v1137_v0 = vsel %vm6613_vm4, %v829_v54, %v1136_v26  ;;  %v2226_v2 = vrot.slane %v2224_v43, 4  ;;  %v2213_v45 = vld [vmem:[#allocation2 + $0x68] sm:$0xf]  ;;  %v2208_v18 = vld [vmem:[#allocation2 + $0x54] sm:$0x1] }
  0xa6   : > { %1135 = vst [vmem:[#allocation2 + $0x38] sm:$0xf] %v1134_v25  ;;  %1138 = vst [vmem:[#allocation2 + $0x3c] sm:$0x1] %v1137_v0  ;;  %v1140_v8 = vsel %vm6691_vm8, %v836_v40, %v1139_v24  ;;  %v1143_v1 = vsel %vm6613_vm4, %v837_v55, %v1142_v32  ;;  %v2229_v9 = vrot.slane %v2227_v46, 5  ;;  %v2238_v10 = vshrl.u32 %v2209_v37, 16 }
  0xa7   : > { %v2071_v59 = vrot.slane %v2070_v62, 4  ;;  %1141 = vst [vmem:[#allocation2 + $0x40] sm:$0xf] %v1140_v8  ;;  %1144 = vst [vmem:[#allocation2 + $0x44] sm:$0x1] %v1143_v1  ;;  %v2241_v15 = vshll.u32 %v2209_v37, 16 }
  0xa8   : > { %v861_v31 = vrot.slane %v6988_v41, 4  ;;  %v869_v17 = vrot.slane %v6998_v51, 4  ;;  %v2230_v21 = vor.u32 %v2229_v9, %v2226_v2  ;;  %v2240_v13 = vrot.slane %v2238_v10, 4  ;;  %v535_v37 = vld [vmem:[%s6634_s15 + $0xf8] sm:$0xff] }
  0xa9   : > { %v2210_v19 = vld [vmem:[#allocation2 + $0x5c] sm:$0x1]  ;;  %v2252_v22 = vshrl.u32 %v7180_v7, 16  ;;  %v2076_v26 = vsel %vm6706_vm9, %v2071_v59, %v2075_v57  ;;  %v2233_v63 = vshll.u32 %v2208_v18, 16  ;;  %v2243_v36 = vrot.slane %v2241_v15, 5 }
  0xaa   : > { %v2247_v56 = vshll.u32 %v2210_v19, 16  ;;  %v5419_v53 = vcombine.low %v2062_v34, %v2076_v26  ;;  %v2231_v44 = vrot.slane %v2230_v21, 4  ;;  %v1161_v41 = vsel %vm6613_vm4, %v861_v31, %v1160_v39  ;;  %v1172_v39 = vld [vmem:[#allocation2 + $0x74] sm:$0x1]  ;;  %v1178_v31 = vld [vmem:[#allocation2 + $0x7c] sm:$0x1] }
  0xab   : > { %v1167_v51 = vsel %vm6613_vm4, %v869_v17, %v1166_v33  ;;  %v2235_v28 = vrot.slane %v2233_v63, 5  ;;  %v2244_v30 = vor.u32 %v2243_v36, %v2240_v13  ;;  %1162 = vst [vmem:[#allocation2 + $0x64] sm:$0x1] %v1161_v41  ;;  %v2254_v38 = vrot.slane %v2252_v22, 4  ;;  %v2215_v17 = vld [vmem:[#allocation2 + $0x70] sm:$0xf] }
  0xac   : > { %v2249_v32 = vrot.slane %v2247_v56, 5  ;;  %1168 = vst [vmem:[#allocation2 + $0x6c] sm:$0x1] %v1167_v51  ;;  %5991 = vmatprep.mubr.msk.bf16.mxu0 %vm1446_vm10, %v5419_v53  ;;  %v2255_v23 = vshll.u32 %v7180_v7, 16  ;;  %v2266_v43 = vshrl.u32 %v2213_v45, 16  ;;  %v2269_v46 = vshll.u32 %v2213_v45, 16 }
  0xad   : > { %v1989_v47 = vld [vmem:[#allocation2 + $0x38] sm:$0xf]  ;;  %v1990_v48 = vld [vmem:[#allocation2 + $0x3c] sm:$0x1]  ;;  %v2245_v50 = vrot.slane %v2244_v30, 4  ;;  %v877_v54 = vrot.slane %v7022_v35, 4  ;;  %v2236_v55 = vsel %vm6706_vm9, %v2231_v44, %v2235_v28  ;;  %v574_v62 = vmul.f32 %v6944_v60, %v535_v37 }
  0xae   : > { %v1991_v24 = vld [vmem:[#allocation2 + $0x40] sm:$0xf]  ;;  %v1992_v34 = vld [vmem:[#allocation2 + $0x44] sm:$0x1]  ;;  %v2078_v57 = vshrl.u32 %v1989_v47, 16  ;;  %v2081_v40 = vshll.u32 %v1989_v47, 16 }
  0xaf   : > { %v2087_v25 = vshll.u32 %v1990_v48, 16  ;;  %v2092_v0 = vshrl.u32 %v1991_v24, 16  ;;  %v2095_v2 = vshll.u32 %v1991_v24, 16  ;;  %v2101_v7 = vshll.u32 %v1992_v34, 16  ;;  %v2217_v22 = vld [vmem:[#allocation2 + $0x78] sm:$0xf] }
  0xb0   : > { %v2080_v33 = vrot.slane %v2078_v57, 4  ;;  %v2083_v8 = vrot.slane %v2081_v40, 5  ;;  %v2250_v1 = vsel %vm6706_vm9, %v2245_v50, %v2249_v32  ;;  %v2257_v35 = vrot.slane %v2255_v23, 5  ;;  %v2219_v23 = vld [vmem:[#allocation2 + $0x80] sm:$0xf] }
  0xb1   : > { %v2089_v9 = vrot.slane %v2087_v25, 5  ;;  %v2094_v10 = vrot.slane %v2092_v0, 4  ;;  %v2097_v59 = vrot.slane %v2095_v2, 5  ;;  %v2103_v15 = vrot.slane %v2101_v7, 5  ;;  %v1184_v48 = vld [vmem:[#allocation2 + $0x84] sm:$0x1] }
  0xb2   : > { %v2084_v45 = vor.u32 %v2083_v8, %v2080_v33  ;;  %v5426_v18 = vcombine.low %v2236_v55, %v2250_v1  ;;  %v2212_v60 = vld [vmem:[#allocation2 + $0x64] sm:$0x1]  ;;  %v2258_v21 = vor.u32 %v2257_v35, %v2254_v38  ;;  %v2268_v13 = vrot.slane %v2266_v43, 4  ;;  %v1190_v50 = vld [vmem:[#allocation2 + $0x8c] sm:$0x1] }
  0xb3   : > { %v2214_v19 = vld [vmem:[#allocation2 + $0x6c] sm:$0x1]  ;;  %v2098_v26 = vor.u32 %v2097_v59, %v2094_v10  ;;  %v2261_v63 = vshll.u32 %v2212_v60, 16  ;;  %v2271_v36 = vrot.slane %v2269_v46, 5  ;;  %v885_v41 = vrot.slane %v7024_v49, 4 }
  0xb4   : > { %v2275_v56 = vshll.u32 %v2214_v19, 16  ;;  %v2085_v53 = vrot.slane %v2084_v45, 4  ;;  %v2259_v44 = vrot.slane %v2258_v21, 4  ;;  %v1173_v51 = vsel %vm6613_vm4, %v877_v54, %v1172_v39  ;;  %v2221_v49 = vld [vmem:[#allocation2 + $0x88] sm:$0xf] }
  0xb5   : > { %v2099_v28 = vrot.slane %v2098_v26, 4  ;;  %v2263_v30 = vrot.slane %v2261_v63, 5  ;;  %v2272_v32 = vor.u32 %v2271_v36, %v2268_v13  ;;  %1174 = vst [vmem:[#allocation2 + $0x74] sm:$0x1] %v1173_v51  ;;  %v1179_v43 = vsel %vm6613_vm4, %v885_v41, %v1178_v31  ;;  %v432_v8 = vld [vmem:[#allocation2 + $0x118] sm:$0x1] }
  0xb6   : > { %v2277_v37 = vrot.slane %v2275_v56, 5  ;;  %v2090_v38 = vsel %vm6706_vm9, %v2085_v53, %v2089_v9  ;;  %v2280_v46 = vshrl.u32 %v2215_v17, 16  ;;  %v2283_v47 = vshll.u32 %v2215_v17, 16  ;;  %1180 = vst [vmem:[#allocation2 + $0x7c] sm:$0x1] %v1179_v43 }
  0xb7   : > { %v2104_v54 = vsel %vm6706_vm9, %v2099_v28, %v2103_v15  ;;  %v2264_v24 = vsel %vm6706_vm9, %v2259_v44, %v2263_v30  ;;  %v2273_v34 = vrot.slane %v2272_v32, 4  ;;  %v2294_v57 = vshrl.u32 %v2217_v22, 16  ;;  %v2557_v21 = vld [vmem:[#allocation2 + $0x98] sm:$0xf]  ;;  %v2559_v53 = vld [vmem:[#allocation2 + $0xa0] sm:$0xf] }
  0xb8   : > { %v5420_v40 = vcombine.low %v2090_v38, %v2104_v54  ;;  %v2282_v55 = vrot.slane %v2280_v46, 4  ;;  %v2285_v25 = vrot.slane %v2283_v47, 5  ;;  %v2297_v0 = vshll.u32 %v2217_v22, 16  ;;  %v7235_v28 = vld [vmem:[%s8034_s1 + $0xe] sm:$0x3] }
  0xb9   : > { %v2278_v2 = vsel %vm6706_vm9, %v2273_v34, %v2277_v37  ;;  %v2296_v7 = vrot.slane %v2294_v57, 4  ;;  %v893_v39 = vrot.slane %v7037_v29, 4  ;;  %v901_v33 = vrot.slane %v7039_v58, 4 }
  0xba   : > { %5992 = vmatmul.mubr.msk.bf16.gmra.mrb[4].mxu0 %vm1446_vm10, %v5420_v40  ;;  %v2286_v1 = vor.u32 %v2285_v25, %v2282_v55  ;;  %v2299_v35 = vrot.slane %v2297_v0, 5  ;;  %v2308_v9 = vshrl.u32 %v2219_v23, 16  ;;  %v613_v10 = vadd.f32 %v6950_v61, %v574_v62 }
  0xbb   : > { %5997 = vmatprep.mubr.msk.bf16.mxu0 %vm1446_vm10, %v5426_v18  ;;  %v1185_v59 = vsel %vm6613_vm4, %v893_v39, %v1184_v48  ;;  %v1191_v15 = vsel %vm6613_vm4, %v901_v33, %v1190_v50  ;;  %v2311_v31 = vshll.u32 %v2219_v23, 16  ;;  %v2322_v29 = vshrl.u32 %v2221_v49, 16  ;;  %v2561_v48 = vld [vmem:[#allocation2 + $0xa8] sm:$0xf]  ;;  %v2560_v33 = vld [vmem:[#allocation2 + $0xa4] sm:$0x1] }
  0xbc   : > { %v5427_v17 = vcombine.low %v2264_v24, %v2278_v2  ;;  %v2216_v58 = vld [vmem:[#allocation2 + $0x74] sm:$0x1]  ;;  %v2300_v45 = vor.u32 %v2299_v35, %v2296_v7  ;;  %1186 = vst [vmem:[#allocation2 + $0x84] sm:$0x1] %v1185_v59  ;;  %1192 = vst [vmem:[#allocation2 + $0x8c] sm:$0x1] %v1191_v15 }
  0xbd   : > { %v2310_v60 = vrot.slane %v2308_v9, 4  ;;  %v2325_v19 = vshll.u32 %v2221_v49, 16  ;;  %v2287_v13 = vrot.slane %v2286_v1, 4  ;;  %v2289_v61 = vshll.u32 %v2216_v58, 16  ;;  %v2218_v22 = vld [vmem:[#allocation2 + $0x7c] sm:$0x1] }
  0xbe   : > { %v2313_v62 = vrot.slane %v2311_v31, 5  ;;  %v2324_v18 = vrot.slane %v2322_v29, 4  ;;  %v2301_v26 = vrot.slane %v2300_v45, 4  ;;  %v433_v36 = vsel %vm6613_vm4, 0, %v432_v8  ;;  %v2558_v24 = vld [vmem:[#allocation2 + $0x9c] sm:$0x1] }
  0xbf   : > { %v2327_v63 = vrot.slane %v2325_v19, 5  ;;  %v645_v56 = vmax.f32 %v613_v10, 0.0  ;;  %v2291_v44 = vrot.slane %v2289_v61, 5  ;;  %v2303_v41 = vshll.u32 %v2218_v22, 16  ;;  %434 = vst [vmem:[#allocation2 + $0x118] sm:$0x1] %v433_v36 }
  0xc0   : > { %v2314_v51 = vor.u32 %v2313_v62, %v2310_v60  ;;  %v2574_v30 = vshrl.u32 %v2557_v21, 16  ;;  %v2481_v32 = vsel %vm1459_vm0, %v7165_v16, 0  ;;  %v2577_v38 = vshll.u32 %v2557_v21, 16  ;;  %v2563_v35 = vld [vmem:[#allocation2 + $0xb0] sm:$0xf] }
  0xc1   : > { %v2328_v37 = vor.u32 %v2327_v63, %v2324_v18  ;;  %v5774_v23 = vpack.c.bf16 %v645_v56, %v645_v56  ;;  %v2292_v43 = vsel %vm6706_vm9, %v2287_v13, %v2291_v44  ;;  %v2305_v46 = vrot.slane %v2303_v41, 5  ;;  %v6440_v59 = vld [vmem:[#allocation2 + $0xe0] ss:$8 sps:$4 sm:$0xff]   ;;  %v2562_v29 = vld [vmem:[#allocation2 + $0xac] sm:$0x1]  ;;  %v527_v13 = vld [vmem:[%s6634_s15 + $0xb8] sm:$0xff] }
  0xc2   : > { %v2315_v47 = vrot.slane %v2314_v51, 4  ;;  %5998 = vmatmul.mubr.msk.bf16.vlgmr.msra.gmra.mrb[0].mxu0 %vm1446_vm10, %v5427_v17  ;;  %v2576_v34 = vrot.slane %v2574_v30, 4  ;;  %v2579_v55 = vrot.slane %v2577_v38, 5  ;;  %v2588_v25 = vshrl.u32 %v2559_v53, 16  ;;  %v2565_v58 = vld [vmem:[#allocation2 + $0xb8] sm:$0xf] }
  0xc3   : > { %v2329_v50 = vrot.slane %v2328_v37, 4  ;;  %v1023_v49 = vshrl.u32 %v5774_v23, 16  ;;  %v1026_v54 = vshll.u32 %v5774_v23, 16  ;;  %6006 = vmatpush3.bf16.msra.mxu0 %v2481_v32  ;;  %v2306_v16 = vsel %vm6706_vm9, %v2301_v26, %v2305_v46  ;;  %v2220_v57 = vld [vmem:[#allocation2 + $0x84] sm:$0x1] }
  0xc4   : > { %v2222_v40 = vld [vmem:[#allocation2 + $0x8c] sm:$0x1]  ;;  %v5428_v0 = vcombine.low %v2292_v43, %v2306_v16  ;;  %v2317_v2 = vshll.u32 %v2220_v57, 16  ;;  %6420 = vmatprep.subr.msk.bf16.mxu0 %vm1459_vm0, %v7235_v28  ;;  %v2590_v8 = vrot.slane %v2588_v25, 4  ;;  %v2591_v1 = vshll.u32 %v2559_v53, 16 }
  0xc5   : > { %v2331_v7 = vshll.u32 %v2222_v40, 16  ;;  %v7246_v39 = vrot.slane %v1023_v49, 7  ;;  %v2602_v17 = vshrl.u32 %v2561_v48, 16  ;;  %v2580_v45 = vor.u32 %v2579_v55, %v2576_v34  ;;  %v2564_v53 = vld [vmem:[#allocation2 + $0xb4] sm:$0x1] }
  0xc6   : > { %6001 = vmatprep.mubr.msk.bf16.mxu0 %vm1446_vm10, %v5428_v0  ;;  %v2319_v9 = vrot.slane %v2317_v2, 5  ;;  %v1283_v31 = vld [vmem:[#allocation2 + $0x118] sm:$0xf]  ;;  %v2583_v60 = vshll.u32 %v2558_v24, 16  ;;  %v2593_v19 = vrot.slane %v2591_v1, 5  ;;  %v2605_v21 = vshll.u32 %v2561_v48, 16 }
  0xc7   : > { %v2333_v10 = vrot.slane %v2331_v7, 5  ;;  %v1028_v15 = vor.u32 %v1026_v54, %v7246_v39  ;;  %v2604_v22 = vrot.slane %v2602_v17, 4  ;;  %v2597_v36 = vshll.u32 %v2560_v33, 16  ;;  %v6530_v51 = vld [vmem:[%s8037_s4] ss:$0 sm:$0xff] }
  0xc8   : > { %v2320_v61 = vsel %vm6706_vm9, %v2315_v47, %v2319_v9  ;;  %v2594_v63 = vor.u32 %v2593_v19, %v2590_v8  ;;  %v2607_v56 = vrot.slane %v2605_v21, 5  ;;  %v2616_v44 = vshrl.u32 %v2563_v35, 16  ;;  %v2566_v23 = vld [vmem:[#allocation2 + $0xbc] sm:$0x1]  ;;  %v2567_v38 = vld [vmem:[#allocation2 + $0xc0] sm:$0xf] }
  0xc9   : > { %v2334_v62 = vsel %vm6706_vm9, %v2329_v50, %v2333_v10  ;;  %v1284_v18 = vsel %vm6691_vm8, %v1028_v15, %v1283_v31  ;;  %v2619_v41 = vshll.u32 %v2563_v35, 16  ;;  %v566_v30 = vmul.f32 %v6530_v51, %v527_v13  ;;  %v6441_v49 = vld [vmem:[#allocation2 + $0xf0] ss:$8 sps:$4 sm:$0xff]   ;;  %v2569_v40 = vld [vmem:[#allocation2 + $0xc8] sm:$0xf] }
  0xca   : > { %v5429_v26 = vcombine.low %v2320_v61, %v2334_v62  ;;  %1285 = vst [vmem:[#allocation2 + $0x118] sm:$0xf] %v1284_v18  ;;  %v2608_v32 = vor.u32 %v2607_v56, %v2604_v22  ;;  %v2611_v37 = vshll.u32 %v2562_v29, 16  ;;  %v2630_v43 = vshrl.u32 %v2565_v58, 16  ;;  %v405_v57 = vld [vmem:[#allocation2 + $0xd0] sm:$0x1] }
  0xcb   : > { %v2581_v46 = vrot.slane %v2580_v45, 4  ;;  %v2585_v47 = vrot.slane %v2583_v60, 5  ;;  %v2618_v48 = vrot.slane %v2616_v44, 4  ;;  %v2621_v50 = vrot.slane %v2619_v41, 5  ;;  %v6442_v55 = vld [vmem:[#allocation2 + $0x100] ss:$8 sps:$4 sm:$0xff]  }
  0xcc   : > { %6002 = vmatmul.mubr.msk.bf16.gmra.mrb[4].mxu0 %vm1446_vm10, %v5429_v26  ;;  %v2595_v54 = vrot.slane %v2594_v63, 4  ;;  %v2599_v24 = vrot.slane %v2597_v36, 5  ;;  %v2625_v34 = vshll.u32 %v2564_v53, 16  ;;  %v2633_v16 = vshll.u32 %v2565_v58, 16  ;;  %v6531_v7 = vld [vmem:[%s8038_s5] ss:$0 sm:$0xff] }
  0xcd   : > { %6007 = vmatprep.mubr.msk.bf16.mxu0 %vm1446_vm10, %v6440_v59  ;;  %v2622_v25 = vor.u32 %v2621_v50, %v2618_v48  ;;  %v2632_v0 = vrot.slane %v2630_v43, 4  ;;  %v2644_v2 = vshrl.u32 %v2567_v38, 16  ;;  %v605_v33 = vadd.f32 %v6531_v7, %v566_v30  ;;  %v7270_v59 = vld [vmem:[%s8034_s1 + $0x10] sm:$0x3]  ;;  %v2568_v15 = vld [vmem:[#allocation2 + $0xc4] sm:$0x1] }
  0xce   : > { %v2609_v8 = vrot.slane %v2608_v32, 4  ;;  %v2613_v1 = vrot.slane %v2611_v37, 5  ;;  %v2635_v35 = vrot.slane %v2633_v16, 5  ;;  %v2647_v9 = vshll.u32 %v2567_v38, 16  ;;  %v2787_v60 = vld [vmem:[#allocation2 + $0xe0] sm:$0xf] }
  0xcf   : > { %v2712_v10 = vsel %vm1459_vm0, %v7235_v28, 0  ;;  %v2639_v31 = vshll.u32 %v2566_v23, 16  ;;  %v2623_v29 = vrot.slane %v2622_v25, 4  ;;  %v2627_v17 = vrot.slane %v2625_v34, 5  ;;  %v2570_v22 = vld [vmem:[#allocation2 + $0xcc] sm:$0x1] }
  0xd0   : > { %v2646_v58 = vrot.slane %v2644_v2, 4  ;;  %v2649_v45 = vrot.slane %v2647_v9, 5  ;;  %v2636_v19 = vor.u32 %v2635_v35, %v2632_v0  ;;  %v406_v21 = vsel %vm6613_vm4, 0, %v405_v57  ;;  %v2789_v63 = vld [vmem:[#allocation2 + $0xe8] sm:$0xf] }
  0xd1   : > { %v637_v13 = vmax.f32 %v605_v33, 0.0  ;;  %v2658_v61 = vshrl.u32 %v2569_v40, 16  ;;  %v2586_v28 = vsel %vm6706_vm9, %v2581_v46, %v2585_v47  ;;  %v2600_v62 = vsel %vm6706_vm9, %v2595_v54, %v2599_v24  ;;  %407 = vst [vmem:[#allocation2 + $0xd0] sm:$0x1] %v406_v21  ;;  %v6443_v41 = vld [vmem:[#allocation2 + $0x110] ss:$8 sps:$4 sm:$0xff]  }
  0xd2   : > { %v2614_v18 = vsel %vm6706_vm9, %v2609_v8, %v2613_v1  ;;  %v2661_v26 = vshll.u32 %v2569_v40, 16  ;;  %v7282_v36 = vrot.slane %v2639_v31, 5  ;;  %v2653_v56 = vshll.u32 %v2568_v15, 16  ;;  %v2788_v47 = vld [vmem:[#allocation2 + $0xe4] sm:$0x1] }
  0xd3   : > { %v5766_v53 = vpack.c.bf16 %v637_v13, %v637_v13  ;;  %v2804_v44 = vshrl.u32 %v2787_v60, 16  ;;  %v2650_v51 = vor.u32 %v2649_v45, %v2646_v58  ;;  %v2660_v30 = vrot.slane %v2658_v61, 4  ;;  %v2791_v48 = vld [vmem:[#allocation2 + $0xf0] sm:$0xf]  ;;  %v2790_v57 = vld [vmem:[#allocation2 + $0xec] sm:$0x1] }
  0xd4   : > { %6008 = vmatmul.mubr.msk.bf16.vlgmr.msra.gmra.mrb[0].mxu0 %vm1446_vm10, %v6441_v49  ;;  %v2663_v32 = vrot.slane %v2661_v26, 5  ;;  %v2807_v37 = vshll.u32 %v2787_v60, 16  ;;  %v2628_v23 = vsel %vm6706_vm9, %v2623_v29, %v2627_v17  ;;  %v2637_v38 = vrot.slane %v2636_v19, 4  ;;  %v1238_v49 = vld [vmem:[#allocation2 + $0xd4] sm:$0x1] }
  0xd5   : > { %6016 = vmatpush3.bf16.msra.mxu0 %v2712_v10  ;;  %6011 = vmatprep.mubr.msk.bf16.mxu0 %vm1446_vm10, %v6442_v55  ;;  %v959_v43 = vshrl.u32 %v5766_v53, 16  ;;  %v962_v46 = vshll.u32 %v5766_v53, 16  ;;  %v5444_v50 = vcombine.low %v2586_v28, %v2600_v62  ;;  %v2806_v54 = vrot.slane %v2804_v44, 4  ;;  %v2792_v33 = vld [vmem:[#allocation2 + $0xf4] sm:$0x1] }
  0xd6   : > { %6421 = vmatprep.subr.msk.bf16.mxu0 %vm1459_vm0, %v7270_v59  ;;  %v2809_v24 = vrot.slane %v2807_v37, 5  ;;  %v2667_v16 = vshll.u32 %v2570_v22, 16  ;;  %v2818_v40 = vshrl.u32 %v2789_v63, 16  ;;  %v2821_v55 = vshll.u32 %v2789_v63, 16  ;;  %v2793_v8 = vld [vmem:[#allocation2 + $0xf8] sm:$0xf] }
  0xd7   : > { %v961_v34 = vrot.slane %v959_v43, 7  ;;  %v5445_v25 = vcombine.low %v2614_v18, %v2628_v23  ;;  %v2651_v0 = vrot.slane %v2650_v51, 4  ;;  %v2655_v2 = vrot.slane %v2653_v56, 5  ;;  %v2794_v31 = vld [vmem:[#allocation2 + $0xfc] sm:$0x1] }
  0xd8   : > { %v2664_v7 = vor.u32 %v2663_v32, %v2660_v30  ;;  %v1235_v9 = vld [vmem:[#allocation2 + $0xd0] sm:$0xf]  ;;  %v2820_v10 = vrot.slane %v2818_v40, 4  ;;  %v2823_v15 = vrot.slane %v2821_v55, 5  ;;  %v2642_v29 = vsel %vm6706_vm9, %v2637_v38, %v7282_v36  ;;  %v2795_v60 = vld [vmem:[#allocation2 + $0x100] sm:$0xf] }
  0xd9   : > { %v964_v1 = vor.u32 %v962_v46, %v961_v34  ;;  %v965_v35 = vrot.slane %v961_v34, 4  ;;  %v2810_v17 = vor.u32 %v2809_v24, %v2806_v54  ;;  %v2813_v58 = vshll.u32 %v2788_v47, 16  ;;  %v2797_v26 = vld [vmem:[#allocation2 + $0x108] sm:$0xf]  ;;  %v2796_v53 = vld [vmem:[#allocation2 + $0x104] sm:$0x1] }
  0xda   : > { %v2832_v45 = vshrl.u32 %v2791_v48, 16  ;;  %v7297_v13 = vrot.slane %v2667_v16, 5  ;;  %v2835_v61 = vshll.u32 %v2791_v48, 16  ;;  %v2656_v28 = vsel %vm6706_vm9, %v2651_v0, %v2655_v2  ;;  %v1286_v48 = vld [vmem:[#allocation2 + $0x11c] sm:$0x1] }
  0xdb   : > { %v1236_v19 = vsel %vm6691_vm8, %v964_v1, %v1235_v9  ;;  %v1239_v21 = vsel %vm6613_vm4, %v965_v35, %v1238_v49  ;;  %v2824_v62 = vor.u32 %v2823_v15, %v2820_v10  ;;  %v2827_v18 = vshll.u32 %v2790_v57, 16  ;;  %v2798_v24 = vld [vmem:[#allocation2 + $0x10c] sm:$0x1]  ;;  %v2799_v0 = vld [vmem:[#allocation2 + $0x110] sm:$0xf] }
  0xdc   : > { %6012 = vmatmul.mubr.msk.bf16.gmra.mrb[4].mxu0 %vm1446_vm10, %v6443_v41  ;;  %1237 = vst [vmem:[#allocation2 + $0xd0] sm:$0xf] %v1236_v19  ;;  %1240 = vst [vmem:[#allocation2 + $0xd4] sm:$0x1] %v1239_v21  ;;  %v2834_v22 = vrot.slane %v2832_v45, 4  ;;  %v7301_v63 = vrot.slane %v2664_v7, 4  ;;  %v5446_v32 = vcombine.low %v2642_v29, %v2656_v28 }
  0xdd   : > { %6017 = vmatprep.mubr.msk.bf16.mxu0 %vm1446_vm10, %v5444_v50  ;;  %v2837_v36 = vrot.slane %v2835_v61, 5  ;;  %v2841_v11 = vshll.u32 %v2792_v33, 16  ;;  %v2846_v56 = vshrl.u32 %v2793_v8, 16  ;;  %v7303_v44 = vrot.slane %v2810_v17, 4  ;;  %v7312_v50 = vld [vmem:[%s8035_s2] sm:$0xff]  }
  0xde   : > { %v7305_v41 = vrot.slane %v2813_v58, 5  ;;  %v2849_v51 = vshll.u32 %v2793_v8, 16  ;;  %v2855_v30 = vshll.u32 %v2794_v31, 16  ;;  %v2860_v37 = vshrl.u32 %v2795_v60, 16  ;;  %v2801_v35 = vld [vmem:[#allocation2 + $0x118] sm:$0xf] }
  0xdf   : > { %v2863_v23 = vshll.u32 %v2795_v60, 16  ;;  %v2942_v38 = vsel %vm1459_vm0, %v7270_v59, 0  ;;  %v2825_v43 = vrot.slane %v2824_v62, 4  ;;  %v2829_v46 = vrot.slane %v2827_v18, 5  ;;  %v2800_v45 = vld [vmem:[#allocation2 + $0x114] sm:$0x1] }
  0xe0   : > { %v2838_v47 = vor.u32 %v2837_v36, %v2834_v22  ;;  %v7314_v49 = vrot.slane %v2841_v11, 5  ;;  %v2848_v54 = vrot.slane %v2846_v56, 4  ;;  %v2874_v34 = vshrl.u32 %v2797_v26, 16  ;;  %v6445_v60 = vld [vmem:[%s8035_s2 + $0x80] sm:$0xff]  }
  0xe1   : > { %v2877_v16 = vshll.u32 %v2797_v26, 16  ;;  %v2851_v57 = vrot.slane %v2849_v51, 5  ;;  %v7317_v40 = vrot.slane %v2855_v30, 5  ;;  %v2869_v59 = vshll.u32 %v2796_v53, 16  ;;  %v483_v51 = vld [vmem:[#allocation3 + $0x1c] sm:$0x1] }
  0xe2   : > { %v1029_v55 = vrot.slane %v7246_v39, 4  ;;  %v2670_v33 = vsel %vm6706_vm9, %v7301_v63, %v7297_v13  ;;  %v2862_v8 = vrot.slane %v2860_v37, 4  ;;  %v2865_v1 = vrot.slane %v2863_v23, 5 }
  0xe3   : > { %v2571_v2 = vld [vmem:[#allocation2 + $0xd0] sm:$0xf]  ;;  %v2572_v7 = vld [vmem:[#allocation2 + $0xd4] sm:$0x1]  ;;  %v7329_v15 = vrot.slane %v2838_v47, 4  ;;  %v2830_v31 = vsel %vm6706_vm9, %v2825_v43, %v2829_v46  ;;  %v2876_v29 = vrot.slane %v2874_v34, 4  ;;  %v2852_v28 = vor.u32 %v2851_v57, %v2848_v54 }
  0xe4   : > { %6018 = vmatmul.mubr.msk.bf16.vlgmr.msra.gmra.mrb[0].mxu0 %vm1446_vm10, %v5445_v25  ;;  %v2816_v25 = vsel %vm6706_vm9, %v7303_v44, %v7305_v41  ;;  %v2672_v39 = vshrl.u32 %v2571_v2, 16  ;;  %v2675_v9 = vshll.u32 %v2571_v2, 16  ;;  %v2681_v10 = vshll.u32 %v2572_v7, 16 }
  0xe5   : > { %6026 = vmatpush3.bf16.msra.mxu0 %v2942_v38  ;;  %6021 = vmatprep.mubr.msk.bf16.mxu0 %vm1446_vm10, %v5446_v32  ;;  %v2879_v17 = vrot.slane %v2877_v16, 5  ;;  %v1287_v58 = vsel %vm6613_vm4, %v1029_v55, %v1286_v48  ;;  %v2871_v13 = vrot.slane %v2869_v59, 5  ;;  %v2883_v61 = vshll.u32 %v2798_v24, 16 }
  0xe6   : > { %6035 = vmatprep.subr.bf16.mxu0 %v7312_v50  ;;  %v2674_v19 = vrot.slane %v2672_v39, 4  ;;  %v2677_v21 = vrot.slane %v2675_v9, 5  ;;  %1288 = vst [vmem:[#allocation2 + $0x11c] sm:$0x1] %v1287_v58  ;;  %v2866_v62 = vor.u32 %v2865_v1, %v2862_v8  ;;  %v2888_v18 = vshrl.u32 %v2799_v0, 16 }
  0xe7   : > { %v2891_v22 = vshll.u32 %v2799_v0, 16  ;;  %v2683_v63 = vrot.slane %v2681_v10, 5  ;;  %v2902_v36 = vshrl.u32 %v2801_v35, 16  ;;  %v2905_v11 = vshll.u32 %v2801_v35, 16  ;;  %v6446_v10 = vld [vmem:[%s8035_s2 + $0x8] sm:$0xff]  }
  0xe8   : > { %v2678_v26 = vor.u32 %v2677_v21, %v2674_v19  ;;  %v2880_v56 = vor.u32 %v2879_v17, %v2876_v29  ;;  %v2890_v53 = vrot.slane %v2888_v18, 4  ;;  %v3388_v41 = vsel %vm1459_vm0, %v7156_v3, 0  ;;  %v445_v29 = vld [vmem:[#allocation3 + $0x8] sm:$0x1]  ;;  %v477_v17 = vld [vmem:[#allocation3 + $0xc] sm:$0x1] }
  0xe9   : > { %v2893_v44 = vrot.slane %v2891_v22, 5  ;;  %v2897_v32 = vshll.u32 %v2800_v45, 16  ;;  %v2904_v37 = vrot.slane %v2902_v36, 4  ;;  %v2907_v23 = vrot.slane %v2905_v11, 5  ;;  %6060 = vmatpush3.bf16.msra.mxu1 %v3388_v41  ;;  %v486_v19 = vld [vmem:[#allocation3 + $0x24] sm:$0x1] }
  0xea   : > { %v2679_v30 = vrot.slane %v2678_v26, 4  ;;  %v5453_v38 = vcombine.low %v2816_v25, %v2830_v31  ;;  %v2853_v43 = vrot.slane %v2852_v28, 4  ;;  %6093 = vmatprep.subr.bf16.mxu1 %v6445_v60  ;;  %v2867_v48 = vrot.slane %v2866_v62, 4  ;;  %v6448_v31 = vld [vmem:[%s8035_s2 + $0x10] sm:$0xff]   ;;  %v6450_v22 = vld [vmem:[%s8035_s2 + $0x18] sm:$0xff]  }
  0xeb   : > { %v2894_v46 = vor.u32 %v2893_v44, %v2890_v53  ;;  %v2885_v54 = vrot.slane %v2883_v61, 5  ;;  %v2908_v24 = vor.u32 %v2907_v23, %v2904_v37  ;;  %v2881_v16 = vrot.slane %v2880_v56, 4  ;;  %v448_v61 = vld [vmem:[#allocation3 + $0x10] sm:$0x1]  ;;  %v480_v28 = vld [vmem:[#allocation3 + $0x14] sm:$0x1] }
  0xec   : > { %v2684_v47 = vsel %vm6706_vm9, %v2679_v30, %v2683_v63  ;;  %6062 = vmatmul.mubr.msk.bf16.vlgmr.msra.gmra.mrb[0].mxu1 %vm1446_vm10, %v5784_v20  ;;  %v452_v59 = vsel %vm7344_vm12, 0, %v451_v6  ;;  %v2899_v2 = vrot.slane %v2897_v32, 5  ;;  %v2844_v4 = vsel %vm6706_vm9, %v7329_v15, %v7314_v49  ;;  %v6447_v15 = vld [vmem:[%s8035_s2 + $0x88] sm:$0xff]   ;;  %v463_v26 = vld [vmem:[#allocation3 + $0x38] sm:$0x1]  ;;  %v6452_v23 = vld [vmem:[%s8035_s2 + $0x20] sm:$0xff]  }
  0xed   : > { %v5447_v34 = vcombine.low %v2670_v33, %v2684_v47  ;;  %v2802_v57 = vld [vmem:[#allocation2 + $0x11c] sm:$0x1]  ;;  %v2895_v0 = vrot.slane %v2894_v46, 4  ;;  %453 = vst [vmem:[#allocation3 + $0x18] sm:$0x1] %v452_v59  ;;  %v484_v33 = vsel %vm7355_vm13, 0, %v483_v51  ;;  %6094 = vmatpush3.bf16.msra.mxu1 %v6445_v60  ;;  %v2858_v14 = vsel %vm6706_vm9, %v2853_v43, %v7317_v40 }
  0xee   : > { %v2911_v7 = vshll.u32 %v2802_v57, 16  ;;  %485 = vst [vmem:[#allocation3 + $0x1c] sm:$0x1] %v484_v33  ;;  %v2909_v20 = vrot.slane %v2908_v24, 4  ;;  %v2872_v8 = vsel %vm6706_vm9, %v2867_v48, %v2871_v13  ;;  %v2886_v1 = vsel %vm6706_vm9, %v2881_v16, %v2885_v54  ;;  %6095 = vmatprep.subr.bf16.mxu1 %v6447_v15  ;;  %v454_v60 = vld [vmem:[#allocation3 + $0x20] sm:$0x1] }
  0xef   : > { %6022 = vmatmul.mubr.msk.bf16.gmra.mrb[4].mxu0 %vm1446_vm10, %v5447_v34  ;;  %v5454_v35 = vcombine.low %v2844_v4, %v2858_v14  ;;  %v5455_v39 = vcombine.low %v2872_v8, %v2886_v1  ;;  %v2900_v49 = vsel %vm6706_vm9, %v2895_v0, %v2899_v2  ;;  %v446_v58 = vsel %vm7344_vm12, 0, %v445_v29  ;;  %v495_v36 = vld [vmem:[#allocation3 + $0x3c] sm:$0x1]  ;;  %v457_v6 = vld [vmem:[#allocation3 + $0x28] sm:$0x1]  ;;  %v6456_v57 = vld [vmem:[%s8035_s2 + $0x30] sm:$0xff]  }
  0xf0   : > { %6027 = vmatprep.mubr.msk.bf16.mxu0 %vm1446_vm10, %v5453_v38  ;;  %v2913_v25 = vrot.slane %v2911_v7, 5  ;;  %v478_v45 = vsel %vm7355_vm13, 0, %v477_v17  ;;  %447 = vst [vmem:[#allocation3 + $0x8] sm:$0x1] %v446_v58  ;;  %v455_v21 = vsel %vm7344_vm12, 0, %v454_v60  ;;  %v487_v13 = vsel %vm7355_vm13, 0, %v486_v19 }
  0xf1   : > { %6096 = vmatpush3.bf16.msra.mxu1 %v6447_v15  ;;  %479 = vst [vmem:[#allocation3 + $0xc] sm:$0x1] %v478_v45  ;;  %456 = vst [vmem:[#allocation3 + $0x20] sm:$0x1] %v455_v21  ;;  %v449_v62 = vsel %vm7344_vm12, 0, %v448_v61  ;;  %v481_v18 = vsel %vm7355_vm13, 0, %v480_v28  ;;  %v5785_v59 = vpack.c.bf16 %v7102_v12, %v7098_v52  ;;  %v5786_v7 = vpack.c.bf16 %v7142_v5, %v7140_v27 }
  0xf2   : > { %v2914_v40 = vsel %vm6706_vm9, %v2909_v20, %v2913_v25  ;;  %488 = vst [vmem:[#allocation3 + $0x24] sm:$0x1] %v487_v13  ;;  %450 = vst [vmem:[#allocation3 + $0x10] sm:$0x1] %v449_v62  ;;  %v464_v63 = vsel %vm7344_vm12, 0, %v463_v26  ;;  %v496_v11 = vsel %vm7355_vm13, 0, %v495_v36 }
  0xf3   : > { %v5456_v9 = vcombine.low %v2900_v49, %v2914_v40  ;;  %482 = vst [vmem:[#allocation3 + $0x14] sm:$0x1] %v481_v18  ;;  %465 = vst [vmem:[#allocation3 + $0x38] sm:$0x1] %v464_v63  ;;  %v458_v56 = vsel %vm7344_vm12, 0, %v457_v6  ;;  %v6451_v53 = vld [vmem:[%s8035_s2 + $0x98] sm:$0xff]   ;;  %6065 = vmatprep.mubr.msk.bf16.mxu1 %vm1446_vm10, %v5785_v59 }
  0xf4   : > { %497 = vst [vmem:[#allocation3 + $0x3c] sm:$0x1] %v496_v11  ;;  %459 = vst [vmem:[#allocation3 + $0x28] sm:$0x1] %v458_v56  ;;  %v489_v44 = vld [vmem:[#allocation3 + $0x2c] sm:$0x1]  ;;  %6066 = vmatmul.mubr.msk.bf16.gmra.mrb[4].mxu1 %vm1446_vm10, %v5786_v7 }
  0xf5   : > { %v466_v41 = vld [vmem:[#allocation3 + $0x40] sm:$0x1]  ;;  %v498_v51 = vld [vmem:[#allocation3 + $0x44] sm:$0x1]  ;;  %v490_v30 = vsel %vm7355_vm13, 0, %v489_v44  ;;  %v6454_v43 = vld [vmem:[%s8035_s2 + $0x28] sm:$0xff]  }
  0xf6   : > { %v467_v32 = vsel %vm7344_vm12, 0, %v466_v41  ;;  %v499_v37 = vsel %vm7355_vm13, 0, %v498_v51  ;;  %491 = vst [vmem:[#allocation3 + $0x2c] sm:$0x1] %v490_v30  ;;  %v6453_v38 = vld [vmem:[%s8035_s2 + $0xa0] sm:$0xff]   ;;  %v6455_v16 = vld [vmem:[%s8035_s2 + $0xa8] sm:$0xff]  }
  0xf7   : > { %6028 = vmatmul.mubr.msk.bf16.vlgmr.msra.gmra.mrb[0].mxu0 %vm1446_vm10, %v5454_v35  ;;  %468 = vst [vmem:[#allocation3 + $0x40] sm:$0x1] %v467_v32  ;;  %500 = vst [vmem:[#allocation3 + $0x44] sm:$0x1] %v499_v37  ;;  %v442_v46 = vld [vmem:[#allocation3] sm:$0x1] }
  0xf8   : > { %6031 = vmatprep.mubr.msk.bf16.mxu0 %vm1446_vm10, %v5455_v39  ;;  %6036 = vmatpush3.bf16.msra.mxu0 %v7312_v50  ;;  %v6449_v50 = vld [vmem:[%s8035_s2 + $0x90] sm:$0xff]   ;;  %v474_v47 = vld [vmem:[#allocation3 + $0x4] sm:$0x1]  ;;  %v443_v0 = vsel %vm7344_vm12, 0, %v442_v46  ;;  %v6458_v12 = vld [vmem:[%s8035_s2 + $0x38] sm:$0xff]   ;;  %vm3160_vm14 = vcmask 1043456  }
  0xf9   : > { %6037 = vmatprep.subr.bf16.mxu0 %v6446_v10  ;;  %6097 = vmatprep.subr.bf16.mxu1 %v6449_v50  ;;  %v460_v48 = vld [vmem:[#allocation3 + $0x30] sm:$0x1]  ;;  %v492_v54 = vld [vmem:[#allocation3 + $0x34] sm:$0x1]  ;;  %v475_v2 = vsel %vm7355_vm13, 0, %v474_v47  ;;  %v6460_v27 = vld [vmem:[%s8035_s2 + $0xb8] sm:$0xff]  }
  0xfa   : > { %6098 = vmatpush3.bf16.msra.mxu1 %v6449_v50  ;;  %v461_v24 = vsel %vm7344_vm12, 0, %v460_v48  ;;  %v493_v34 = vsel %vm7355_vm13, 0, %v492_v54  ;;  %444 = vst [vmem:[#allocation3] sm:$0x1] %v443_v0  ;;  %476 = vst [vmem:[#allocation3 + $0x4] sm:$0x1] %v475_v2 }
  0xfb   : > { %6099 = vmatprep.subr.bf16.mxu1 %v6451_v53  ;;  %462 = vst [vmem:[#allocation3 + $0x30] sm:$0x1] %v461_v24  ;;  %494 = vst [vmem:[#allocation3 + $0x34] sm:$0x1] %v493_v34  ;;  %v6457_v52 = vld [vmem:[%s8035_s2 + $0xb0] sm:$0xff]   ;;  %v7465_v5 = vld [vmem:[%s8035_s2 + $0x40] sm:$0xff]  }
  0xfc   : > { %6038 = vmatpush3.bf16.msra.mxu0 %v6446_v10  ;;  %v7470_v33 = vld [vmem:[%s8035_s2 + $0xc0] sm:$0xff]   ;;  %v469_v4 = vld [vmem:[#allocation3 + $0x48] sm:$0x1]  ;;  %v501_v20 = vld [vmem:[#allocation3 + $0x4c] sm:$0x1]  ;;  %vm3761_vm0 = vcmask 1042432  }
  0xfd   : > { %6039 = vmatprep.subr.bf16.mxu0 %v6448_v31  ;;  %v470_v14 = vsel %vm7344_vm12, 0, %v469_v4  ;;  %v502_v25 = vsel %vm7355_vm13, 0, %v501_v20  ;;  %v7481_v8 = vld [vmem:[%s8039_s6] ss:$0 sm:$0xff]  ;;  %v3177_v44 = vld [vmem:[#allocation3 + $0x1c] sm:$0x1]  ;;  %vm7508_vm15 = vmand %vm3160_vm14, %vm472_vm5 }
  0xfe   : > { %6100 = vmatpush3.bf16.msra.mxu1 %v6451_v53  ;;  %471 = vst [vmem:[#allocation3 + $0x48] sm:$0x1] %v470_v14  ;;  %503 = vst [vmem:[#allocation3 + $0x4c] sm:$0x1] %v502_v25  ;;  %v7486_v35 = vld [vmem:[%s8040_s7] ss:$0 sm:$0xff] }
  0xff   : > { %6032 = vmatmul.mubr.msk.bf16.gmra.mrb[4].mxu0 %vm1446_vm10, %v5456_v9  ;;  %6101 = vmatprep.subr.bf16.mxu1 %v6453_v38  ;;  %v3174_v53 = vld [vmem:[#allocation3 + $0x18] sm:$0xf]  ;;  %v3165_v34 = vld [vmem:[#allocation3 + $0xc] sm:$0x1]  ;;  %v3183_v14 = vld [vmem:[#allocation3 + $0x24] sm:$0x1] }
 0x100   : > { %6040 = vmatpush3.bf16.msra.mxu0 %v6448_v31  ;;  %vm3762_vm1 = vcmask 1046532  }
 0x101   : > { %6041 = vmatprep.subr.bf16.mxu0 %v6450_v22  ;;  %v7494_v29 = vld [vmem:[#allocation3] sm:$0xf]  ;;  %v7498_v13 = vld [vmem:[#allocation3 + $0x4] sm:$0x1]  ;;  %vm7551_vm2 = vmor %vm3761_vm0, %vm3762_vm1 }
 0x102   : > { %6102 = vmatpush3.bf16.msra.mxu1 %v6453_v38  ;;  %v3472_v61 = vshrl.u32 %v7494_v29, 16  ;;  %v3481_v26 = vshll.u32 %v7498_v13, 16  ;;  %v3162_v38 = vld [vmem:[#allocation3 + $0x8] sm:$0xf] }
 0x103   : > { %6103 = vmatprep.subr.bf16.mxu1 %v6455_v16 }
 0x104   : > { %6042 = vmatpush3.bf16.msra.mxu0 %v6450_v22  ;;  %v3475_v22 = vshll.u32 %v7494_v29, 16 }
 0x105   : > { %6043 = vmatprep.subr.bf16.mxu0 %v6452_v23 }
 0x106   : > { %6104 = vmatpush3.bf16.msra.mxu1 %v6455_v16 }
 0x107   : > { %6105 = vmatprep.subr.bf16.mxu1 %v6457_v52 }
 0x108   : > { %6044 = vmatpush3.bf16.msra.mxu0 %v6452_v23 }
 0x109   : > { %6045 = vmatprep.subr.bf16.mxu0 %v6454_v43 }
 0x10a   : > { %6106 = vmatpush3.bf16.msra.mxu1 %v6457_v52  ;;  %v3180_v52 = vld [vmem:[#allocation3 + $0x20] sm:$0xf] }
 0x10b   : > { %6107 = vmatprep.subr.bf16.mxu1 %v6460_v27 }
 0x10c   : > { %6046 = vmatpush3.bf16.msra.mxu0 %v6454_v43 }
 0x10d   : > { %6047 = vmatprep.subr.bf16.mxu0 %v6456_v57 }
 0x10e   : > { %6108 = vmatpush3.bf16.msra.mxu1 %v6460_v27 }
 0x10f   : > { %6117 = vmatprep.subr.bf16.mxu1 %v7470_v33 }
 0x110   : > { %6048 = vmatpush3.bf16.msra.mxu0 %v6456_v57 }
 0x111   : > { %6049 = vmatprep.subr.bf16.mxu0 %v6458_v12 }
 0x114   : > { %6050 = vmatpush3.bf16.msra.mxu0 %v6458_v12 }
 0x115   : > { %6069 = vmatprep.subr.bf16.mxu0 %v7465_v5 }
 0x1ca   : > { %v6029_v1 = vpop.f32.mrb[0].mxu0 }
 0x1cb   : > { %v3026_v39 = vmul.f32 %v6029_v1, %v7481_v8  ;;  %v2978_v49 = vpop.f32.mrb[1].mxu0 }
 0x1cc   : > { %v3024_v40 = vmul.f32 %v7481_v8, %v2978_v49  ;;  %v6030_v9 = vpop.f32.mrb[2].mxu0 }
 0x1cd   : > { %v3041_v55 = vadd.f32 %v7486_v35, %v3026_v39  ;;  %v3027_v10 = vmul.f32 %v6030_v9, %v7481_v8  ;;  %v2981_v15 = vpop.f32.mrb[3].mxu0  ;;  %v3168_v9 = vld [vmem:[#allocation3 + $0x10] sm:$0xf] }
 0x1ce   : > { %v3039_v31 = vadd.f32 %v7486_v35, %v3024_v40  ;;  %v3025_v50 = vmul.f32 %v7481_v8, %v2981_v15 }
 0x1cf   : > { %v3049_v17 = vmax.f32 %v3041_v55, 0.0  ;;  %v3042_v58 = vadd.f32 %v7486_v35, %v3027_v10  ;;  %v3171_v55 = vld [vmem:[#allocation3 + $0x14] sm:$0x1] }
 0x1d0   : > { %v3047_v45 = vmax.f32 %v3039_v31, 0.0  ;;  %v3040_v60 = vadd.f32 %v7486_v35, %v3025_v50 }
 0x1d1   : > { %v5777_v19 = vpack.c.bf16 %v3049_v17, %v3049_v17  ;;  %v3050_v21 = vmax.f32 %v3042_v58, 0.0  ;;  %v7521_v17 = vld [vmem:[#allocation3] sm:$0xe] }
 0x1d2   : > { %v5775_v28 = vpack.c.bf16 %v3047_v45, %v3047_v45  ;;  %v3048_v62 = vmax.f32 %v3040_v60, 0.0  ;;  %v6033_v18 = vpop.f32.mrb[4].mxu0 }
 0x1d3   : > { %v3096_v63 = vshrl.u32 %v5777_v19, 16  ;;  %v3099_v36 = vshll.u32 %v5777_v19, 16  ;;  %v5778_v11 = vpack.c.bf16 %v3050_v21, %v3050_v21  ;;  %v3030_v6 = vmul.f32 %v6033_v18, %v7481_v8  ;;  %v2994_v56 = vpop.f32.mrb[5].mxu0 }
 0x1d4   : > { %v3080_v41 = vshrl.u32 %v5775_v28, 16  ;;  %v3083_v51 = vshll.u32 %v5775_v28, 16  ;;  %v5776_v30 = vpack.c.bf16 %v3048_v62, %v3048_v62  ;;  %v3028_v32 = vmul.f32 %v7481_v8, %v2994_v56  ;;  %v6034_v37 = vpop.f32.mrb[6].mxu0  ;;  %v3201_v56 = vld [vmem:[#allocation3 + $0x3c] sm:$0x1] }
 0x1d5   : > { %v3098_v23 = vrot.slane %v3096_v63, 7  ;;  %v3104_v43 = vshrl.u32 %v5778_v11, 16  ;;  %v3107_v46 = vshll.u32 %v5778_v11, 16  ;;  %v3045_v47 = vadd.f32 %v7486_v35, %v3030_v6  ;;  %v2997_v48 = vpop.f32.mrb[7].mxu0  ;;  %v3198_v6 = vld [vmem:[#allocation3 + $0x38] sm:$0xf] }
 0x1d6   : > { %v3082_v24 = vrot.slane %v3080_v41, 7  ;;  %v3088_v16 = vshrl.u32 %v5776_v30, 16  ;;  %v3091_v57 = vshll.u32 %v5776_v30, 16  ;;  %v3043_v59 = vadd.f32 %v7486_v35, %v3028_v32 }
 0x1d7   : > { %v3101_v0 = vor.u32 %v3099_v36, %v3098_v23  ;;  %v3102_v2 = vrot.slane %v3098_v23, 4  ;;  %v3106_v7 = vrot.slane %v3104_v43, 7  ;;  %v3053_v12 = vmax.f32 %v3045_v47, 0.0  ;;  %v3186_v23 = vld [vmem:[#allocation3 + $0x28] sm:$0xf] }
 0x1d8   : > { %v3085_v27 = vor.u32 %v3083_v51, %v3082_v24  ;;  %v3086_v4 = vrot.slane %v3082_v24, 4  ;;  %v3090_v20 = vrot.slane %v3088_v16, 7  ;;  %v3051_v25 = vmax.f32 %v3043_v59, 0.0 }
 0x1d9   : > { %v3175_v1 = vsel %vm7508_vm15, %v3101_v0, %v3174_v53  ;;  %v3178_v39 = vsel %vm7344_vm12, %v3102_v2, %v3177_v44  ;;  %v3109_v49 = vor.u32 %v3107_v46, %v3106_v7  ;;  %v3110_v40 = vrot.slane %v3106_v7, 4 }
 0x1da   : > { %3176 = vst [vmem:[#allocation3 + $0x18] sm:$0xf] %v3175_v1  ;;  %3179 = vst [vmem:[#allocation3 + $0x1c] sm:$0x1] %v3178_v39  ;;  %v3163_v10 = vsel %vm7508_vm15, %v3085_v27, %v3162_v38  ;;  %v3166_v15 = vsel %vm7344_vm12, %v3086_v4, %v3165_v34  ;;  %v3093_v31 = vor.u32 %v3091_v57, %v3090_v20  ;;  %v3094_v50 = vrot.slane %v3090_v20, 4 }
 0x1db   : > { %3164 = vst [vmem:[#allocation3 + $0x8] sm:$0xf] %v3163_v10  ;;  %3167 = vst [vmem:[#allocation3 + $0xc] sm:$0x1] %v3166_v15  ;;  %v3181_v58 = vsel %vm7508_vm15, %v3109_v49, %v3180_v52  ;;  %v3184_v45 = vsel %vm7344_vm12, %v3110_v40, %v3183_v14  ;;  %v5781_v60 = vpack.c.bf16 %v3053_v12, %v3053_v12  ;;  %v5519_v11 = vrot.slane %v7521_v17, 9  ;;  %v6464_v12 = vld [vmem:[%s8035_s2 + $0x48] sm:$0xff]  }
 0x1dc   : > { %v5779_v19 = vpack.c.bf16 %v3051_v25, %v3051_v25  ;;  %3182 = vst [vmem:[#allocation3 + $0x20] sm:$0xf] %v3181_v58  ;;  %3185 = vst [vmem:[#allocation3 + $0x24] sm:$0x1] %v3184_v45  ;;  %v3169_v21 = vsel %vm7508_vm15, %v3093_v31, %v3168_v9  ;;  %v3172_v28 = vsel %vm7344_vm12, %v3094_v50, %v3171_v55  ;;  %v3766_v41 = vrot.slane %v7498_v13, 5 }
 0x1dd   : > { %v3031_v62 = vmul.f32 %v6034_v37, %v7481_v8  ;;  %v3029_v18 = vmul.f32 %v7481_v8, %v2997_v48  ;;  %3170 = vst [vmem:[#allocation3 + $0x10] sm:$0xf] %v3169_v21  ;;  %3173 = vst [vmem:[#allocation3 + $0x14] sm:$0x1] %v3172_v28  ;;  %v3128_v63 = vshrl.u32 %v5781_v60, 16  ;;  %v7539_v51 = vrot.slane %v3472_v61, 4 }
 0x1de   : > { %v3112_v36 = vshrl.u32 %v5779_v19, 16  ;;  %v3131_v30 = vshll.u32 %v5781_v60, 16  ;;  %v3115_v37 = vshll.u32 %v5779_v19, 16  ;;  %v3189_v38 = vld [vmem:[#allocation3 + $0x2c] sm:$0x1]  ;;  %v7543_v47 = vrot.slane %v3475_v22, 5 }
 0x1df   : > { %v3046_v53 = vadd.f32 %v7486_v35, %v3031_v62  ;;  %v3044_v44 = vadd.f32 %v7486_v35, %v3029_v18  ;;  %v3130_v8 = vrot.slane %v3128_v63, 7  ;;  %v7547_v35 = vrot.slane %v3481_v26, 5  ;;  %v3204_v1 = vld [vmem:[#allocation3 + $0x40] sm:$0xf]  ;;  %v3207_v39 = vld [vmem:[#allocation3 + $0x44] sm:$0x1] }
 0x1e0   : > { %v3114_v32 = vrot.slane %v3112_v36, 7  ;;  %v3192_v49 = vld [vmem:[#allocation3 + $0x30] sm:$0xf]  ;;  %v3767_v9 = vsel %vm7551_vm2, %v5519_v11, %v3766_v41  ;;  %v3195_v60 = vld [vmem:[#allocation3 + $0x34] sm:$0x1]  ;;  %v3478_v18 = vor.u32 %v7543_v47, %v7539_v51 }
 0x1e1   : > { %v3054_v43 = vmax.f32 %v3046_v53, 0.0  ;;  %v3052_v46 = vmax.f32 %v3044_v44, 0.0  ;;  %v3133_v48 = vor.u32 %v3131_v30, %v3130_v8  ;;  %v3134_v24 = vrot.slane %v3130_v8, 4  ;;  %v7557_v22 = vld [vmem:[#allocation3 + $0x1c] sm:$0x1]  ;;  %v6466_v8 = vld [vmem:[%s8035_s2 + $0xc8] sm:$0xff]  }
 0x1e2   : > { %v3117_v61 = vor.u32 %v3115_v37, %v3114_v32  ;;  %v3118_v34 = vrot.slane %v3114_v32, 4  ;;  %v6459_v0 = vld [vmem:[#allocation3] ss:$8 sps:$4 sm:$0xff]   ;;  %v7555_v29 = vld [vmem:[#allocation3 + $0xc] sm:$0x1]  ;;  %v3778_v28 = vrot.slane %v7557_v22, 5 }
 0x1e3   : > { %v5782_v57 = vpack.c.bf16 %v3054_v43, %v3054_v43  ;;  %v5780_v59 = vpack.c.bf16 %v3052_v46, %v3052_v46  ;;  %v3199_v13 = vsel %vm7508_vm15, %v3133_v48, %v3198_v6  ;;  %v3202_v26 = vsel %vm7344_vm12, %v3134_v24, %v3201_v56  ;;  %v3738_v52 = vld [vmem:[#allocation3 + $0x8] sm:$0xe]  ;;  %v3740_v27 = vld [vmem:[#allocation3 + $0x18] sm:$0xe]  ;;  %6051 = vmatprep.mubr.bf16.mxu0 %v6459_v0  ;;  %v3741_v56 = vld [vmem:[#allocation3 + $0x20] sm:$0xe] }
 0x1e4   : > { %v3187_v2 = vsel %vm7508_vm15, %v3117_v61, %v3186_v23  ;;  %v3190_v7 = vsel %vm7344_vm12, %v3118_v34, %v3189_v38  ;;  %3200 = vst [vmem:[#allocation3 + $0x38] sm:$0xf] %v3199_v13  ;;  %3203 = vst [vmem:[#allocation3 + $0x3c] sm:$0x1] %v3202_v26  ;;  %v6462_v40 = vld [vmem:[#allocation3 + $0x10] ss:$8 sps:$4 sm:$0xff]  }
 0x1e5   : > { %3188 = vst [vmem:[#allocation3 + $0x28] sm:$0xf] %v3187_v2  ;;  %3191 = vst [vmem:[#allocation3 + $0x2c] sm:$0x1] %v3190_v7  ;;  %v3136_v4 = vshrl.u32 %v5782_v57, 16  ;;  %v3139_v14 = vshll.u32 %v5782_v57, 16  ;;  %6052 = vmatmul.mubr.bf16.vlgmr.msra.gmra.mrb[8].mxu0 %v6462_v40 }
 0x1e6   : > { %v3120_v20 = vshrl.u32 %v5780_v59, 16  ;;  %v3123_v25 = vshll.u32 %v5780_v59, 16  ;;  %v5520_v55 = vrot.slane %v3738_v52, 9  ;;  %v3770_v10 = vrot.slane %v7555_v29, 5  ;;  %v7573_v15 = vld [vmem:[#allocation3 + $0x14] sm:$0x1]  ;;  %6070 = vmatpush3.bf16.msra.mxu0 %v7465_v5 }
 0x1e7   : > { %v3138_v31 = vrot.slane %v3136_v4, 7  ;;  %v3739_v17 = vld [vmem:[#allocation3 + $0x10] sm:$0xe]  ;;  %v3774_v58 = vrot.slane %v7573_v15, 5  ;;  %v5522_v45 = vrot.slane %v3740_v27, 9  ;;  %6071 = vmatprep.subr.bf16.mxu0 %v6464_v12  ;;  %v3495_v3 = vshll.u32 %v7555_v29, 16 }
 0x1e8   : > { %v3122_v50 = vrot.slane %v3120_v20, 7  ;;  %v3771_v19 = vsel %vm7551_vm2, %v5520_v55, %v3770_v10  ;;  %v5521_v21 = vrot.slane %v3739_v17, 9  ;;  %v3457_v62 = vld [vmem:[#allocation3 + $0x8] sm:$0xf]  ;;  %v6467_v23 = vld [vmem:[%s8035_s2 + $0x50] sm:$0xff]   ;;  %v5523_v61 = vrot.slane %v3741_v56, 9 }
 0x1e9   : > { %v3141_v63 = vor.u32 %v3139_v14, %v3138_v31  ;;  %v3142_v36 = vrot.slane %v3138_v31, 4  ;;  %v5543_v53 = vcombine.low %v3767_v9, %v3771_v19  ;;  %v3779_v41 = vsel %vm7551_vm2, %v5522_v45, %v3778_v28  ;;  %v7600_v38 = vld [vmem:[#allocation3 + $0x24] sm:$0x1]  ;;  %v7602_v43 = vld [vmem:[#allocation3 + $0x10] sm:$0xf]  ;;  %v6470_v13 = vld [vmem:[%s8035_s2 + $0x58] sm:$0xff]  }
 0x1ea   : > { %v3125_v11 = vor.u32 %v3123_v25, %v3122_v50  ;;  %v3126_v6 = vrot.slane %v3122_v50, 4  ;;  %v3775_v44 = vsel %vm7551_vm2, %v5521_v21, %v3774_v58  ;;  %v3486_v51 = vshrl.u32 %v3457_v62, 16  ;;  %6072 = vmatpush3.bf16.msra.mxu0 %v6464_v12  ;;  %v6469_v52 = vld [vmem:[%s8035_s2 + $0xd0] sm:$0xff]   ;;  %v6473_v20 = vld [vmem:[%s8035_s2 + $0x60] sm:$0xff]   ;;  %v3461_v25 = vld [vmem:[#allocation3 + $0x18] sm:$0xf] }
 0x1eb   : > { %v3205_v30 = vsel %vm7508_vm15, %v3141_v63, %v3204_v1  ;;  %v3208_v5 = vsel %vm7344_vm12, %v3142_v36, %v3207_v39  ;;  %6109 = vmatprep.mubr.bf16.mxu1 %v5543_v53  ;;  %v5544_v46 = vcombine.low %v3775_v44, %v3779_v41  ;;  %v3489_v48 = vshll.u32 %v3457_v62, 16  ;;  %6073 = vmatprep.subr.bf16.mxu0 %v6467_v23  ;;  %v7613_v2 = vld [vmem:[#allocation3 + $0x3c] sm:$0x1]  ;;  %v3744_v7 = vld [vmem:[#allocation3 + $0x38] sm:$0xe]  ;;  %v6474_v44 = vld [vmem:[%s8035_s2 + $0xe0] sm:$0xff]  }
 0x1ec   : > { %v3193_v32 = vsel %vm7508_vm15, %v3125_v11, %v3192_v49  ;;  %v3196_v37 = vsel %vm7344_vm12, %v3126_v6, %v3195_v60  ;;  %3206 = vst [vmem:[#allocation3 + $0x40] sm:$0xf] %v3205_v30  ;;  %3209 = vst [vmem:[#allocation3 + $0x44] sm:$0x1] %v3208_v5  ;;  %v6465_v47 = vld [vmem:[#allocation3 + $0x20] ss:$8 sps:$4 sm:$0xff]  }
 0x1ed   : > { %3194 = vst [vmem:[#allocation3 + $0x30] sm:$0xf] %v3193_v32  ;;  %3197 = vst [vmem:[#allocation3 + $0x34] sm:$0x1] %v3196_v37  ;;  %v3488_v54 = vrot.slane %v3486_v51, 4  ;;  %6110 = vmatmul.mubr.bf16.vlgmr.msra.gmra.mrb[8].mxu1 %v5544_v46  ;;  %6055 = vmatprep.mubr.bf16.mxu0 %v6465_v47  ;;  %v3479_v34 = vrot.slane %v3478_v18, 4 }
 0x1ee   : > { %v7605_v24 = vld [vmem:[#allocation3 + $0x2c] sm:$0x1]  ;;  %v3742_v57 = vld [vmem:[#allocation3 + $0x28] sm:$0xe]  ;;  %v3782_v59 = vrot.slane %v7600_v38, 5  ;;  %6118 = vmatpush3.bf16.msra.mxu1 %v7470_v33  ;;  %v3491_v26 = vrot.slane %v3489_v48, 5  ;;  %6074 = vmatpush3.bf16.msra.mxu0 %v6467_v23 }
 0x1ef   : > { %v3786_v0 = vrot.slane %v7605_v24, 5  ;;  %v5524_v29 = vrot.slane %v3742_v57, 9  ;;  %6119 = vmatprep.subr.bf16.mxu1 %v6466_v8  ;;  %v3500_v12 = vshrl.u32 %v7602_v43, 16  ;;  %v3497_v4 = vrot.slane %v3495_v3, 5  ;;  %6075 = vmatprep.subr.bf16.mxu0 %v6470_v13  ;;  %v3463_v40 = vld [vmem:[#allocation3 + $0x20] sm:$0xf] }
 0x1f0   : > { %v3492_v27 = vor.u32 %v3491_v26, %v3488_v54  ;;  %v3783_v14 = vsel %vm7551_vm2, %v5523_v61, %v3782_v59  ;;  %v5526_v39 = vrot.slane %v3744_v7, 9  ;;  %v3794_v49 = vrot.slane %v7613_v2, 5  ;;  %v6472_v58 = vld [vmem:[%s8035_s2 + $0xd8] sm:$0xff]   ;;  %v3465_v21 = vld [vmem:[#allocation3 + $0x28] sm:$0xf] }
 0x1f1   : > { %v3787_v33 = vsel %vm7551_vm2, %v5524_v29, %v3786_v0  ;;  %v3484_v55 = vsel %vm6706_vm9, %v3479_v34, %v7547_v35  ;;  %v3503_v31 = vshll.u32 %v7602_v43, 16  ;;  %v3502_v45 = vrot.slane %v3500_v12, 4  ;;  %v6475_v41 = vld [vmem:[%s8035_s2 + $0x68] sm:$0xff]   ;;  %v6477_v43 = vld [vmem:[%s8035_s2 + $0x70] sm:$0xff]   ;;  %v3469_v3 = vld [vmem:[#allocation3 + $0x38] sm:$0xf] }
 0x1f2   : > { %v5545_v1 = vcombine.low %v3783_v14, %v3787_v33  ;;  %6120 = vmatpush3.bf16.msra.mxu1 %v6466_v8  ;;  %v3493_v10 = vrot.slane %v3492_v27, 4  ;;  %v3795_v62 = vsel %vm7551_vm2, %v5526_v39, %v3794_v49  ;;  %6076 = vmatpush3.bf16.msra.mxu0 %v6470_v13  ;;  %v3514_v18 = vshrl.u32 %v3461_v25, 16  ;;  %v6471_v51 = vld [vmem:[#allocation3 + $0x8] ss:$8 sps:$4 sm:$0xff]  }
 0x1f3   : > { %6121 = vmatprep.subr.bf16.mxu1 %v6469_v52  ;;  %v3517_v63 = vshll.u32 %v3461_v25, 16  ;;  %6077 = vmatprep.subr.bf16.mxu0 %v6473_v20  ;;  %v3505_v11 = vrot.slane %v3503_v31, 5  ;;  %v3528_v6 = vshrl.u32 %v3463_v40, 16  ;;  %v3531_v56 = vshll.u32 %v3463_v40, 16  ;;  %v6476_v61 = vld [vmem:[%s8035_s2 + $0xe8] sm:$0xff]  }
 0x1f4   : > { %v6468_v9 = vld [vmem:[#allocation3 + $0x30] ss:$8 sps:$4 sm:$0xff]   ;;  %6113 = vmatprep.mubr.bf16.mxu1 %v5545_v1  ;;  %v7631_v50 = vld [vmem:[#allocation3 + $0x34] sm:$0x1]  ;;  %v3498_v60 = vsel %vm6706_vm9, %v3493_v10, %v3497_v4  ;;  %v3542_v8 = vshrl.u32 %v3465_v21, 16  ;;  %v3545_v30 = vshll.u32 %v3465_v21, 16 }
 0x1f5   : > { %v3743_v17 = vld [vmem:[#allocation3 + $0x30] sm:$0xe]  ;;  %6056 = vmatmul.mubr.bf16.gmra.mrb[12].mxu0 %v6468_v9  ;;  %v3790_v35 = vrot.slane %v7631_v50, 5  ;;  %v5507_v28 = vcombine.low %v3484_v55, %v3498_v60  ;;  %v3516_v32 = vrot.slane %v3514_v18, 4  ;;  %v3519_v37 = vrot.slane %v3517_v63, 5  ;;  %v7670_v10 = vld [vmem:[%s8035_s2 + $0x200] sm:$0xff]  }
 0x1f6   : > { %v5525_v19 = vrot.slane %v3743_v17, 9  ;;  %6122 = vmatpush3.bf16.msra.mxu1 %v6469_v52  ;;  %v3467_v5 = vld [vmem:[#allocation3 + $0x30] sm:$0xf]  ;;  %6078 = vmatpush3.bf16.msra.mxu0 %v6473_v20  ;;  %v3544_v23 = vrot.slane %v3542_v8, 4  ;;  %v3506_v46 = vor.u32 %v3505_v11, %v3502_v45  ;;  %v3530_v47 = vrot.slane %v3528_v6, 4  ;;  %v6479_v52 = vld [vmem:[%s8035_s2 + $0x78] sm:$0xff]  }
 0x1f7   : > { %6085 = vmatprep.mubr.bf16.mxu0 %v5507_v28  ;;  %6123 = vmatprep.subr.bf16.mxu1 %v6472_v58  ;;  %v3533_v54 = vrot.slane %v3531_v56, 5  ;;  %v3547_v48 = vrot.slane %v3545_v30, 5  ;;  %v3509_v34 = vshll.u32 %v7573_v15, 16  ;;  %v3556_v57 = vshrl.u32 %v3467_v5, 16  ;;  %v6478_v15 = vld [vmem:[%s8035_s2 + $0xf0] sm:$0xff]   ;;  %v6483_v30 = vld [vmem:[%s8035_s2 + $0x100] sm:$0xff]  }
 0x1f8   : > { %v3791_v36 = vsel %vm7551_vm2, %v5525_v19, %v3790_v35  ;;  %6079 = vmatprep.subr.bf16.mxu0 %v6475_v41  ;;  %v3559_v59 = vshll.u32 %v3467_v5, 16  ;;  %v3520_v13 = vor.u32 %v3519_v37, %v3516_v32  ;;  %v3523_v26 = vshll.u32 %v7557_v22, 16  ;;  %v4120_v1 = vld [vmem:[#allocation3 + $0x8] sm:$0xf]  ;;  %v4122_v39 = vld [vmem:[#allocation3 + $0x10] sm:$0xf] }
 0x1f9   : > { %v5546_v53 = vcombine.low %v3791_v36, %v3795_v62  ;;  %v3548_v0 = vor.u32 %v3547_v48, %v3544_v23  ;;  %v3570_v29 = vshrl.u32 %v3469_v3, 16  ;;  %v3573_v7 = vshll.u32 %v3469_v3, 16  ;;  %v7680_v36 = vld [vmem:[#allocation3 + $0x14] sm:$0x1]  ;;  %v5065_v11 = vld [vmem:[#allocation3 + $0x10] sm:$0xe] }
 0x1fa   : > { %6124 = vmatpush3.bf16.msra.mxu1 %v6472_v58  ;;  %6080 = vmatpush3.bf16.msra.mxu0 %v6475_v41  ;;  %v3507_v12 = vrot.slane %v3506_v46, 4  ;;  %v3534_v27 = vor.u32 %v3533_v54, %v3530_v47  ;;  %v3551_v4 = vshll.u32 %v7605_v24, 16  ;;  %v3511_v14 = vrot.slane %v3509_v34, 5  ;;  %v6480_v58 = vld [vmem:[%s8035_s2 + $0xf8] sm:$0xff]   ;;  %v7697_v47 = vld [vmem:[#allocation3 + $0x14] sm:$0x1] }
 0x1fb   : > { %6114 = vmatmul.mubr.bf16.gmra.mrb[12].mxu1 %v5546_v53  ;;  %6125 = vmatprep.subr.bf16.mxu1 %v6474_v44  ;;  %v3558_v33 = vrot.slane %v3556_v57, 4  ;;  %v3561_v22 = vrot.slane %v3559_v59, 5  ;;  %v3537_v20 = vshll.u32 %v7600_v38, 16  ;;  %v3549_v25 = vrot.slane %v3548_v0, 4  ;;  %v7691_v8 = vld [vmem:[#allocation3 + $0x1c] sm:$0x1] }
 0x1fc   : > { %6133 = vmatprep.mubr.bf16.mxu1 %v6471_v51  ;;  %6081 = vmatprep.subr.bf16.mxu0 %v6477_v43  ;;  %v3521_v49 = vrot.slane %v3520_v13, 4  ;;  %v3525_v40 = vrot.slane %v3523_v26, 5  ;;  %v3572_v9 = vrot.slane %v3570_v29, 4  ;;  %v3575_v55 = vrot.slane %v3573_v7, 5  ;;  %v5066_v32 = vld [vmem:[#allocation3 + $0x18] sm:$0xe] }
 0x1fd   : > { %v3512_v24 = vsel %vm6706_vm9, %v3507_v12, %v3511_v14  ;;  %v3535_v31 = vrot.slane %v3534_v27, 4  ;;  %v3553_v38 = vrot.slane %v3551_v4, 5  ;;  %v4151_v17 = vshrl.u32 %v4122_v39, 16  ;;  %v7702_v34 = vld [vmem:[#allocation3 + $0xc] sm:$0x1]  ;;  %v7712_v26 = vld [vmem:[%s8035_s2 + $0x210] sm:$0xff]  }
 0x1fe   : > { %6126 = vmatpush3.bf16.msra.mxu1 %v6474_v44  ;;  %6082 = vmatpush3.bf16.msra.mxu0 %v6477_v43  ;;  %v3562_v45 = vor.u32 %v3561_v22, %v3558_v33  ;;  %v4137_v60 = vshrl.u32 %v4120_v1, 16  ;;  %v4140_v19 = vshll.u32 %v4120_v1, 16  ;;  %v4154_v35 = vshll.u32 %v4122_v39, 16  ;;  %v6482_v57 = vld [vmem:[#allocation3 + $0x18] ss:$8 sps:$4 sm:$0xff]   ;;  %v6486_v59 = vld [vmem:[%s8035_s2 + $0x108] sm:$0xff]  }
 0x1ff   : > { %6127 = vmatprep.subr.bf16.mxu1 %v6476_v61  ;;  %6083 = vmatprep.subr.bf16.mxu0 %v6479_v52  ;;  %v3539_v21 = vrot.slane %v3537_v20, 5  ;;  %v3554_v28 = vsel %vm6706_vm9, %v3549_v25, %v3553_v38  ;;  %v3565_v62 = vshll.u32 %v7631_v50, 16  ;;  %v3526_v18 = vsel %vm6706_vm9, %v3521_v49, %v3525_v40  ;;  %v7688_v50 = vld [vmem:[%s8035_s2 + $0x208] sm:$0xff]   ;;  %v4124_v14 = vld [vmem:[#allocation3 + $0x18] sm:$0xf]  ;;  %v6489_v20 = vld [vmem:[%s8035_s2 + $0x110] sm:$0xff]  }
 0x200   : > { %v3576_v63 = vor.u32 %v3575_v55, %v3572_v9  ;;  %v4153_v6 = vrot.slane %v4151_v17, 4  ;;  %v4156_v56 = vrot.slane %v4154_v35, 5  ;;  %v5508_v53 = vcombine.low %v3512_v24, %v3526_v18  ;;  %v7729_v25 = vld [vmem:[%s8035_s2 + $0x218] sm:$0xff]   ;;  %v4126_v1 = vld [vmem:[#allocation3 + $0x20] sm:$0xf] }
 0x201   : > { %v3540_v44 = vsel %vm6706_vm9, %v3535_v31, %v3539_v21  ;;  %v3579_v41 = vshll.u32 %v7613_v2, 16  ;;  %v3563_v5 = vrot.slane %v3562_v45, 4  ;;  %v4139_v37 = vrot.slane %v4137_v60, 4  ;;  %v7732_v9 = vld [vmem:[#allocation3 + $0x2c] sm:$0x1]  ;;  %v6491_v45 = vld [vmem:[%s8035_s2 + $0x118] sm:$0xff]  }
 0x202   : > { %6128 = vmatpush3.bf16.msra.mxu1 %v6476_v61  ;;  %6084 = vmatpush3.bf16.msra.mxu0 %v6479_v52  ;;  %v5509_v51 = vcombine.low %v3540_v44, %v3554_v28  ;;  %v4142_v23 = vrot.slane %v4140_v19, 5  ;;  %v5703_v43 = vrot.slane %v5065_v11, 9  ;;  %v5091_v46 = vrot.slane %v7680_v36, 5  ;;  %v6484_v52 = vld [vmem:[#allocation3 + $0x28] ss:$8 sps:$4 sm:$0xff]   ;;  %v7743_v60 = vld [vmem:[%s8035_s2 + $0x220] sm:$0xff]  }
 0x203   : > { %6129 = vmatprep.subr.bf16.mxu1 %v6478_v15  ;;  %6237 = vmatprep.subr.bf16.mxu0 %v7670_v10  ;;  %v3567_v2 = vrot.slane %v3565_v62, 5  ;;  %v3577_v54 = vrot.slane %v3576_v63, 4  ;;  %v4157_v48 = vor.u32 %v4156_v56, %v4153_v6  ;;  %v5704_v3 = vrot.slane %v5066_v32, 9  ;;  %v5068_v55 = vld [vmem:[#allocation3 + $0x28] sm:$0xe] }
 0x204   : > { %v5095_v61 = vrot.slane %v7691_v8, 5  ;;  %v3581_v13 = vrot.slane %v3579_v41, 5  ;;  %v4143_v29 = vor.u32 %v4142_v23, %v4139_v37  ;;  %v4160_v7 = vshll.u32 %v7697_v47, 16  ;;  %v6488_v38 = vld [vmem:[#allocation3 + $0x38] ss:$8 sps:$4 sm:$0xff]  }
 0x205   : > { %6086 = vmatmul.mubr.bf16.vlgmr.msra.gmra.mrb[16].mxu0 %v5508_v53  ;;  %v3568_v0 = vsel %vm6706_vm9, %v3563_v5, %v3567_v2  ;;  %v5092_v12 = vsel %vm7551_vm2, %v5703_v43, %v5091_v46  ;;  %v4146_v4 = vshll.u32 %v7702_v34, 16  ;;  %v4165_v24 = vshrl.u32 %v4124_v14, 16  ;;  %v7745_v19 = vld [vmem:[#allocation3 + $0x24] sm:$0x1]  ;;  %v5067_v35 = vld [vmem:[#allocation3 + $0x20] sm:$0xe] }
 0x206   : > { %6130 = vmatpush3.bf16.msra.mxu1 %v6478_v15  ;;  %6089 = vmatprep.mubr.bf16.mxu0 %v5509_v51  ;;  %v3582_v27 = vsel %vm6706_vm9, %v3577_v54, %v3581_v13  ;;  %v4158_v15 = vrot.slane %v4157_v48, 4  ;;  %v5096_v22 = vsel %vm7551_vm2, %v5704_v3, %v5095_v61  ;;  %v4144_v49 = vrot.slane %v4143_v29, 4  ;;  %v7749_v63 = vld [vmem:[#allocation3 + $0x1c] sm:$0x1]  ;;  %v4130_v11 = vld [vmem:[#allocation3 + $0x30] sm:$0xf] }
 0x207   : > { %6131 = vmatprep.subr.bf16.mxu1 %v6480_v58  ;;  %6238 = vmatpush3.bf16.msra.mxu0 %v7670_v10  ;;  %v5510_v33 = vcombine.low %v3568_v0, %v3582_v27  ;;  %v5727_v39 = vcombine.low %v5092_v12, %v5096_v22  ;;  %v4162_v40 = vrot.slane %v4160_v7, 5  ;;  %v4168_v31 = vshll.u32 %v4124_v14, 16  ;;  %v7753_v56 = vld [vmem:[#allocation3 + $0x24] sm:$0x1]  ;;  %v4128_v51 = vld [vmem:[#allocation3 + $0x28] sm:$0xf] }
 0x208   : > { %6239 = vmatprep.subr.bf16.mxu0 %v7688_v50  ;;  %v4148_v17 = vrot.slane %v4146_v4, 5  ;;  %v4179_v21 = vshrl.u32 %v4126_v1, 16  ;;  %v4182_v28 = vshll.u32 %v4126_v1, 16  ;;  %v5706_v62 = vrot.slane %v5068_v55, 9  ;;  %v7761_v43 = vld [vmem:[%s8035_s2 + $0x228] sm:$0xff]   ;;  %v6493_v48 = vld [vmem:[%s8035_s2 + $0x120] sm:$0xff]  }
 0x209   : > { %v5103_v18 = vrot.slane %v7732_v9, 5  ;;  %v4167_v44 = vrot.slane %v4165_v24, 4  ;;  %v4170_v41 = vrot.slane %v4168_v31, 5  ;;  %v4207_v37 = vshrl.u32 %v4130_v11, 16  ;;  %v6495_v29 = vld [vmem:[%s8035_s2 + $0x128] sm:$0xff]   ;;  %v7785_v4 = vld [vmem:[%s8035_s2 + $0x230] sm:$0xff]  }
 0x20a   : > { %6132 = vmatpush3.bf16.msra.mxu1 %v6480_v58  ;;  %v4163_v58 = vsel %vm6706_vm9, %v4158_v15, %v4162_v40  ;;  %v4149_v6 = vsel %vm6706_vm9, %v4144_v49, %v4148_v17  ;;  %v4181_v5 = vrot.slane %v4179_v21, 4  ;;  %v4184_v32 = vrot.slane %v4182_v28, 5  ;;  %v4134_v22 = vld [vmem:[#allocation3 + $0x40] sm:$0xf]  ;;  %v4783_v49 = vld [vmem:[#allocation3 + $0x10] sm:$0xf] }
 0x20b   : > { %6141 = vmatprep.subr.bf16.mxu1 %v6483_v30  ;;  %6240 = vmatpush3.bf16.msra.mxu0 %v7688_v50  ;;  %v5599_v53 = vcombine.low %v4149_v6, %v4163_v58  ;;  %v4210_v23 = vshll.u32 %v4130_v11, 16  ;;  %v5705_v46 = vrot.slane %v5067_v35, 9  ;;  %v5099_v2 = vrot.slane %v7745_v19, 5  ;;  %v4785_v40 = vld [vmem:[#allocation3 + $0x18] sm:$0xf]  ;;  %v6497_v28 = vld [vmem:[%s8035_s2 + $0x130] sm:$0xff]  }
 0x20c   : > { %6241 = vmatprep.subr.bf16.mxu0 %v7712_v26  ;;  %v4174_v54 = vshll.u32 %v7749_v63, 16  ;;  %v4193_v3 = vshrl.u32 %v4128_v51, 16  ;;  %v4196_v61 = vshll.u32 %v4128_v51, 16  ;;  %v4188_v0 = vshll.u32 %v7753_v56, 16  ;;  %v4787_v17 = vld [vmem:[#allocation3 + $0x20] sm:$0xf] }
 0x20d   : > { %6134 = vmatmul.mubr.bf16.vlgmr.msra.gmra.mrb[8].mxu1 %v6482_v57  ;;  %6090 = vmatmul.mubr.bf16.gmra.mrb[20].mxu0 %v5510_v33  ;;  %v7771_v57 = vsel %vm7551_vm2, %v5706_v62, %v5103_v18  ;;  %v4185_v7 = vor.u32 %v4184_v32, %v4181_v5  ;;  %v4209_v12 = vrot.slane %v4207_v37, 4  ;;  %v4212_v27 = vrot.slane %v4210_v23, 5  ;;  %v7793_v33 = vld [vmem:[#allocation3 + $0x38] sm:$0xf]  ;;  %v4789_v5 = vld [vmem:[#allocation3 + $0x28] sm:$0xf] }
 0x20e   : > { %6137 = vmatprep.mubr.bf16.mxu1 %v6484_v52  ;;  %6142 = vmatpush3.bf16.msra.mxu1 %v6483_v30  ;;  %v7755_v30 = vld [vmem:[#allocation3 + $0x2c] sm:$0x1]  ;;  %v7779_v52 = vld [vmem:[#allocation3 + $0x34] sm:$0x1]  ;;  %v7789_v15 = vsel %vm7551_vm2, %v5705_v46, %v5099_v2  ;;  %v7791_v14 = vrot.slane %v4174_v54, 5  ;;  %v7797_v1 = vrot.slane %v4193_v3, 4 }
 0x20f   : > { %6143 = vmatprep.subr.bf16.mxu1 %v6486_v59  ;;  %6242 = vmatpush3.bf16.msra.mxu0 %v7712_v26  ;;  %v4202_v13 = vshll.u32 %v7755_v30, 16  ;;  %v7803_v24 = vrot.slane %v4188_v0, 5  ;;  %v7809_v58 = vrot.slane %v4185_v7, 4  ;;  %v4221_v35 = vshrl.u32 %v7793_v33, 16  ;;  %v7819_v62 = vld [vmem:[%s8035_s2 + $0x238] sm:$0xff]   ;;  %v7824_v37 = vpop.f32.mrb[0].mxu1 }
 0x210   : > { %6253 = vmatprep.mubr.bf16.mxu0 %v5727_v39  ;;  %6243 = vmatprep.subr.bf16.mxu0 %v7729_v25  ;;  %v7799_v39 = vrot.slane %v4196_v61, 5  ;;  %v4235_v21 = vshrl.u32 %v4134_v22, 16  ;;  %v4238_v18 = vshll.u32 %v4134_v22, 16  ;;  %v4800_v11 = vshrl.u32 %v4783_v49, 16  ;;  %v5071_v42 = vld [vmem:[#allocation3 + $0x40] sm:$0xe] }
 0x211   : > { %v7805_v31 = vrot.slane %v4202_v13, 5  ;;  %v4803_v6 = vshll.u32 %v4783_v49, 16  ;;  %v4817_v51 = vshll.u32 %v4785_v40, 16  ;;  %v4828_v32 = vshrl.u32 %v4787_v17, 16 }
 0x212   : > { %6144 = vmatpush3.bf16.msra.mxu1 %v6486_v59  ;;  %v4171_v59 = vor.u32 %v4170_v41, %v4167_v44  ;;  %v4199_v44 = vor.u32 %v7799_v39, %v7797_v1  ;;  %v4809_v41 = vshll.u32 %v7680_v36, 16  ;;  %v4224_v23 = vshll.u32 %v7793_v33, 16 }
 0x213   : > { %6145 = vmatprep.subr.bf16.mxu1 %v6489_v20  ;;  %6244 = vmatpush3.bf16.msra.mxu0 %v7729_v25  ;;  %v4802_v46 = vrot.slane %v4800_v11, 4  ;;  %v4805_v2 = vrot.slane %v4803_v6, 5  ;;  %v4823_v54 = vshll.u32 %v7691_v8, 16  ;;  %v4237_v61 = vrot.slane %v4235_v21, 4  ;;  %v6499_v8 = vld [vmem:[%s8035_s2 + $0x138] sm:$0xff]  }
 0x214   : > { %6245 = vmatprep.subr.bf16.mxu0 %v7743_v60  ;;  %v7801_v55 = vrot.slane %v4171_v59, 4  ;;  %v4819_v0 = vrot.slane %v4817_v51, 5  ;;  %v4830_v13 = vrot.slane %v4828_v32, 4  ;;  %v4831_v7 = vshll.u32 %v4787_v17, 16  ;;  %v6500_v32 = vld [vmem:[%s8035_s2 + $0x140] sm:$0xff]  }
 0x215   : > { %6138 = vmatmul.mubr.bf16.gmra.mrb[12].mxu1 %v6488_v38  ;;  %v4216_v38 = vshll.u32 %v7779_v52, 16  ;;  %v4806_v36 = vor.u32 %v4805_v2, %v4802_v46  ;;  %v4240_v33 = vrot.slane %v4238_v18, 5  ;;  %v4811_v22 = vrot.slane %v4809_v41, 5 }
 0x216   : > { %6146 = vmatpush3.bf16.msra.mxu1 %v6489_v20  ;;  %6157 = vmatprep.mubr.bf16.mxu1 %v5599_v53  ;;  %v5728_v20 = vcombine.low %v7789_v15, %v7771_v57  ;;  %v4814_v53 = vshrl.u32 %v4785_v40, 16  ;;  %v4845_v39 = vshll.u32 %v4789_v5, 16  ;;  %v4825_v40 = vrot.slane %v4823_v54, 5  ;;  %v7847_v54 = vld [vmem:[#allocation3 + $0x44] sm:$0x1] }
 0x217   : > { %6147 = vmatprep.subr.bf16.mxu1 %v6491_v45  ;;  %6246 = vmatpush3.bf16.msra.mxu0 %v7743_v60  ;;  %v4837_v11 = vshll.u32 %v7745_v19, 16  ;;  %v4223_v51 = vrot.slane %v4221_v35, 4  ;;  %v4226_v18 = vrot.slane %v4224_v23, 5  ;;  %v4200_v46 = vrot.slane %v4199_v44, 4 }
 0x218   : > { %6247 = vmatprep.subr.bf16.mxu0 %v7761_v43  ;;  %v4816_v59 = vrot.slane %v4814_v53, 4  ;;  %v4847_v6 = vrot.slane %v4845_v39, 5  ;;  %v4851_v53 = vshll.u32 %v7732_v9, 16  ;;  %v4218_v2 = vrot.slane %v4216_v38, 5 }
 0x219   : > { %v4191_v35 = vsel %vm6706_vm9, %v7809_v58, %v7803_v24  ;;  %v4177_v57 = vsel %vm6706_vm9, %v7801_v55, %v7791_v14  ;;  %v4227_v15 = vor.u32 %v4226_v18, %v4223_v51  ;;  %v4403_v24 = vld [vmem:[#allocation3 + $0x10] sm:$0xe] }
 0x21a   : > { %6148 = vmatpush3.bf16.msra.mxu1 %v6491_v45  ;;  %v4213_v45 = vor.u32 %v4212_v27, %v4209_v12  ;;  %v4842_v12 = vshrl.u32 %v4789_v5, 16  ;;  %v4820_v1 = vor.u32 %v4819_v0, %v4816_v59  ;;  %v7862_v59 = vld [vmem:[#allocation3 + $0x3c] sm:$0x1]  ;;  %v4839_v0 = vrot.slane %v4837_v11, 5 }
 0x21b   : > { %6149 = vmatprep.subr.bf16.mxu1 %v6493_v48  ;;  %6248 = vmatpush3.bf16.msra.mxu0 %v7761_v43  ;;  %v5600_v58 = vcombine.low %v4177_v57, %v4191_v35  ;;  %v4228_v39 = vrot.slane %v4227_v15, 4  ;;  %v4405_v35 = vld [vmem:[#allocation3 + $0x20] sm:$0xe]  ;;  %v4448_v15 = vrot.slane %v7779_v52, 5 }
 0x21c   : > { %6249 = vmatprep.subr.bf16.mxu0 %v7785_v4  ;;  %v4214_v3 = vrot.slane %v4213_v45, 4  ;;  %v4833_v45 = vrot.slane %v4831_v7, 5  ;;  %v4844_v21 = vrot.slane %v4842_v12, 4  ;;  %v4821_v17 = vrot.slane %v4820_v1, 4 }
 0x21d   : > { %v4230_v12 = vshll.u32 %v7862_v59, 16  ;;  %v5612_v1 = vrot.slane %v4403_v24, 9  ;;  %v4436_v24 = vrot.slane %v7749_v63, 5 }
 0x21e   : > { %6150 = vmatpush3.bf16.msra.mxu1 %v6493_v48  ;;  %v7828_v48 = vpop.f32.mrb[1].mxu1  ;;  %v4834_v5 = vor.u32 %v4833_v45, %v4830_v13  ;;  %v4826_v19 = vsel %vm6706_vm9, %v4821_v17, %v4825_v40  ;;  %v4848_v9 = vor.u32 %v4847_v6, %v4844_v21  ;;  %v4219_v38 = vsel %vm6706_vm9, %v4214_v3, %v4218_v2  ;;  %v6502_v40 = vld [vmem:[%s8035_s2 + $0x150] sm:$0xff]  }
 0x21f   : > { %6151 = vmatprep.subr.bf16.mxu1 %v6495_v29  ;;  %6250 = vmatpush3.bf16.msra.mxu0 %v7785_v4  ;;  %v7832_v27 = vpop.f32.mrb[2].mxu1  ;;  %v4853_v13 = vrot.slane %v4851_v53, 5  ;;  %v4205_v3 = vsel %vm6706_vm9, %v4200_v46, %v7805_v31  ;;  %v4432_v31 = vrot.slane %v7697_v47, 5  ;;  %v4428_v21 = vrot.slane %v7702_v34, 5  ;;  %v6503_v34 = vld [vmem:[%s8035_s2 + $0x158] sm:$0xff]  }
 0x220   : > { %6251 = vmatprep.subr.bf16.mxu0 %v7819_v62  ;;  %v7837_v49 = vpop.f32.mrb[3].mxu1  ;;  %v4835_v44 = vrot.slane %v4834_v5, 4  ;;  %v5601_v55 = vcombine.low %v4205_v3, %v4219_v38  ;;  %v4232_v17 = vrot.slane %v4230_v12, 5  ;;  %v4404_v38 = vld [vmem:[#allocation3 + $0x18] sm:$0xe] }
 0x221   : > { %v4433_v6 = vsel %vm7551_vm2, %v5612_v1, %v4432_v31  ;;  %v7901_v5 = vpop.f32.mrb[4].mxu1  ;;  %v4408_v12 = vld [vmem:[#allocation3 + $0x38] sm:$0xe]  ;;  %v4456_v1 = vrot.slane %v7847_v54, 5 }
 0x222   : > { %6152 = vmatpush3.bf16.msra.mxu1 %v6495_v29  ;;  %v4807_v29 = vrot.slane %v4806_v36, 4  ;;  %v4849_v36 = vrot.slane %v4848_v9, 4  ;;  %v4840_v7 = vsel %vm6706_vm9, %v4835_v44, %v4839_v0  ;;  %v4233_v47 = vsel %vm6706_vm9, %v4228_v39, %v4232_v17  ;;  %v7906_v46 = vpop.f32.mrb[5].mxu1  ;;  %v6506_v9 = vld [vmem:[%s8035_s2 + $0x170] sm:$0xff]   ;;  %v6507_v44 = vld [vmem:[%s8035_s2 + $0x178] sm:$0xff]  }
 0x223   : > { %6153 = vmatprep.subr.bf16.mxu1 %v6497_v28  ;;  %6252 = vmatpush3.bf16.msra.mxu0 %v7819_v62  ;;  %v7908_v2 = vpop.f32.mrb[6].mxu1  ;;  %v5614_v0 = vrot.slane %v4405_v35, 9  ;;  %v5617_v31 = vrot.slane %v4408_v12, 9  ;;  %v4452_v39 = vrot.slane %v7862_v59, 5  ;;  %v6511_v17 = vld [vmem:[#allocation3 + $0x10] ss:$8 sps:$4 sm:$0xff]  }
 0x224   : > { %v4812_v41 = vsel %vm6706_vm9, %v4807_v29, %v4811_v22  ;;  %v4854_v14 = vsel %vm6706_vm9, %v4849_v36, %v4853_v13  ;;  %v4440_v36 = vrot.slane %v7753_v56, 5  ;;  %v4406_v13 = vld [vmem:[#allocation3 + $0x28] sm:$0xe]  ;;  %v6513_v59 = vld [vmem:[%s8035_s2 + $0x1a0] sm:$0xff]   ;;  %v4791_v35 = vld [vmem:[#allocation3 + $0x30] sm:$0xf] }
 0x225   : > { %v7858_v23 = vcombine.low %v4812_v41, %v4826_v19  ;;  %v7880_v22 = vcombine.low %v4840_v7, %v4854_v14  ;;  %v6504_v41 = vld [vmem:[%s8035_s2 + $0x160] sm:$0xff]   ;;  %v7910_v19 = vpop.f32.mrb[7].mxu1  ;;  %v5615_v3 = vrot.slane %v4406_v13, 9  ;;  %v6527_v12 = vld [vmem:[%s8035_s2 + $0x1f8] sm:$0xff]  }
 0x226   : > { %6154 = vmatpush3.bf16.msra.mxu1 %v6497_v28  ;;  %6254 = vmatmul.mubr.bf16.vlgmr.msra.gmra.mrb[24].mxu0 %v5728_v20  ;;  %v4241_v28 = vor.u32 %v4240_v33, %v4237_v61  ;;  %v4244_v20 = vshll.u32 %v7847_v54, 16  ;;  %v6501_v61 = vld [vmem:[%s8035_s2 + $0x148] sm:$0xff]   ;;  %v4441_v7 = vsel %vm7551_vm2, %v5614_v0, %v4440_v36  ;;  %v4409_v14 = vld [vmem:[#allocation3 + $0x40] sm:$0xe]  ;;  %v6512_v54 = vld [vmem:[%s8035_s2 + $0x198] sm:$0xff]   ;;  %v4859_v0 = vshll.u32 %v4791_v35, 16 }
 0x227   : > { %6155 = vmatprep.subr.bf16.mxu1 %v6499_v8  ;;  %v4402_v33 = vld [vmem:[#allocation3 + $0x8] sm:$0xe] }
 0x228   : > { %v4246_v29 = vrot.slane %v4244_v20, 5  ;;  %v5611_v45 = vrot.slane %v4402_v33, 9  ;;  %v5613_v20 = vrot.slane %v4404_v38, 9  ;;  %v5618_v33 = vrot.slane %v4409_v14, 9  ;;  %v6525_v36 = vld [vmem:[%s8035_s2 + $0x1e8] sm:$0xff]  }
 0x229   : > { %v4856_v38 = vshrl.u32 %v4791_v35, 16 }
 0x22a   : > { %6156 = vmatpush3.bf16.msra.mxu1 %v6499_v8  ;;  %v4242_v8 = vrot.slane %v4241_v28, 4  ;;  %v4429_v51 = vsel %vm7551_vm2, %v5611_v45, %v4428_v21  ;;  %v4407_v28 = vld [vmem:[#allocation3 + $0x30] sm:$0xe]  ;;  %v4437_v52 = vsel %vm7551_vm2, %v5613_v20, %v4436_v24  ;;  %v4453_v45 = vsel %vm7551_vm2, %v5617_v31, %v4452_v39  ;;  %v4797_v24 = vld [vmem:[#allocation3 + $0x48] sm:$0xf] }
 0x22b   : > { %6165 = vmatprep.subr.bf16.mxu1 %v6500_v32  ;;  %v5635_v18 = vcombine.low %v4429_v51, %v4433_v6  ;;  %v5616_v57 = vrot.slane %v4407_v28, 9  ;;  %v5636_v63 = vcombine.low %v4437_v52, %v4441_v7  ;;  %v6515_v6 = vld [vmem:[%s8035_s2 + $0x1b0] sm:$0xff]   ;;  %v6517_v51 = vld [vmem:[#allocation3 + $0x20] ss:$8 sps:$4 sm:$0xff]   ;;  %v4861_v20 = vrot.slane %v4859_v0, 5 }
 0x22c   : > { %v4247_v11 = vsel %vm6706_vm9, %v4242_v8, %v4246_v29  ;;  %v6510_v29 = vld [vmem:[%s8035_s2 + $0x190] sm:$0xff]   ;;  %v6524_v28 = vld [vmem:[%s8035_s2 + $0x1e0] sm:$0xff]   ;;  %v4898_v52 = vshrl.u32 %v4797_v24, 16 }
 0x22d   : > { %6158 = vmatmul.mubr.bf16.vlgmr.msra.gmra.mrb[8].mxu1 %v5600_v58  ;;  %v5602_v53 = vcombine.low %v4233_v47, %v4247_v11  ;;  %v6508_v58 = vld [vmem:[%s8035_s2 + $0x180] sm:$0xff]   ;;  %v4449_v56 = vsel %vm7551_vm2, %v5616_v57, %v4448_v15  ;;  %v6514_v11 = vld [vmem:[%s8035_s2 + $0x1a8] sm:$0xff]   ;;  %v6516_v47 = vld [vmem:[%s8035_s2 + $0x1b8] sm:$0xff]   ;;  %v4858_v15 = vrot.slane %v4856_v38, 4 }
 0x22e   : > { %6161 = vmatprep.mubr.bf16.mxu1 %v5601_v55  ;;  %6166 = vmatpush3.bf16.msra.mxu1 %v6500_v32  ;;  %v6505_v32 = vld [vmem:[%s8035_s2 + $0x168] sm:$0xff]   ;;  %v4792_v7 = vld [vmem:[#allocation3 + $0x34] sm:$0x1]  ;;  %v4900_v39 = vrot.slane %v4898_v52, 4 }
 0x22f   : > { %6167 = vmatprep.subr.bf16.mxu1 %v6501_v61  ;;  %v5107_v0 = vrot.slane %v4792_v7, 5 }
 0x232   : > { %6168 = vmatpush3.bf16.msra.mxu1 %v6501_v61  ;;  %v4444_v61 = vrot.slane %v7755_v30, 5  ;;  %v6509_v30 = vld [vmem:[%s8035_s2 + $0x188] sm:$0xff]  }
 0x233   : > { %6169 = vmatprep.subr.bf16.mxu1 %v6502_v40 }
 0x234   : > { %v4445_v55 = vsel %vm7551_vm2, %v5615_v3, %v4444_v61 }
 0x235   : > { %6162 = vmatmul.mubr.bf16.gmra.mrb[12].mxu1 %v5602_v53  ;;  %v5637_v8 = vcombine.low %v4445_v55, %v4449_v56  ;;  %v6518_v53 = vld [vmem:[%s8035_s2 + $0x1c0] sm:$0xff]   ;;  %v4862_v55 = vor.u32 %v4861_v20, %v4858_v15 }
 0x236   : > { %6170 = vmatpush3.bf16.msra.mxu1 %v6502_v40  ;;  %6181 = vmatprep.mubr.bf16.mxu1 %v5635_v18  ;;  %v4457_v40 = vsel %vm7551_vm2, %v5618_v33, %v4456_v1  ;;  %v6519_v18 = vld [vmem:[#allocation3 + $0x30] ss:$8 sps:$4 sm:$0xff]  }
 0x237   : > { %6171 = vmatprep.subr.bf16.mxu1 %v6503_v34  ;;  %v5638_v21 = vcombine.low %v4453_v45, %v4457_v40  ;;  %v4863_v40 = vrot.slane %v4862_v55, 4 }
 0x23a   : > { %6172 = vmatpush3.bf16.msra.mxu1 %v6503_v34  ;;  %v6520_v34 = vld [vmem:[%s8035_s2 + $0x1c8] sm:$0xff]  }
 0x23b   : > { %6173 = vmatprep.subr.bf16.mxu1 %v6504_v41 }
 0x23e   : > { %6174 = vmatpush3.bf16.msra.mxu1 %v6504_v41  ;;  %v6522_v41 = vld [vmem:[%s8035_s2 + $0x1d0] sm:$0xff]  }
 0x23f   : > { %6175 = vmatprep.subr.bf16.mxu1 %v6505_v32 }
 0x242   : > { %6176 = vmatpush3.bf16.msra.mxu1 %v6505_v32  ;;  %v6521_v32 = vld [vmem:[#allocation3 + $0x40] ss:$8 sps:$4 sm:$0xff]  }
 0x243   : > { %6177 = vmatprep.subr.bf16.mxu1 %v6506_v9 }
 0x246   : > { %6178 = vmatpush3.bf16.msra.mxu1 %v6506_v9  ;;  %v6523_v9 = vld [vmem:[%s8035_s2 + $0x1d8] sm:$0xff]  }
 0x247   : > { %6179 = vmatprep.subr.bf16.mxu1 %v6507_v44 }
 0x24a   : > { %6180 = vmatpush3.bf16.msra.mxu1 %v6507_v44  ;;  %v4793_v44 = vld [vmem:[#allocation3 + $0x38] sm:$0xf] }
 0x24b   : > { %6189 = vmatprep.subr.bf16.mxu1 %v6508_v58  ;;  %v4870_v13 = vshrl.u32 %v4793_v44, 16  ;;  %v4873_v57 = vshll.u32 %v4793_v44, 16  ;;  %v5070_v44 = vld [vmem:[#allocation3 + $0x38] sm:$0xe] }
 0x24d   : > { %6182 = vmatmul.mubr.bf16.vlgmr.msra.gmra.mrb[8].mxu1 %v5636_v63  ;;  %v4872_v3 = vrot.slane %v4870_v13, 4  ;;  %v4875_v61 = vrot.slane %v4873_v57, 5  ;;  %v4901_v63 = vshll.u32 %v4797_v24, 16  ;;  %v5708_v13 = vrot.slane %v5070_v44, 9 }
 0x24e   : > { %6185 = vmatprep.mubr.bf16.mxu1 %v5637_v8  ;;  %6190 = vmatpush3.bf16.msra.mxu1 %v6508_v58  ;;  %v6526_v58 = vld [vmem:[%s8035_s2 + $0x1f0] sm:$0xff]   ;;  %v4865_v8 = vshll.u32 %v4792_v7, 16 }
 0x24f   : > { %6191 = vmatprep.subr.bf16.mxu1 %v6509_v30  ;;  %v4876_v33 = vor.u32 %v4875_v61, %v4872_v3 }
 0x252   : > { %6192 = vmatpush3.bf16.msra.mxu1 %v6509_v30  ;;  %v4794_v30 = vld [vmem:[#allocation3 + $0x3c] sm:$0x1] }
 0x253   : > { %6193 = vmatprep.subr.bf16.mxu1 %v6510_v29  ;;  %v4879_v45 = vshll.u32 %v4794_v30, 16  ;;  %v5111_v57 = vrot.slane %v4794_v30, 5 }
 0x255   : > { %6186 = vmatmul.mubr.bf16.gmra.mrb[12].mxu1 %v5638_v21  ;;  %v4867_v21 = vrot.slane %v4865_v8, 5 }
 0x256   : > { %6194 = vmatpush3.bf16.msra.mxu1 %v6510_v29  ;;  %6205 = vmatprep.mubr.bf16.mxu1 %v6511_v17  ;;  %v4903_v29 = vrot.slane %v4901_v63, 5  ;;  %v4796_v17 = vld [vmem:[#allocation3 + $0x44] sm:$0x1] }
 0x257   : > { %6195 = vmatprep.subr.bf16.mxu1 %v6512_v54 }
 0x25a   : > { %6196 = vmatpush3.bf16.msra.mxu1 %v6512_v54  ;;  %v4877_v54 = vrot.slane %v4876_v33, 4 }
 0x25b   : > { %6197 = vmatprep.subr.bf16.mxu1 %v6513_v59 }
 0x25e   : > { %6198 = vmatpush3.bf16.msra.mxu1 %v6513_v59  ;;  %v4798_v59 = vld [vmem:[#allocation3 + $0x4c] sm:$0x1] }
 0x25f   : > { %6199 = vmatprep.subr.bf16.mxu1 %v6514_v11  ;;  %v5119_v3 = vrot.slane %v4798_v59, 5 }
 0x262   : > { %6200 = vmatpush3.bf16.msra.mxu1 %v6514_v11 }
 0x263   : > { %6201 = vmatprep.subr.bf16.mxu1 %v6515_v6 }
 0x266   : > { %6202 = vmatpush3.bf16.msra.mxu1 %v6515_v6  ;;  %v4904_v6 = vor.u32 %v4903_v29, %v4900_v39 }
 0x267   : > { %6203 = vmatprep.subr.bf16.mxu1 %v6516_v47 }
 0x268   : > { %v4905_v35 = vrot.slane %v4904_v6, 4 }
 0x26a   : > { %6204 = vmatpush3.bf16.msra.mxu1 %v6516_v47  ;;  %v4907_v47 = vshll.u32 %v4798_v59, 16 }
 0x26b   : > { %6213 = vmatprep.subr.bf16.mxu1 %v6518_v53 }
 0x26d   : > { %6206 = vmatmul.mubr.bf16.vlgmr.msra.gmra.mrb[8].mxu1 %v6517_v51  ;;  %v4881_v51 = vrot.slane %v4879_v45, 5 }
 0x26e   : > { %6209 = vmatprep.mubr.bf16.mxu1 %v6519_v18  ;;  %6214 = vmatpush3.bf16.msra.mxu1 %v6518_v53  ;;  %v4868_v53 = vsel %vm6706_vm9, %v4863_v40, %v4867_v21  ;;  %v5069_v18 = vld [vmem:[#allocation3 + $0x30] sm:$0xe] }
 0x26f   : > { %6215 = vmatprep.subr.bf16.mxu1 %v6520_v34  ;;  %v5707_v38 = vrot.slane %v5069_v18, 9 }
 0x272   : > { %6216 = vmatpush3.bf16.msra.mxu1 %v6520_v34  ;;  %v4893_v34 = vshll.u32 %v4796_v17, 16 }
 0x273   : > { %6217 = vmatprep.subr.bf16.mxu1 %v6522_v41 }
 0x275   : > { %6210 = vmatmul.mubr.bf16.gmra.mrb[12].mxu1 %v6521_v32 }
 0x276   : > { %6218 = vmatpush3.bf16.msra.mxu1 %v6522_v41  ;;  %6229 = vmatprep.mubr.bf16.mxu1 %v7858_v23  ;;  %v4795_v23 = vld [vmem:[#allocation3 + $0x40] sm:$0xf]  ;;  %v4882_v41 = vsel %vm6706_vm9, %v4877_v54, %v4881_v51 }
 0x277   : > { %6219 = vmatprep.subr.bf16.mxu1 %v6523_v9  ;;  %v4884_v56 = vshrl.u32 %v4795_v23, 16  ;;  %v4887_v14 = vshll.u32 %v4795_v23, 16  ;;  %v5693_v32 = vcombine.low %v4868_v53, %v4882_v41  ;;  %v5108_v23 = vsel %vm7551_vm2, %v5707_v38, %v5107_v0 }
 0x279   : > { %v4886_v1 = vrot.slane %v4884_v56, 4  ;;  %v4889_v31 = vrot.slane %v4887_v14, 5 }
 0x27a   : > { %6220 = vmatpush3.bf16.msra.mxu1 %v6523_v9 }
 0x27b   : > { %6221 = vmatprep.subr.bf16.mxu1 %v6524_v28  ;;  %v4890_v11 = vor.u32 %v4889_v31, %v4886_v1 }
 0x27d   : > { %v4891_v9 = vrot.slane %v4890_v11, 4 }
 0x27e   : > { %6222 = vmatpush3.bf16.msra.mxu1 %v6524_v28  ;;  %v4909_v28 = vrot.slane %v4907_v47, 5 }
 0x27f   : > { %6223 = vmatprep.subr.bf16.mxu1 %v6525_v36 }
 0x280   : > { %v4910_v20 = vsel %vm6706_vm9, %v4905_v35, %v4909_v28 }
 0x282   : > { %6224 = vmatpush3.bf16.msra.mxu1 %v6525_v36  ;;  %v4895_v36 = vrot.slane %v4893_v34, 5 }
 0x283   : > { %6225 = vmatprep.subr.bf16.mxu1 %v6526_v58 }
 0x284   : > { %v4896_v15 = vsel %vm6706_vm9, %v4891_v9, %v4895_v36 }
 0x286   : > { %6226 = vmatpush3.bf16.msra.mxu1 %v6526_v58  ;;  %v5115_v58 = vrot.slane %v4796_v17, 5 }
 0x287   : > { %6227 = vmatprep.subr.bf16.mxu1 %v6527_v12 }
 0x28a   : > { %6228 = vmatpush3.bf16.msra.mxu1 %v6527_v12 }
 0x28b   : > { %6261 = vmatprep.subr.bf16.mxu1 %v7670_v10 }
 0x28d   : > { %6230 = vmatmul.mubr.bf16.vlgmr.msra.gmra.mrb[8].mxu1 %v7880_v22  ;;  %v5694_v22 = vcombine.low %v4896_v15, %v4910_v20 }
 0x28e   : > { %6233 = vmatprep.mubr.bf16.mxu1 %v5693_v32  ;;  %6269 = vmatpush3.bf16.msra.mxu1 %v7670_v10  ;;  %v5112_v10 = vsel %vm7551_vm2, %v5708_v13, %v5111_v57 }
 0x28f   : > { %6262 = vmatprep.subr.bf16.mxu1 %v7688_v50  ;;  %v5729_v24 = vcombine.low %v5108_v23, %v5112_v10 }
 0x292   : > { %6270 = vmatpush3.bf16.msra.mxu1 %v7688_v50  ;;  %v5072_v50 = vld [vmem:[#allocation3 + $0x48] sm:$0xe] }
 0x293   : > { %6263 = vmatprep.subr.bf16.mxu1 %v7712_v26  ;;  %v5710_v61 = vrot.slane %v5072_v50, 9 }
 0x295   : > { %6234 = vmatmul.mubr.bf16.gmra.mrb[12].mxu1 %v5694_v22 }
 0x296   : > { %6271 = vmatpush3.bf16.msra.mxu1 %v7712_v26  ;;  %6257 = vmatprep.mubr.bf16.mxu1 %v5729_v24  ;;  %v5709_v26 = vrot.slane %v5071_v42, 9 }
 0x297   : > { %6264 = vmatprep.subr.bf16.mxu1 %v7729_v25 }
 0x29a   : > { %6272 = vmatpush3.bf16.msra.mxu1 %v7729_v25  ;;  %v5116_v25 = vsel %vm7551_vm2, %v5709_v26, %v5115_v58 }
 0x29b   : > { %6265 = vmatprep.subr.bf16.mxu1 %v7743_v60 }
 0x29e   : > { %6273 = vmatpush3.bf16.msra.mxu1 %v7743_v60  ;;  %v5120_v60 = vsel %vm7551_vm2, %v5710_v61, %v5119_v3 }
 0x29f   : > { %6266 = vmatprep.subr.bf16.mxu1 %v7761_v43  ;;  %v5730_v7 = vcombine.low %v5116_v25, %v5120_v60 }
 0x2a2   : > { %6274 = vmatpush3.bf16.msra.mxu1 %v7761_v43 }
 0x2a3   : > { %6267 = vmatprep.subr.bf16.mxu1 %v7785_v4 }
 0x2a6   : > { %6275 = vmatpush3.bf16.msra.mxu1 %v7785_v4 }
 0x2a7   : > { %6268 = vmatprep.subr.bf16.mxu1 %v7819_v62 }
 0x2aa   : > { %6276 = vmatpush3.bf16.msra.mxu1 %v7819_v62 }
 0x2ad   : > { %6258 = vmatmul.mubr.bf16.vlgmr.msra.gmra.mrb[12].mxu1 %v5730_v7 }
 0x2b8   : > { %v6053_v43 = vpop.f32.mrb[8].mxu0 }
 0x2b9   : > { %v3433_v56 = vadd.f32 %v7824_v37, %v6053_v43  ;;  %v3340_v14 = vpop.f32.mrb[9].mxu0 }
 0x2ba   : > { %v3425_v52 = vadd.f32 %v7828_v48, %v3340_v14  ;;  %v6054_v63 = vpop.f32.mrb[10].mxu0 }
 0x2bb   : > { %v3436_v4 = vadd.f32 %v7832_v27, %v6054_v63  ;;  %v3343_v55 = vpop.f32.mrb[11].mxu0 }
 0x2bc   : > { %v3428_v30 = vadd.f32 %v7837_v49, %v3343_v55 }
 0x2c8   : > { %v6057_v12 = vpop.f32.mrb[12].mxu0 }
 0x2c9   : > { %v3449_v16 = vadd.f32 %v7901_v5, %v6057_v12  ;;  %v3356_v8 = vpop.f32.mrb[13].mxu0 }
 0x2ca   : > { %v3441_v62 = vadd.f32 %v7906_v46, %v3356_v8  ;;  %v6058_v33 = vpop.f32.mrb[14].mxu0 }
 0x2cb   : > { %v3452_v1 = vadd.f32 %v7908_v2, %v6058_v33  ;;  %v3359_v31 = vpop.f32.mrb[15].mxu0 }
 0x2cc   : > { %v3444_v37 = vadd.f32 %v7910_v19, %v3359_v31 }
 0x2d8   : > { %v6087_v39 = vpop.f32.mrb[16].mxu0 }
 0x2d9   : > { %v3731_v48 = vadd.f32 %v6087_v39, %v3433_v56  ;;  %v3698_v29 = vpop.f32.mrb[17].mxu0 }
 0x2da   : > { %v3729_v40 = vadd.f32 %v3698_v29, %v3425_v52  ;;  %v6088_v27 = vpop.f32.mrb[18].mxu0 }
 0x2db   : > { %v3732_v45 = vadd.f32 %v6088_v27, %v3436_v4  ;;  %v3701_v49 = vpop.f32.mrb[19].mxu0 }
 0x2dc   : > { %v3730_v21 = vadd.f32 %v3701_v49, %v3428_v30 }
 0x2e0   : > { %v6091_v54 = vpop.f32.mrb[20].mxu0 }
 0x2e1   : > { %v3735_v5 = vadd.f32 %v6091_v54, %v3449_v16  ;;  %v3714_v17 = vpop.f32.mrb[21].mxu0 }
 0x2e2   : > { %v3733_v59 = vadd.f32 %v3714_v17, %v3441_v62  ;;  %v6092_v46 = vpop.f32.mrb[22].mxu0 }
 0x2e3   : > { %v3736_v11 = vadd.f32 %v6092_v46, %v3452_v1  ;;  %v3717_v6 = vpop.f32.mrb[23].mxu0 }
 0x2e4   : > { %v3734_v2 = vadd.f32 %v3717_v6, %v3444_v37 }
 0x2f9   : > { %v6255_v47 = vpop.f32.mrb[24].mxu0 }
 0x2fa   : > { %v5236_v53 = vpop.f32.mrb[25].mxu0 }
 0x2fb   : > { %v6256_v19 = vpop.f32.mrb[26].mxu0 }
 0x2fc   : > { %v5239_v51 = vpop.f32.mrb[27].mxu0 }
 0x360   : > { %v6231_v34 = vpop.f32.mrb[8].mxu1 }
 0x361   : > { %v6279_v18 = vadd.f32 %v6231_v34, %v3731_v48  ;;  %v5026_v41 = vpop.f32.mrb[9].mxu1 }
 0x362   : > { %v6283_v32 = vadd.f32 %v5026_v41, %v3729_v40  ;;  %v6232_v9 = vpop.f32.mrb[10].mxu1 }
 0x363   : > { %v6280_v35 = vadd.f32 %v6279_v18, %v6255_v47  ;;  %v6287_v28 = vadd.f32 %v6232_v9, %v3732_v45  ;;  %v5029_v44 = vpop.f32.mrb[11].mxu1 }
 0x364   : > { %v6284_v38 = vadd.f32 %v6283_v32, %v5236_v53  ;;  %v6291_v0 = vadd.f32 %v5029_v44, %v3730_v21 }
 0x365   : > { %5277 = vst [vmem:[%s305_s16 + $0x10] sm:$0xff] %v6280_v35  ;;  %v6288_v36 = vadd.f32 %v6287_v28, %v6256_v19 }
 0x366   : > { %5275 = vst [vmem:[%s305_s16] sm:$0xff] %v6284_v38  ;;  %v6292_v13 = vadd.f32 %v6291_v0, %v5239_v51 }
 0x367   : > { %5278 = vst [vmem:[%s305_s16 + $0x18] sm:$0xff] %v6288_v36 }
 0x368   : > { %5276 = vst [vmem:[%s305_s16 + $0x8] sm:$0xff] %v6292_v13 }
 0x380   : > { %v6259_v57 = vpop.f32.mrb[12].mxu1 }
 0x381   : > { %v6295_v15 = vadd.f32 %v6259_v57, %v3735_v5  ;;  %v5252_v20 = vpop.f32.mrb[13].mxu1 }
 0x382   : > { %v6298_v23 = vadd.f32 %v5252_v20, %v3733_v59  ;;  %v6260_v22 = vpop.f32.mrb[14].mxu1 }
 0x383   : > { %5281 = vst [vmem:[%s305_s16 + $0x30] sm:$0xff] %v6295_v15  ;;  %v6301_v10 = vadd.f32 %v6260_v22, %v3736_v11  ;;  %v5255_v24 = vpop.f32.mrb[15].mxu1 }
 0x384   : > { %5279 = vst [vmem:[%s305_s16 + $0x20] sm:$0xff] %v6298_v23  ;;  %v6304_v42 = vadd.f32 %v5255_v24, %v3734_v2 }
 0x385   : > { %5282 = vst [vmem:[%s305_s16 + $0x38] sm:$0xff] %v6301_v10 }
 0x386   : > { %5280 = vst [vmem:[%s305_s16 + $0x28] sm:$0xff] %v6304_v42 }
 0x387 PF: > { %s18_s27 = sadd.s32 1, %s6538_s27  }
 0x388   : > { %p15_p4 = scmp.ge.s32.totalorder %s18_s27, 4  }
 0x38a   :  { %17 = sbr.rel (!%p15_p4) target bundleno = 1 (0x1), region = 107 }

</bundles_post_ra>
